<compile_context>
chip_gen: v7x
topology: tpu7x:2x2x1
jax: 0.10.0
libtpu: 0.0.40
codegen_flags: <defaults>
</compile_context>

<pallas_src>
import functools
import math

import jax
import jax.numpy as jnp
from jax import lax
from jax.experimental import pallas as pl
from jax.experimental.pallas import tpu as pltpu

INF = 1e10
EPS = 1e-6


# ----------------------------- in-kernel helpers -----------------------------

def _layernorm_f32(y, gamma, beta, eps=EPS):
    """torch-style: gamma * (y - mean) / (std_unbiased + eps) + beta (last axis, f32)."""
    d = y.shape[-1]
    mean = jnp.mean(y, axis=-1, keepdims=True)
    var = jnp.sum((y - mean) ** 2, axis=-1, keepdims=True) / (d - 1)  # unbiased, like torch.std
    # One reciprocal per row (EUP) instead of D divides per row (VALU).
    inv = pl.reciprocal(jnp.sqrt(var) + eps, approx=False)
    return gamma * (y - mean) * inv + beta


def _softmax_rows_f32(s):
    """Numerically-stable softmax over the last axis, f32, reciprocal-multiply normalize."""
    m = jnp.max(s, axis=-1, keepdims=True)
    e = jnp.exp(s - m)
    return e * pl.reciprocal(jnp.sum(e, axis=-1, keepdims=True), approx=False)


def _mha_packed(x_q, x_kv, wq, wk, wv, wo, attn_ref, *,
                bblk, n_heads, inv_scale, causal, mm_dtype):
    """Multi-head attention for a packed batch block.

    x_q: (bblk*Tq, D) f32, x_kv: (bblk*Tk, D) f32. Weights in mm_dtype.
    Per-head outputs are written into lane slices of attn_ref (bblk*Tq, D) scratch,
    then one full-depth (K = D) out-projection is applied.  Returns (bblk*Tq, D) f32.
    """
    m, d = x_q.shape
    tq = m // bblk
    tk = x_kv.shape[0] // bblk
    dh = d // n_heads

    # Dense full-D projections with the batch packed into the MXU M dim.
    # 1/scale folded into q (one multiply instead of per-score divides).
    q = jnp.dot(x_q.astype(mm_dtype), wq, preferred_element_type=jnp.float32) * inv_scale
    k = jnp.dot(x_kv.astype(mm_dtype), wk, preferred_element_type=jnp.float32)
    v = jnp.dot(x_kv.astype(mm_dtype), wv, preferred_element_type=jnp.float32)

    neg_mask = None
    if causal:
        # Built once, reused by every head.  Reference subtracts INF from UNSCALED
        # scores then divides by scale; with q pre-scaled, subtract INF*inv_scale.
        row = lax.broadcasted_iota(jnp.int32, (tq, tk), 0)
        col = lax.broadcasted_iota(jnp.int32, (tq, tk), 1)
        neg_mask = jnp.where(col > row,
                             jnp.float32(INF) * jnp.float32(inv_scale),
                             jnp.float32(0.0))

    for h in range(n_heads):  # n_heads static & small -> unrolled
        sl = slice(h * dh, (h + 1) * dh)
        qh = q[:, sl].reshape(bblk, tq, dh).astype(mm_dtype)
        kh = k[:, sl].reshape(bblk, tk, dh).astype(mm_dtype)
        vh = v[:, sl].reshape(bblk, tk, dh).astype(mm_dtype)
        # Contraction over the LAST dims of q/k: no explicit kh transpose materialized.
        s = jnp.einsum("bqd,bkd->bqk", qh, kh, preferred_element_type=jnp.float32)
        if causal:
            s = s - neg_mask
        p = _softmax_rows_f32(s)
        oh = jnp.einsum("bqk,bkd->bqd", p.astype(mm_dtype), vh,
                        preferred_element_type=jnp.float32)
        # Lane-slice write into the head-concat scratch (no lane-axis concatenate).
        attn_ref[:, sl] = oh.reshape(m, dh).astype(attn_ref.dtype)

    # Single K=D out-projection of the concatenated heads.
    return jnp.dot(attn_ref[...], wo, preferred_element_type=jnp.float32)


# ------------------------------- fused kernel --------------------------------

def decoder_layer_kernel(x_ref, enc_ref,
                         s_wq, s_wk, s_wv, s_wo, s_g, s_b,
                         c_wq, c_wk, c_wv, c_wo, c_g, c_b,
                         f_w1, f_b1, f_w2, f_b2, f_g, f_b,
                         o_ref, attn_scr, *, bblk, n_heads, inv_scale, mm_dtype):
    """Self-attn + cross-attn + FFN residual blocks fused, one packed batch block.

    The (Bblk*T, D) activation never leaves the chip between the three sub-blocks.
    LayerNorm / softmax / residual math in f32; MXU operands in mm_dtype.
    """
    _, t, d = x_ref.shape
    s_len = enc_ref.shape[1]
    m = bblk * t

    x = x_ref[...].astype(jnp.float32).reshape(m, d)
    enc = enc_ref[...].astype(jnp.float32).reshape(bblk * s_len, d)

    # 1) causal self-attention residual block
    attn = _mha_packed(x, x, s_wq[...], s_wk[...], s_wv[...], s_wo[...], attn_scr,
                       bblk=bblk, n_heads=n_heads, inv_scale=inv_scale,
                       causal=True, mm_dtype=mm_dtype)
    x = _layernorm_f32(x + attn, s_g[...], s_b[...])

    # 2) cross-attention residual block (keys/values from the encoder)
    attn = _mha_packed(x, enc, c_wq[...], c_wk[...], c_wv[...], c_wo[...], attn_scr,
                       bblk=bblk, n_heads=n_heads, inv_scale=inv_scale,
                       causal=False, mm_dtype=mm_dtype)
    x = _layernorm_f32(x + attn, c_g[...], c_b[...])

    # 3) feed-forward residual block
    h = jnp.dot(x.astype(mm_dtype), f_w1[...], preferred_element_type=jnp.float32) + f_b1[...]
    h = jnp.maximum(h, 0.0)
    ff = jnp.dot(h.astype(mm_dtype), f_w2[...], preferred_element_type=jnp.float32) + f_b2[...]
    x = _layernorm_f32(x + ff, f_g[...], f_b[...])

    o_ref[...] = x.reshape(bblk, t, d).astype(o_ref.dtype)


# ------------------------------ host wrapper ----------------------------------

def _const_spec(shape, single_buffer):
    """Whole-array block, constant index map (weights fetched once).

    With single_buffer, request a single pipeline buffer (constant blocks never change,
    so the default second buffer is pure VMEM waste).
    """
    idx = lambda i: tuple(0 for _ in shape)
    if single_buffer:
        return pl.BlockSpec(shape, idx, pipeline_mode=pl.Buffered(1))
    return pl.BlockSpec(shape, idx)


def _pick_batch_block(b, t, target_rows=256):
    """Largest divisor of b such that bblk*t <= target_rows (fills the MXU M dim)."""
    best = 1
    for cand in range(1, b + 1):
        if b % cand == 0 and cand * t <= max(target_rows, t):
            best = cand
    return best


def decoder_layer(x, encoding, params, *, n_heads, d_model,
                  matmul_dtype=jnp.bfloat16, batch_block=None):
    b, t, d = x.shape
    _, s, _ = encoding.shape
    assert d == d_model and d_model > 1 and d_model % n_heads == 0
    d_hidden = params["ffn"]["w1"].shape[1]
    inv_scale = 1.0 / math.sqrt(d_model)  # MultiHead is constructed with d_key == d_model

    bblk = batch_block if batch_block is not None else _pick_batch_block(b, t)
    assert b % bblk == 0
    mm_dtype = jnp.dtype(matmul_dtype)

    ps, pc, pf = params["self"], params["cross"], params["ffn"]

    def wcast(w):
        # Matmul-path weights shipped in mm_dtype (halves HBM traffic & VMEM vs f32).
        # In production, store the weights in bf16 to avoid the per-call convert.
        return w.astype(mm_dtype)

    def f32(w):
        return w.astype(jnp.float32)

    args = (x, encoding,
            wcast(ps["wq"]), wcast(ps["wk"]), wcast(ps["wv"]), wcast(ps["wo"]),
            f32(ps["gamma"]), f32(ps["beta"]),
            wcast(pc["wq"]), wcast(pc["wk"]), wcast(pc["wv"]), wcast(pc["wo"]),
            f32(pc["gamma"]), f32(pc["beta"]),
            wcast(pf["w1"]), f32(pf["b1"]), wcast(pf["w2"]), f32(pf["b2"]),
            f32(pf["gamma"]), f32(pf["beta"]))

    kernel = functools.partial(decoder_layer_kernel, bblk=bblk, n_heads=n_heads,
                               inv_scale=inv_scale, mm_dtype=mm_dtype)

    def build(single_buffer_weights):
        wspec = functools.partial(_const_spec, single_buffer=single_buffer_weights)
        wb = mm_dtype.itemsize
        m = bblk * t
        weight_bufs = 1 if single_buffer_weights else 2
        # VMEM budget estimate: weights (x pipeline buffers) + double-buffered activation
        # blocks + head-concat scratch + f32 temporaries (q/k/v, scores, probs, FFN
        # hidden, residuals), with a 2x margin; clamp to [32 MiB, 64 MiB] (v7x physical).
        est = ((8 * d * d + 2 * d * d_hidden) * wb * weight_bufs          # matmul weights
               + (6 * d + d_hidden) * 4 * weight_bufs                     # biases / LN params
               + 2 * (m * d + bblk * s * d + m * d) * x.dtype.itemsize    # x / enc / out blocks
               + m * d * wb                                               # head-concat scratch
               + (6 * m * d + 4 * bblk * t * max(t, s) + 3 * m * d_hidden) * 4)
        vmem_limit = int(min(max(2 * est, 32 << 20), 64 << 20))

        return pl.pallas_call(
            kernel,
            out_shape=jax.ShapeDtypeStruct((b, t, d), x.dtype),
            grid=(b // bblk,),
            in_specs=[
                pl.BlockSpec((bblk, t, d), lambda i: (i, 0, 0)),   # x (batch-packed block)
                pl.BlockSpec((bblk, s, d), lambda i: (i, 0, 0)),   # encoder output
                # self-attention params
                wspec((d, d)), wspec((d, d)), wspec((d, d)), wspec((d, d)),
                wspec((1, d)), wspec((1, d)),
                # cross-attention params
                wspec((d, d)), wspec((d, d)), wspec((d, d)), wspec((d, d)),
                wspec((1, d)), wspec((1, d)),
                # feed-forward params
                wspec((d, d_hidden)), wspec((1, d_hidden)),
                wspec((d_hidden, d)), wspec((1, d)),
                wspec((1, d)), wspec((1, d)),
            ],
            out_specs=pl.BlockSpec((bblk, t, d), lambda i: (i, 0, 0)),
            scratch_shapes=[pltpu.VMEM((bblk * t, d), mm_dtype)],   # head-concat scratch
            compiler_params=pltpu.CompilerParams(
                dimension_semantics=("parallel",),   # batch blocks independent -> both TCs
                vmem_limit_bytes=vmem_limit),
        )

    try:
        return build(True)(*args)
    except Exception:
        # Fallback for Pallas builds that reject BlockSpec pipeline_mode / Buffered(1).
        return build(False)(*args)


# ------------------------- deterministic parameter init ----------------------

def init_params(key, d_model, d_hidden, dtype=jnp.float32):
    ks = jax.random.split(key, 10)

    def lin(k, din, dout):
        return (jax.random.normal(k, (din, dout), jnp.float32) / jnp.sqrt(din)).astype(dtype)

    def ln_params():
        return {"gamma": jnp.ones((1, d_model), dtype),
                "beta": jnp.zeros((1, d_model), dtype)}

    return {
        "self": dict(wq=lin(ks[0], d_model, d_model), wk=lin(ks[1], d_model, d_model),
                     wv=lin(ks[2], d_model, d_model), wo=lin(ks[3], d_model, d_model),
                     **ln_params()),
        "cross": dict(wq=lin(ks[4], d_model, d_model), wk=lin(ks[5], d_model, d_model),
                      wv=lin(ks[6], d_model, d_model), wo=lin(ks[7], d_model, d_model),
                      **ln_params()),
        "ffn": dict(w1=lin(ks[8], d_model, d_hidden),
                    b1=jnp.zeros((1, d_hidden), dtype),
                    w2=lin(ks[9], d_hidden, d_model),
                    b2=jnp.zeros((1, d_model), dtype),
                    **ln_params()),
    }


# ------------------------------ pure-JAX reference ---------------------------

def ref_decoder_layer(x, enc, params, *, n_heads, d_model):
    scale = math.sqrt(d_model)

    def ln(y, p):
        d = y.shape[-1]
        mean = y.mean(-1, keepdims=True)
        std = jnp.sqrt(((y - mean) ** 2).sum(-1, keepdims=True) / (d - 1))
        return p["gamma"][0] * (y - mean) / (std + EPS) + p["beta"][0]

    def mha(q_in, kv_in, p, causal):
        q = q_in @ p["wq"]; k = kv_in @ p["wk"]; v = kv_in @ p["wv"]
        dh = d_model // n_heads
        tq, tk = q.shape[1], k.shape[1]
        tri = jnp.triu(jnp.ones((tq, tk), jnp.float32), 1) * INF
        outs = []
        for h in range(n_heads):
            qh, kh, vh = (t[..., h * dh:(h + 1) * dh] for t in (q, k, v))
            s = jnp.einsum("btd,bsd->bts", qh, kh)
            if causal:
                s = s - tri[None]
            pm = jax.nn.softmax(s / scale, -1)
            outs.append(jnp.einsum("bts,bsd->btd", pm, vh))
        return jnp.concatenate(outs, -1) @ p["wo"]

    x1 = ln(x + mha(x, x, params["self"], True), params["self"])
    x2 = ln(x1 + mha(x1, enc, params["cross"], False), params["cross"])
    h = jnp.maximum(x2 @ params["ffn"]["w1"] + params["ffn"]["b1"][0], 0.0)
    ff = h @ params["ffn"]["w2"] + params["ffn"]["b2"][0]
    return ln(x2 + ff, params["ffn"])


# ----------------------------------- main -------------------------------------

if __name__ == "__main__":
    B, T, S = 2, 8, 8          # batch, decoder seq len, encoder seq len
    d_model, d_hidden, n_heads = 32, 64, 4

    key = jax.random.PRNGKey(0)
    kx, kenc, kp = jax.random.split(key, 3)
    x = jax.random.normal(kx, (B, T, d_model), jnp.float32)
    encoding = jax.random.normal(kenc, (B, S, d_model), jnp.float32)
    params = init_params(kp, d_model, d_hidden)

    ref = ref_decoder_layer(x, encoding, params, n_heads=n_heads, d_model=d_model)

    # f32 matmul path: tight parity with the f32 reference.
    out_f32 = decoder_layer(x, encoding, params, n_heads=n_heads, d_model=d_model,
                            matmul_dtype=jnp.float32)
    out_f32 = jax.block_until_ready(out_f32)
    assert out_f32.shape == (B, T, d_model)
    assert jnp.allclose(out_f32, ref, rtol=1e-4, atol=1e-4), "f32 kernel mismatch vs reference"

    # bf16 MXU path (default, production): f32 accumulation + f32 softmax/LayerNorm,
    # so only operand-rounding differences remain -> loose tolerance check.
    out_bf16 = decoder_layer(x, encoding, params, n_heads=n_heads, d_model=d_model,
                             matmul_dtype=jnp.bfloat16)
    out_bf16 = jax.block_until_ready(out_bf16)
    assert out_bf16.shape == (B, T, d_model)
    assert jnp.allclose(out_bf16, ref, rtol=1e-1, atol=1e-1), "bf16 kernel mismatch vs reference"

    print("KERNEL_OK")
</pallas_src>

<mosaic_0001>
module attributes {stable_mosaic.version = 11 : i64} {
  func.func @decoder_layer_kernel(%arg0: i32, %arg1: memref<2x8x32xf32, #tpu.memory_space<vmem>>, %arg2: memref<2x8x32xf32, #tpu.memory_space<vmem>>, %arg3: memref<32x32xf32, #tpu.memory_space<vmem>>, %arg4: memref<32x32xf32, #tpu.memory_space<vmem>>, %arg5: memref<32x32xf32, #tpu.memory_space<vmem>>, %arg6: memref<32x32xf32, #tpu.memory_space<vmem>>, %arg7: memref<1x32xf32, #tpu.memory_space<vmem>>, %arg8: memref<1x32xf32, #tpu.memory_space<vmem>>, %arg9: memref<32x32xf32, #tpu.memory_space<vmem>>, %arg10: memref<32x32xf32, #tpu.memory_space<vmem>>, %arg11: memref<32x32xf32, #tpu.memory_space<vmem>>, %arg12: memref<32x32xf32, #tpu.memory_space<vmem>>, %arg13: memref<1x32xf32, #tpu.memory_space<vmem>>, %arg14: memref<1x32xf32, #tpu.memory_space<vmem>>, %arg15: memref<32x64xf32, #tpu.memory_space<vmem>>, %arg16: memref<1x64xf32, #tpu.memory_space<vmem>>, %arg17: memref<64x32xf32, #tpu.memory_space<vmem>>, %arg18: memref<1x32xf32, #tpu.memory_space<vmem>>, %arg19: memref<1x32xf32, #tpu.memory_space<vmem>>, %arg20: memref<1x32xf32, #tpu.memory_space<vmem>>, %arg21: memref<2x8x32xf32, #tpu.memory_space<vmem>>, %arg22: memref<16x32xf32, #tpu.memory_space<vmem>>) attributes {dimension_semantics = [#tpu.dimension_semantics<parallel>], iteration_bounds = array<i64: 1>, scalar_prefetch = 0 : i64, scratch_operands = 1 : i64, tpu.core_type = #tpu.core_type<tc>, window_params = [{transform_indices = @transform_0, window_bounds = array<i64: 2, 8, 32>}, {transform_indices = @transform_1, window_bounds = array<i64: 2, 8, 32>}, {pipeline_mode = #tpu.pipeline_mode<synchronous>, transform_indices = @transform_2, window_bounds = array<i64: 32, 32>}, {pipeline_mode = #tpu.pipeline_mode<synchronous>, transform_indices = @transform_3, window_bounds = array<i64: 32, 32>}, {pipeline_mode = #tpu.pipeline_mode<synchronous>, transform_indices = @transform_4, window_bounds = array<i64: 32, 32>}, {pipeline_mode = #tpu.pipeline_mode<synchronous>, transform_indices = @transform_5, window_bounds = array<i64: 32, 32>}, {pipeline_mode = #tpu.pipeline_mode<synchronous>, transform_indices = @transform_6, window_bounds = array<i64: 1, 32>}, {pipeline_mode = #tpu.pipeline_mode<synchronous>, transform_indices = @transform_7, window_bounds = array<i64: 1, 32>}, {pipeline_mode = #tpu.pipeline_mode<synchronous>, transform_indices = @transform_8, window_bounds = array<i64: 32, 32>}, {pipeline_mode = #tpu.pipeline_mode<synchronous>, transform_indices = @transform_9, window_bounds = array<i64: 32, 32>}, {pipeline_mode = #tpu.pipeline_mode<synchronous>, transform_indices = @transform_10, window_bounds = array<i64: 32, 32>}, {pipeline_mode = #tpu.pipeline_mode<synchronous>, transform_indices = @transform_11, window_bounds = array<i64: 32, 32>}, {pipeline_mode = #tpu.pipeline_mode<synchronous>, transform_indices = @transform_12, window_bounds = array<i64: 1, 32>}, {pipeline_mode = #tpu.pipeline_mode<synchronous>, transform_indices = @transform_13, window_bounds = array<i64: 1, 32>}, {pipeline_mode = #tpu.pipeline_mode<synchronous>, transform_indices = @transform_14, window_bounds = array<i64: 32, 64>}, {pipeline_mode = #tpu.pipeline_mode<synchronous>, transform_indices = @transform_15, window_bounds = array<i64: 1, 64>}, {pipeline_mode = #tpu.pipeline_mode<synchronous>, transform_indices = @transform_16, window_bounds = array<i64: 64, 32>}, {pipeline_mode = #tpu.pipeline_mode<synchronous>, transform_indices = @transform_17, window_bounds = array<i64: 1, 32>}, {pipeline_mode = #tpu.pipeline_mode<synchronous>, transform_indices = @transform_18, window_bounds = array<i64: 1, 32>}, {pipeline_mode = #tpu.pipeline_mode<synchronous>, transform_indices = @transform_19, window_bounds = array<i64: 1, 32>}, {transform_indices = @transform_20, window_bounds = array<i64: 2, 8, 32>}]} {
    %c0 = arith.constant 0 : index
    %c0_0 = arith.constant 0 : index
    %c0_1 = arith.constant 0 : index
    %0 = vector.load %arg1[%c0, %c0_0, %c0_1] : memref<2x8x32xf32, #tpu.memory_space<vmem>>, vector<2x8x32xf32>
    %1 = vector.shape_cast %0 : vector<2x8x32xf32> to vector<16x32xf32>
    %c0_2 = arith.constant 0 : index
    %c0_3 = arith.constant 0 : index
    %c0_4 = arith.constant 0 : index
    %2 = vector.load %arg2[%c0_2, %c0_3, %c0_4] : memref<2x8x32xf32, #tpu.memory_space<vmem>>, vector<2x8x32xf32>
    %3 = vector.shape_cast %2 : vector<2x8x32xf32> to vector<16x32xf32>
    %c0_5 = arith.constant 0 : index
    %c0_6 = arith.constant 0 : index
    %4 = vector.load %arg3[%c0_5, %c0_6] : memref<32x32xf32, #tpu.memory_space<vmem>>, vector<32x32xf32>
    %c0_7 = arith.constant 0 : index
    %c0_8 = arith.constant 0 : index
    %5 = vector.load %arg4[%c0_7, %c0_8] : memref<32x32xf32, #tpu.memory_space<vmem>>, vector<32x32xf32>
    %c0_9 = arith.constant 0 : index
    %c0_10 = arith.constant 0 : index
    %6 = vector.load %arg5[%c0_9, %c0_10] : memref<32x32xf32, #tpu.memory_space<vmem>>, vector<32x32xf32>
    %c0_11 = arith.constant 0 : index
    %c0_12 = arith.constant 0 : index
    %7 = vector.load %arg6[%c0_11, %c0_12] : memref<32x32xf32, #tpu.memory_space<vmem>>, vector<32x32xf32>
    %cst = arith.constant dense<0.000000e+00> : vector<16x32xf32>
    %8 = tpu.matmul %1, %4, %cst {dimension_numbers = #tpu.dot_dimension_numbers<[1], [0], [0], [1], [0, 0, 1, 1], [], []>} : vector<16x32xf32>, vector<32x32xf32>, vector<16x32xf32> -> vector<16x32xf32>
    %cst_13 = arith.constant 0.176776692 : f32
    %9 = vector.broadcast %cst_13 : f32 to vector<16x32xf32>
    %10 = arith.mulf %8, %9 : vector<16x32xf32>
    %cst_14 = arith.constant dense<0.000000e+00> : vector<16x32xf32>
    %11 = tpu.matmul %1, %5, %cst_14 {dimension_numbers = #tpu.dot_dimension_numbers<[1], [0], [0], [1], [0, 0, 1, 1], [], []>} : vector<16x32xf32>, vector<32x32xf32>, vector<16x32xf32> -> vector<16x32xf32>
    %cst_15 = arith.constant dense<0.000000e+00> : vector<16x32xf32>
    %12 = tpu.matmul %1, %6, %cst_15 {dimension_numbers = #tpu.dot_dimension_numbers<[1], [0], [0], [1], [0, 0, 1, 1], [], []>} : vector<16x32xf32>, vector<32x32xf32>, vector<16x32xf32> -> vector<16x32xf32>
    %13 = tpu.iota {dimensions = array<i32: 0>} : vector<8x8xi32>
    %14 = tpu.iota {dimensions = array<i32: 1>} : vector<8x8xi32>
    %15 = arith.cmpi sgt, %14, %13 : vector<8x8xi32>
    %cst_16 = arith.constant 1.000000e+10 : f32
    %cst_17 = arith.constant 0.176776692 : f32
    %16 = arith.mulf %cst_16, %cst_17 : f32
    %cst_18 = arith.constant 0.000000e+00 : f32
    %17 = vector.broadcast %16 : f32 to vector<8x8xf32>
    %18 = vector.broadcast %cst_18 : f32 to vector<8x8xf32>
    %19 = arith.select %15, %17, %18 : vector<8x8xi1>, vector<8x8xf32>
    %20 = vector.extract_strided_slice %10 {offsets = [0, 0], sizes = [16, 8], strides = [1, 1]} : vector<16x32xf32> to vector<16x8xf32>
    %21 = vector.shape_cast %20 : vector<16x8xf32> to vector<2x8x8xf32>
    %22 = vector.extract_strided_slice %11 {offsets = [0, 0], sizes = [16, 8], strides = [1, 1]} : vector<16x32xf32> to vector<16x8xf32>
    %23 = vector.shape_cast %22 : vector<16x8xf32> to vector<2x8x8xf32>
    %24 = vector.extract_strided_slice %12 {offsets = [0, 0], sizes = [16, 8], strides = [1, 1]} : vector<16x32xf32> to vector<16x8xf32>
    %25 = vector.shape_cast %24 : vector<16x8xf32> to vector<2x8x8xf32>
    "tpu.trace_start"() <{level = 10 : i32, message = "bqd,bkd->bqk"}> : () -> ()
    %cst_19 = arith.constant dense<0.000000e+00> : vector<2x8x8xf32>
    %26 = tpu.matmul %21, %23, %cst_19 {dimension_numbers = #tpu.dot_dimension_numbers<[2], [2], [1], [1], [0, 0, 0, 1, 1, 1], [0], [0]>} : vector<2x8x8xf32>, vector<2x8x8xf32>, vector<2x8x8xf32> -> vector<2x8x8xf32>
    "tpu.trace_stop"() : () -> ()
    %27 = vector.shape_cast %19 : vector<8x8xf32> to vector<1x8x8xf32>
    %28 = vector.broadcast %27 : vector<1x8x8xf32> to vector<2x8x8xf32>
    %29 = arith.subf %26, %28 : vector<2x8x8xf32>
    %cst_20 = arith.constant dense<0xFF800000> : vector<2x8xf32>
    %30 = vector.multi_reduction <maximumf>, %29, %cst_20 [2] : vector<2x8x8xf32> to vector<2x8xf32>
    %31 = vector.shape_cast %30 : vector<2x8xf32> to vector<2x8x1xf32>
    %32 = vector.broadcast %31 : vector<2x8x1xf32> to vector<2x8x8xf32>
    %33 = arith.subf %29, %32 : vector<2x8x8xf32>
    %34 = math.exp %33 : vector<2x8x8xf32>
    %cst_21 = arith.constant dense<0.000000e+00> : vector<2x8xf32>
    %35 = vector.multi_reduction <add>, %34, %cst_21 [2] : vector<2x8x8xf32> to vector<2x8xf32>
    %36 = vector.shape_cast %35 : vector<2x8xf32> to vector<2x8x1xf32>
    %37 = tpu.reciprocal %36 : vector<2x8x1xf32> -> vector<2x8x1xf32>
    %38 = vector.broadcast %37 : vector<2x8x1xf32> to vector<2x8x8xf32>
    %39 = arith.mulf %34, %38 : vector<2x8x8xf32>
    "tpu.trace_start"() <{level = 10 : i32, message = "bqk,bkd->bqd"}> : () -> ()
    %cst_22 = arith.constant dense<0.000000e+00> : vector<2x8x8xf32>
    %40 = tpu.matmul %39, %25, %cst_22 {dimension_numbers = #tpu.dot_dimension_numbers<[2], [1], [1], [2], [0, 0, 0, 1, 1, 2], [0], [0]>} : vector<2x8x8xf32>, vector<2x8x8xf32>, vector<2x8x8xf32> -> vector<2x8x8xf32>
    "tpu.trace_stop"() : () -> ()
    %41 = vector.shape_cast %40 : vector<2x8x8xf32> to vector<16x8xf32>
    %c0_23 = arith.constant 0 : index
    %c0_24 = arith.constant 0 : index
    %42 = vector.load %arg22[%c0_23, %c0_24] : memref<16x32xf32, #tpu.memory_space<vmem>>, vector<16x8xf32>
    tpu.vector_store %arg22[%c0_23, %c0_24], %41 {strides = array<i32>} : memref<16x32xf32, #tpu.memory_space<vmem>>, vector<16x8xf32>,
    %43 = vector.extract_strided_slice %10 {offsets = [0, 8], sizes = [16, 8], strides = [1, 1]} : vector<16x32xf32> to vector<16x8xf32>
    %44 = vector.shape_cast %43 : vector<16x8xf32> to vector<2x8x8xf32>
    %45 = vector.extract_strided_slice %11 {offsets = [0, 8], sizes = [16, 8], strides = [1, 1]} : vector<16x32xf32> to vector<16x8xf32>
    %46 = vector.shape_cast %45 : vector<16x8xf32> to vector<2x8x8xf32>
    %47 = vector.extract_strided_slice %12 {offsets = [0, 8], sizes = [16, 8], strides = [1, 1]} : vector<16x32xf32> to vector<16x8xf32>
    %48 = vector.shape_cast %47 : vector<16x8xf32> to vector<2x8x8xf32>
    "tpu.trace_start"() <{level = 10 : i32, message = "bqd,bkd->bqk"}> : () -> ()
    %cst_25 = arith.constant dense<0.000000e+00> : vector<2x8x8xf32>
    %49 = tpu.matmul %44, %46, %cst_25 {dimension_numbers = #tpu.dot_dimension_numbers<[2], [2], [1], [1], [0, 0, 0, 1, 1, 1], [0], [0]>} : vector<2x8x8xf32>, vector<2x8x8xf32>, vector<2x8x8xf32> -> vector<2x8x8xf32>
    "tpu.trace_stop"() : () -> ()
    %50 = vector.shape_cast %19 : vector<8x8xf32> to vector<1x8x8xf32>
    %51 = vector.broadcast %50 : vector<1x8x8xf32> to vector<2x8x8xf32>
    %52 = arith.subf %49, %51 : vector<2x8x8xf32>
    %cst_26 = arith.constant dense<0xFF800000> : vector<2x8xf32>
    %53 = vector.multi_reduction <maximumf>, %52, %cst_26 [2] : vector<2x8x8xf32> to vector<2x8xf32>
    %54 = vector.shape_cast %53 : vector<2x8xf32> to vector<2x8x1xf32>
    %55 = vector.broadcast %54 : vector<2x8x1xf32> to vector<2x8x8xf32>
    %56 = arith.subf %52, %55 : vector<2x8x8xf32>
    %57 = math.exp %56 : vector<2x8x8xf32>
    %cst_27 = arith.constant dense<0.000000e+00> : vector<2x8xf32>
    %58 = vector.multi_reduction <add>, %57, %cst_27 [2] : vector<2x8x8xf32> to vector<2x8xf32>
    %59 = vector.shape_cast %58 : vector<2x8xf32> to vector<2x8x1xf32>
    %60 = tpu.reciprocal %59 : vector<2x8x1xf32> -> vector<2x8x1xf32>
    %61 = vector.broadcast %60 : vector<2x8x1xf32> to vector<2x8x8xf32>
    %62 = arith.mulf %57, %61 : vector<2x8x8xf32>
    "tpu.trace_start"() <{level = 10 : i32, message = "bqk,bkd->bqd"}> : () -> ()
    %cst_28 = arith.constant dense<0.000000e+00> : vector<2x8x8xf32>
    %63 = tpu.matmul %62, %48, %cst_28 {dimension_numbers = #tpu.dot_dimension_numbers<[2], [1], [1], [2], [0, 0, 0, 1, 1, 2], [0], [0]>} : vector<2x8x8xf32>, vector<2x8x8xf32>, vector<2x8x8xf32> -> vector<2x8x8xf32>
    "tpu.trace_stop"() : () -> ()
    %64 = vector.shape_cast %63 : vector<2x8x8xf32> to vector<16x8xf32>
    %c0_29 = arith.constant 0 : index
    %c8 = arith.constant 8 : index
    %65 = vector.load %arg22[%c0_29, %c8] : memref<16x32xf32, #tpu.memory_space<vmem>>, vector<16x8xf32>
    tpu.vector_store %arg22[%c0_29, %c8], %64 {strides = array<i32>} : memref<16x32xf32, #tpu.memory_space<vmem>>, vector<16x8xf32>,
    %66 = vector.extract_strided_slice %10 {offsets = [0, 16], sizes = [16, 8], strides = [1, 1]} : vector<16x32xf32> to vector<16x8xf32>
    %67 = vector.shape_cast %66 : vector<16x8xf32> to vector<2x8x8xf32>
    %68 = vector.extract_strided_slice %11 {offsets = [0, 16], sizes = [16, 8], strides = [1, 1]} : vector<16x32xf32> to vector<16x8xf32>
    %69 = vector.shape_cast %68 : vector<16x8xf32> to vector<2x8x8xf32>
    %70 = vector.extract_strided_slice %12 {offsets = [0, 16], sizes = [16, 8], strides = [1, 1]} : vector<16x32xf32> to vector<16x8xf32>
    %71 = vector.shape_cast %70 : vector<16x8xf32> to vector<2x8x8xf32>
    "tpu.trace_start"() <{level = 10 : i32, message = "bqd,bkd->bqk"}> : () -> ()
    %cst_30 = arith.constant dense<0.000000e+00> : vector<2x8x8xf32>
    %72 = tpu.matmul %67, %69, %cst_30 {dimension_numbers = #tpu.dot_dimension_numbers<[2], [2], [1], [1], [0, 0, 0, 1, 1, 1], [0], [0]>} : vector<2x8x8xf32>, vector<2x8x8xf32>, vector<2x8x8xf32> -> vector<2x8x8xf32>
    "tpu.trace_stop"() : () -> ()
    %73 = vector.shape_cast %19 : vector<8x8xf32> to vector<1x8x8xf32>
    %74 = vector.broadcast %73 : vector<1x8x8xf32> to vector<2x8x8xf32>
    %75 = arith.subf %72, %74 : vector<2x8x8xf32>
    %cst_31 = arith.constant dense<0xFF800000> : vector<2x8xf32>
    %76 = vector.multi_reduction <maximumf>, %75, %cst_31 [2] : vector<2x8x8xf32> to vector<2x8xf32>
    %77 = vector.shape_cast %76 : vector<2x8xf32> to vector<2x8x1xf32>
    %78 = vector.broadcast %77 : vector<2x8x1xf32> to vector<2x8x8xf32>
    %79 = arith.subf %75, %78 : vector<2x8x8xf32>
    %80 = math.exp %79 : vector<2x8x8xf32>
    %cst_32 = arith.constant dense<0.000000e+00> : vector<2x8xf32>
    %81 = vector.multi_reduction <add>, %80, %cst_32 [2] : vector<2x8x8xf32> to vector<2x8xf32>
    %82 = vector.shape_cast %81 : vector<2x8xf32> to vector<2x8x1xf32>
    %83 = tpu.reciprocal %82 : vector<2x8x1xf32> -> vector<2x8x1xf32>
    %84 = vector.broadcast %83 : vector<2x8x1xf32> to vector<2x8x8xf32>
    %85 = arith.mulf %80, %84 : vector<2x8x8xf32>
    "tpu.trace_start"() <{level = 10 : i32, message = "bqk,bkd->bqd"}> : () -> ()
    %cst_33 = arith.constant dense<0.000000e+00> : vector<2x8x8xf32>
    %86 = tpu.matmul %85, %71, %cst_33 {dimension_numbers = #tpu.dot_dimension_numbers<[2], [1], [1], [2], [0, 0, 0, 1, 1, 2], [0], [0]>} : vector<2x8x8xf32>, vector<2x8x8xf32>, vector<2x8x8xf32> -> vector<2x8x8xf32>
    "tpu.trace_stop"() : () -> ()
    %87 = vector.shape_cast %86 : vector<2x8x8xf32> to vector<16x8xf32>
    %c0_34 = arith.constant 0 : index
    %c16 = arith.constant 16 : index
    %88 = vector.load %arg22[%c0_34, %c16] : memref<16x32xf32, #tpu.memory_space<vmem>>, vector<16x8xf32>
    tpu.vector_store %arg22[%c0_34, %c16], %87 {strides = array<i32>} : memref<16x32xf32, #tpu.memory_space<vmem>>, vector<16x8xf32>,
    %89 = vector.extract_strided_slice %10 {offsets = [0, 24], sizes = [16, 8], strides = [1, 1]} : vector<16x32xf32> to vector<16x8xf32>
    %90 = vector.shape_cast %89 : vector<16x8xf32> to vector<2x8x8xf32>
    %91 = vector.extract_strided_slice %11 {offsets = [0, 24], sizes = [16, 8], strides = [1, 1]} : vector<16x32xf32> to vector<16x8xf32>
    %92 = vector.shape_cast %91 : vector<16x8xf32> to vector<2x8x8xf32>
    %93 = vector.extract_strided_slice %12 {offsets = [0, 24], sizes = [16, 8], strides = [1, 1]} : vector<16x32xf32> to vector<16x8xf32>
    %94 = vector.shape_cast %93 : vector<16x8xf32> to vector<2x8x8xf32>
    "tpu.trace_start"() <{level = 10 : i32, message = "bqd,bkd->bqk"}> : () -> ()
    %cst_35 = arith.constant dense<0.000000e+00> : vector<2x8x8xf32>
    %95 = tpu.matmul %90, %92, %cst_35 {dimension_numbers = #tpu.dot_dimension_numbers<[2], [2], [1], [1], [0, 0, 0, 1, 1, 1], [0], [0]>} : vector<2x8x8xf32>, vector<2x8x8xf32>, vector<2x8x8xf32> -> vector<2x8x8xf32>
    "tpu.trace_stop"() : () -> ()
    %96 = vector.shape_cast %19 : vector<8x8xf32> to vector<1x8x8xf32>
    %97 = vector.broadcast %96 : vector<1x8x8xf32> to vector<2x8x8xf32>
    %98 = arith.subf %95, %97 : vector<2x8x8xf32>
    %cst_36 = arith.constant dense<0xFF800000> : vector<2x8xf32>
    %99 = vector.multi_reduction <maximumf>, %98, %cst_36 [2] : vector<2x8x8xf32> to vector<2x8xf32>
    %100 = vector.shape_cast %99 : vector<2x8xf32> to vector<2x8x1xf32>
    %101 = vector.broadcast %100 : vector<2x8x1xf32> to vector<2x8x8xf32>
    %102 = arith.subf %98, %101 : vector<2x8x8xf32>
    %103 = math.exp %102 : vector<2x8x8xf32>
    %cst_37 = arith.constant dense<0.000000e+00> : vector<2x8xf32>
    %104 = vector.multi_reduction <add>, %103, %cst_37 [2] : vector<2x8x8xf32> to vector<2x8xf32>
    %105 = vector.shape_cast %104 : vector<2x8xf32> to vector<2x8x1xf32>
    %106 = tpu.reciprocal %105 : vector<2x8x1xf32> -> vector<2x8x1xf32>
    %107 = vector.broadcast %106 : vector<2x8x1xf32> to vector<2x8x8xf32>
    %108 = arith.mulf %103, %107 : vector<2x8x8xf32>
    "tpu.trace_start"() <{level = 10 : i32, message = "bqk,bkd->bqd"}> : () -> ()
    %cst_38 = arith.constant dense<0.000000e+00> : vector<2x8x8xf32>
    %109 = tpu.matmul %108, %94, %cst_38 {dimension_numbers = #tpu.dot_dimension_numbers<[2], [1], [1], [2], [0, 0, 0, 1, 1, 2], [0], [0]>} : vector<2x8x8xf32>, vector<2x8x8xf32>, vector<2x8x8xf32> -> vector<2x8x8xf32>
    "tpu.trace_stop"() : () -> ()
    %110 = vector.shape_cast %109 : vector<2x8x8xf32> to vector<16x8xf32>
    %c0_39 = arith.constant 0 : index
    %c24 = arith.constant 24 : index
    %111 = vector.load %arg22[%c0_39, %c24] : memref<16x32xf32, #tpu.memory_space<vmem>>, vector<16x8xf32>
    tpu.vector_store %arg22[%c0_39, %c24], %110 {strides = array<i32>} : memref<16x32xf32, #tpu.memory_space<vmem>>, vector<16x8xf32>,
    %c0_40 = arith.constant 0 : index
    %c0_41 = arith.constant 0 : index
    %112 = vector.load %arg22[%c0_40, %c0_41] : memref<16x32xf32, #tpu.memory_space<vmem>>, vector<16x32xf32>
    %cst_42 = arith.constant dense<0.000000e+00> : vector<16x32xf32>
    %113 = tpu.matmul %112, %7, %cst_42 {dimension_numbers = #tpu.dot_dimension_numbers<[1], [0], [0], [1], [0, 0, 1, 1], [], []>} : vector<16x32xf32>, vector<32x32xf32>, vector<16x32xf32> -> vector<16x32xf32>
    %114 = arith.addf %1, %113 : vector<16x32xf32>
    %c0_43 = arith.constant 0 : index
    %c0_44 = arith.constant 0 : index
    %115 = vector.load %arg7[%c0_43, %c0_44] : memref<1x32xf32, #tpu.memory_space<vmem>>, vector<1x32xf32>
    %c0_45 = arith.constant 0 : index
    %c0_46 = arith.constant 0 : index
    %116 = vector.load %arg8[%c0_45, %c0_46] : memref<1x32xf32, #tpu.memory_space<vmem>>, vector<1x32xf32>
    %cst_47 = arith.constant dense<0.000000e+00> : vector<16xf32>
    %117 = vector.multi_reduction <add>, %114, %cst_47 [1] : vector<16x32xf32> to vector<16xf32>
    %118 = vector.shape_cast %117 : vector<16xf32> to vector<16x1xf32>
    %cst_48 = arith.constant 3.200000e+01 : f32
    %119 = vector.broadcast %cst_48 : f32 to vector<16x1xf32>
    %120 = arith.divf %118, %119 : vector<16x1xf32>
    %121 = vector.broadcast %120 : vector<16x1xf32> to vector<16x32xf32>
    %122 = arith.subf %114, %121 : vector<16x32xf32>
    %123 = arith.mulf %122, %122 : vector<16x32xf32>
    %cst_49 = arith.constant dense<0.000000e+00> : vector<16xf32>
    %124 = vector.multi_reduction <add>, %123, %cst_49 [1] : vector<16x32xf32> to vector<16xf32>
    %125 = vector.shape_cast %124 : vector<16xf32> to vector<16x1xf32>
    %cst_50 = arith.constant 3.100000e+01 : f32
    %126 = vector.broadcast %cst_50 : f32 to vector<16x1xf32>
    %127 = arith.divf %125, %126 : vector<16x1xf32>
    %128 = math.sqrt %127 : vector<16x1xf32>
    %cst_51 = arith.constant 9.99999997E-7 : f32
    %129 = vector.broadcast %cst_51 : f32 to vector<16x1xf32>
    %130 = arith.addf %128, %129 : vector<16x1xf32>
    %131 = tpu.reciprocal %130 : vector<16x1xf32> -> vector<16x1xf32>
    %132 = vector.broadcast %120 : vector<16x1xf32> to vector<16x32xf32>
    %133 = arith.subf %114, %132 : vector<16x32xf32>
    %134 = vector.broadcast %115 : vector<1x32xf32> to vector<16x32xf32>
    %135 = arith.mulf %134, %133 : vector<16x32xf32>
    %136 = vector.broadcast %131 : vector<16x1xf32> to vector<16x32xf32>
    %137 = arith.mulf %135, %136 : vector<16x32xf32>
    %138 = vector.broadcast %116 : vector<1x32xf32> to vector<16x32xf32>
    %139 = arith.addf %137, %138 : vector<16x32xf32>
    %c0_52 = arith.constant 0 : index
    %c0_53 = arith.constant 0 : index
    %140 = vector.load %arg9[%c0_52, %c0_53] : memref<32x32xf32, #tpu.memory_space<vmem>>, vector<32x32xf32>
    %c0_54 = arith.constant 0 : index
    %c0_55 = arith.constant 0 : index
    %141 = vector.load %arg10[%c0_54, %c0_55] : memref<32x32xf32, #tpu.memory_space<vmem>>, vector<32x32xf32>
    %c0_56 = arith.constant 0 : index
    %c0_57 = arith.constant 0 : index
    %142 = vector.load %arg11[%c0_56, %c0_57] : memref<32x32xf32, #tpu.memory_space<vmem>>, vector<32x32xf32>
    %c0_58 = arith.constant 0 : index
    %c0_59 = arith.constant 0 : index
    %143 = vector.load %arg12[%c0_58, %c0_59] : memref<32x32xf32, #tpu.memory_space<vmem>>, vector<32x32xf32>
    %cst_60 = arith.constant dense<0.000000e+00> : vector<16x32xf32>
    %144 = tpu.matmul %139, %140, %cst_60 {dimension_numbers = #tpu.dot_dimension_numbers<[1], [0], [0], [1], [0, 0, 1, 1], [], []>} : vector<16x32xf32>, vector<32x32xf32>, vector<16x32xf32> -> vector<16x32xf32>
    %cst_61 = arith.constant 0.176776692 : f32
    %145 = vector.broadcast %cst_61 : f32 to vector<16x32xf32>
    %146 = arith.mulf %144, %145 : vector<16x32xf32>
    %cst_62 = arith.constant dense<0.000000e+00> : vector<16x32xf32>
    %147 = tpu.matmul %3, %141, %cst_62 {dimension_numbers = #tpu.dot_dimension_numbers<[1], [0], [0], [1], [0, 0, 1, 1], [], []>} : vector<16x32xf32>, vector<32x32xf32>, vector<16x32xf32> -> vector<16x32xf32>
    %cst_63 = arith.constant dense<0.000000e+00> : vector<16x32xf32>
    %148 = tpu.matmul %3, %142, %cst_63 {dimension_numbers = #tpu.dot_dimension_numbers<[1], [0], [0], [1], [0, 0, 1, 1], [], []>} : vector<16x32xf32>, vector<32x32xf32>, vector<16x32xf32> -> vector<16x32xf32>
    %149 = vector.extract_strided_slice %146 {offsets = [0, 0], sizes = [16, 8], strides = [1, 1]} : vector<16x32xf32> to vector<16x8xf32>
    %150 = vector.shape_cast %149 : vector<16x8xf32> to vector<2x8x8xf32>
    %151 = vector.extract_strided_slice %147 {offsets = [0, 0], sizes = [16, 8], strides = [1, 1]} : vector<16x32xf32> to vector<16x8xf32>
    %152 = vector.shape_cast %151 : vector<16x8xf32> to vector<2x8x8xf32>
    %153 = vector.extract_strided_slice %148 {offsets = [0, 0], sizes = [16, 8], strides = [1, 1]} : vector<16x32xf32> to vector<16x8xf32>
    %154 = vector.shape_cast %153 : vector<16x8xf32> to vector<2x8x8xf32>
    "tpu.trace_start"() <{level = 10 : i32, message = "bqd,bkd->bqk"}> : () -> ()
    %cst_64 = arith.constant dense<0.000000e+00> : vector<2x8x8xf32>
    %155 = tpu.matmul %150, %152, %cst_64 {dimension_numbers = #tpu.dot_dimension_numbers<[2], [2], [1], [1], [0, 0, 0, 1, 1, 1], [0], [0]>} : vector<2x8x8xf32>, vector<2x8x8xf32>, vector<2x8x8xf32> -> vector<2x8x8xf32>
    "tpu.trace_stop"() : () -> ()
    %cst_65 = arith.constant dense<0xFF800000> : vector<2x8xf32>
    %156 = vector.multi_reduction <maximumf>, %155, %cst_65 [2] : vector<2x8x8xf32> to vector<2x8xf32>
    %157 = vector.shape_cast %156 : vector<2x8xf32> to vector<2x8x1xf32>
    %158 = vector.broadcast %157 : vector<2x8x1xf32> to vector<2x8x8xf32>
    %159 = arith.subf %155, %158 : vector<2x8x8xf32>
    %160 = math.exp %159 : vector<2x8x8xf32>
    %cst_66 = arith.constant dense<0.000000e+00> : vector<2x8xf32>
    %161 = vector.multi_reduction <add>, %160, %cst_66 [2] : vector<2x8x8xf32> to vector<2x8xf32>
    %162 = vector.shape_cast %161 : vector<2x8xf32> to vector<2x8x1xf32>
    %163 = tpu.reciprocal %162 : vector<2x8x1xf32> -> vector<2x8x1xf32>
    %164 = vector.broadcast %163 : vector<2x8x1xf32> to vector<2x8x8xf32>
    %165 = arith.mulf %160, %164 : vector<2x8x8xf32>
    "tpu.trace_start"() <{level = 10 : i32, message = "bqk,bkd->bqd"}> : () -> ()
    %cst_67 = arith.constant dense<0.000000e+00> : vector<2x8x8xf32>
    %166 = tpu.matmul %165, %154, %cst_67 {dimension_numbers = #tpu.dot_dimension_numbers<[2], [1], [1], [2], [0, 0, 0, 1, 1, 2], [0], [0]>} : vector<2x8x8xf32>, vector<2x8x8xf32>, vector<2x8x8xf32> -> vector<2x8x8xf32>
    "tpu.trace_stop"() : () -> ()
    %167 = vector.shape_cast %166 : vector<2x8x8xf32> to vector<16x8xf32>
    %c0_68 = arith.constant 0 : index
    %c0_69 = arith.constant 0 : index
    %168 = vector.load %arg22[%c0_68, %c0_69] : memref<16x32xf32, #tpu.memory_space<vmem>>, vector<16x8xf32>
    tpu.vector_store %arg22[%c0_68, %c0_69], %167 {strides = array<i32>} : memref<16x32xf32, #tpu.memory_space<vmem>>, vector<16x8xf32>,
    %169 = vector.extract_strided_slice %146 {offsets = [0, 8], sizes = [16, 8], strides = [1, 1]} : vector<16x32xf32> to vector<16x8xf32>
    %170 = vector.shape_cast %169 : vector<16x8xf32> to vector<2x8x8xf32>
    %171 = vector.extract_strided_slice %147 {offsets = [0, 8], sizes = [16, 8], strides = [1, 1]} : vector<16x32xf32> to vector<16x8xf32>
    %172 = vector.shape_cast %171 : vector<16x8xf32> to vector<2x8x8xf32>
    %173 = vector.extract_strided_slice %148 {offsets = [0, 8], sizes = [16, 8], strides = [1, 1]} : vector<16x32xf32> to vector<16x8xf32>
    %174 = vector.shape_cast %173 : vector<16x8xf32> to vector<2x8x8xf32>
    "tpu.trace_start"() <{level = 10 : i32, message = "bqd,bkd->bqk"}> : () -> ()
    %cst_70 = arith.constant dense<0.000000e+00> : vector<2x8x8xf32>
    %175 = tpu.matmul %170, %172, %cst_70 {dimension_numbers = #tpu.dot_dimension_numbers<[2], [2], [1], [1], [0, 0, 0, 1, 1, 1], [0], [0]>} : vector<2x8x8xf32>, vector<2x8x8xf32>, vector<2x8x8xf32> -> vector<2x8x8xf32>
    "tpu.trace_stop"() : () -> ()
    %cst_71 = arith.constant dense<0xFF800000> : vector<2x8xf32>
    %176 = vector.multi_reduction <maximumf>, %175, %cst_71 [2] : vector<2x8x8xf32> to vector<2x8xf32>
    %177 = vector.shape_cast %176 : vector<2x8xf32> to vector<2x8x1xf32>
    %178 = vector.broadcast %177 : vector<2x8x1xf32> to vector<2x8x8xf32>
    %179 = arith.subf %175, %178 : vector<2x8x8xf32>
    %180 = math.exp %179 : vector<2x8x8xf32>
    %cst_72 = arith.constant dense<0.000000e+00> : vector<2x8xf32>
    %181 = vector.multi_reduction <add>, %180, %cst_72 [2] : vector<2x8x8xf32> to vector<2x8xf32>
    %182 = vector.shape_cast %181 : vector<2x8xf32> to vector<2x8x1xf32>
    %183 = tpu.reciprocal %182 : vector<2x8x1xf32> -> vector<2x8x1xf32>
    %184 = vector.broadcast %183 : vector<2x8x1xf32> to vector<2x8x8xf32>
    %185 = arith.mulf %180, %184 : vector<2x8x8xf32>
    "tpu.trace_start"() <{level = 10 : i32, message = "bqk,bkd->bqd"}> : () -> ()
    %cst_73 = arith.constant dense<0.000000e+00> : vector<2x8x8xf32>
    %186 = tpu.matmul %185, %174, %cst_73 {dimension_numbers = #tpu.dot_dimension_numbers<[2], [1], [1], [2], [0, 0, 0, 1, 1, 2], [0], [0]>} : vector<2x8x8xf32>, vector<2x8x8xf32>, vector<2x8x8xf32> -> vector<2x8x8xf32>
    "tpu.trace_stop"() : () -> ()
    %187 = vector.shape_cast %186 : vector<2x8x8xf32> to vector<16x8xf32>
    %c0_74 = arith.constant 0 : index
    %c8_75 = arith.constant 8 : index
    %188 = vector.load %arg22[%c0_74, %c8_75] : memref<16x32xf32, #tpu.memory_space<vmem>>, vector<16x8xf32>
    tpu.vector_store %arg22[%c0_74, %c8_75], %187 {strides = array<i32>} : memref<16x32xf32, #tpu.memory_space<vmem>>, vector<16x8xf32>,
    %189 = vector.extract_strided_slice %146 {offsets = [0, 16], sizes = [16, 8], strides = [1, 1]} : vector<16x32xf32> to vector<16x8xf32>
    %190 = vector.shape_cast %189 : vector<16x8xf32> to vector<2x8x8xf32>
    %191 = vector.extract_strided_slice %147 {offsets = [0, 16], sizes = [16, 8], strides = [1, 1]} : vector<16x32xf32> to vector<16x8xf32>
    %192 = vector.shape_cast %191 : vector<16x8xf32> to vector<2x8x8xf32>
    %193 = vector.extract_strided_slice %148 {offsets = [0, 16], sizes = [16, 8], strides = [1, 1]} : vector<16x32xf32> to vector<16x8xf32>
    %194 = vector.shape_cast %193 : vector<16x8xf32> to vector<2x8x8xf32>
    "tpu.trace_start"() <{level = 10 : i32, message = "bqd,bkd->bqk"}> : () -> ()
    %cst_76 = arith.constant dense<0.000000e+00> : vector<2x8x8xf32>
    %195 = tpu.matmul %190, %192, %cst_76 {dimension_numbers = #tpu.dot_dimension_numbers<[2], [2], [1], [1], [0, 0, 0, 1, 1, 1], [0], [0]>} : vector<2x8x8xf32>, vector<2x8x8xf32>, vector<2x8x8xf32> -> vector<2x8x8xf32>
    "tpu.trace_stop"() : () -> ()
    %cst_77 = arith.constant dense<0xFF800000> : vector<2x8xf32>
    %196 = vector.multi_reduction <maximumf>, %195, %cst_77 [2] : vector<2x8x8xf32> to vector<2x8xf32>
    %197 = vector.shape_cast %196 : vector<2x8xf32> to vector<2x8x1xf32>
    %198 = vector.broadcast %197 : vector<2x8x1xf32> to vector<2x8x8xf32>
    %199 = arith.subf %195, %198 : vector<2x8x8xf32>
    %200 = math.exp %199 : vector<2x8x8xf32>
    %cst_78 = arith.constant dense<0.000000e+00> : vector<2x8xf32>
    %201 = vector.multi_reduction <add>, %200, %cst_78 [2] : vector<2x8x8xf32> to vector<2x8xf32>
    %202 = vector.shape_cast %201 : vector<2x8xf32> to vector<2x8x1xf32>
    %203 = tpu.reciprocal %202 : vector<2x8x1xf32> -> vector<2x8x1xf32>
    %204 = vector.broadcast %203 : vector<2x8x1xf32> to vector<2x8x8xf32>
    %205 = arith.mulf %200, %204 : vector<2x8x8xf32>
    "tpu.trace_start"() <{level = 10 : i32, message = "bqk,bkd->bqd"}> : () -> ()
    %cst_79 = arith.constant dense<0.000000e+00> : vector<2x8x8xf32>
    %206 = tpu.matmul %205, %194, %cst_79 {dimension_numbers = #tpu.dot_dimension_numbers<[2], [1], [1], [2], [0, 0, 0, 1, 1, 2], [0], [0]>} : vector<2x8x8xf32>, vector<2x8x8xf32>, vector<2x8x8xf32> -> vector<2x8x8xf32>
    "tpu.trace_stop"() : () -> ()
    %207 = vector.shape_cast %206 : vector<2x8x8xf32> to vector<16x8xf32>
    %c0_80 = arith.constant 0 : index
    %c16_81 = arith.constant 16 : index
    %208 = vector.load %arg22[%c0_80, %c16_81] : memref<16x32xf32, #tpu.memory_space<vmem>>, vector<16x8xf32>
    tpu.vector_store %arg22[%c0_80, %c16_81], %207 {strides = array<i32>} : memref<16x32xf32, #tpu.memory_space<vmem>>, vector<16x8xf32>,
    %209 = vector.extract_strided_slice %146 {offsets = [0, 24], sizes = [16, 8], strides = [1, 1]} : vector<16x32xf32> to vector<16x8xf32>
    %210 = vector.shape_cast %209 : vector<16x8xf32> to vector<2x8x8xf32>
    %211 = vector.extract_strided_slice %147 {offsets = [0, 24], sizes = [16, 8], strides = [1, 1]} : vector<16x32xf32> to vector<16x8xf32>
    %212 = vector.shape_cast %211 : vector<16x8xf32> to vector<2x8x8xf32>
    %213 = vector.extract_strided_slice %148 {offsets = [0, 24], sizes = [16, 8], strides = [1, 1]} : vector<16x32xf32> to vector<16x8xf32>
    %214 = vector.shape_cast %213 : vector<16x8xf32> to vector<2x8x8xf32>
    "tpu.trace_start"() <{level = 10 : i32, message = "bqd,bkd->bqk"}> : () -> ()
    %cst_82 = arith.constant dense<0.000000e+00> : vector<2x8x8xf32>
    %215 = tpu.matmul %210, %212, %cst_82 {dimension_numbers = #tpu.dot_dimension_numbers<[2], [2], [1], [1], [0, 0, 0, 1, 1, 1], [0], [0]>} : vector<2x8x8xf32>, vector<2x8x8xf32>, vector<2x8x8xf32> -> vector<2x8x8xf32>
    "tpu.trace_stop"() : () -> ()
    %cst_83 = arith.constant dense<0xFF800000> : vector<2x8xf32>
    %216 = vector.multi_reduction <maximumf>, %215, %cst_83 [2] : vector<2x8x8xf32> to vector<2x8xf32>
    %217 = vector.shape_cast %216 : vector<2x8xf32> to vector<2x8x1xf32>
    %218 = vector.broadcast %217 : vector<2x8x1xf32> to vector<2x8x8xf32>
    %219 = arith.subf %215, %218 : vector<2x8x8xf32>
    %220 = math.exp %219 : vector<2x8x8xf32>
    %cst_84 = arith.constant dense<0.000000e+00> : vector<2x8xf32>
    %221 = vector.multi_reduction <add>, %220, %cst_84 [2] : vector<2x8x8xf32> to vector<2x8xf32>
    %222 = vector.shape_cast %221 : vector<2x8xf32> to vector<2x8x1xf32>
    %223 = tpu.reciprocal %222 : vector<2x8x1xf32> -> vector<2x8x1xf32>
    %224 = vector.broadcast %223 : vector<2x8x1xf32> to vector<2x8x8xf32>
    %225 = arith.mulf %220, %224 : vector<2x8x8xf32>
    "tpu.trace_start"() <{level = 10 : i32, message = "bqk,bkd->bqd"}> : () -> ()
    %cst_85 = arith.constant dense<0.000000e+00> : vector<2x8x8xf32>
    %226 = tpu.matmul %225, %214, %cst_85 {dimension_numbers = #tpu.dot_dimension_numbers<[2], [1], [1], [2], [0, 0, 0, 1, 1, 2], [0], [0]>} : vector<2x8x8xf32>, vector<2x8x8xf32>, vector<2x8x8xf32> -> vector<2x8x8xf32>
    "tpu.trace_stop"() : () -> ()
    %227 = vector.shape_cast %226 : vector<2x8x8xf32> to vector<16x8xf32>
    %c0_86 = arith.constant 0 : index
    %c24_87 = arith.constant 24 : index
    %228 = vector.load %arg22[%c0_86, %c24_87] : memref<16x32xf32, #tpu.memory_space<vmem>>, vector<16x8xf32>
    tpu.vector_store %arg22[%c0_86, %c24_87], %227 {strides = array<i32>} : memref<16x32xf32, #tpu.memory_space<vmem>>, vector<16x8xf32>,
    %c0_88 = arith.constant 0 : index
    %c0_89 = arith.constant 0 : index
    %229 = vector.load %arg22[%c0_88, %c0_89] : memref<16x32xf32, #tpu.memory_space<vmem>>, vector<16x32xf32>
    %cst_90 = arith.constant dense<0.000000e+00> : vector<16x32xf32>
    %230 = tpu.matmul %229, %143, %cst_90 {dimension_numbers = #tpu.dot_dimension_numbers<[1], [0], [0], [1], [0, 0, 1, 1], [], []>} : vector<16x32xf32>, vector<32x32xf32>, vector<16x32xf32> -> vector<16x32xf32>
    %231 = arith.addf %139, %230 : vector<16x32xf32>
    %c0_91 = arith.constant 0 : index
    %c0_92 = arith.constant 0 : index
    %232 = vector.load %arg13[%c0_91, %c0_92] : memref<1x32xf32, #tpu.memory_space<vmem>>, vector<1x32xf32>
    %c0_93 = arith.constant 0 : index
    %c0_94 = arith.constant 0 : index
    %233 = vector.load %arg14[%c0_93, %c0_94] : memref<1x32xf32, #tpu.memory_space<vmem>>, vector<1x32xf32>
    %cst_95 = arith.constant dense<0.000000e+00> : vector<16xf32>
    %234 = vector.multi_reduction <add>, %231, %cst_95 [1] : vector<16x32xf32> to vector<16xf32>
    %235 = vector.shape_cast %234 : vector<16xf32> to vector<16x1xf32>
    %cst_96 = arith.constant 3.200000e+01 : f32
    %236 = vector.broadcast %cst_96 : f32 to vector<16x1xf32>
    %237 = arith.divf %235, %236 : vector<16x1xf32>
    %238 = vector.broadcast %237 : vector<16x1xf32> to vector<16x32xf32>
    %239 = arith.subf %231, %238 : vector<16x32xf32>
    %240 = arith.mulf %239, %239 : vector<16x32xf32>
    %cst_97 = arith.constant dense<0.000000e+00> : vector<16xf32>
    %241 = vector.multi_reduction <add>, %240, %cst_97 [1] : vector<16x32xf32> to vector<16xf32>
    %242 = vector.shape_cast %241 : vector<16xf32> to vector<16x1xf32>
    %cst_98 = arith.constant 3.100000e+01 : f32
    %243 = vector.broadcast %cst_98 : f32 to vector<16x1xf32>
    %244 = arith.divf %242, %243 : vector<16x1xf32>
    %245 = math.sqrt %244 : vector<16x1xf32>
    %cst_99 = arith.constant 9.99999997E-7 : f32
    %246 = vector.broadcast %cst_99 : f32 to vector<16x1xf32>
    %247 = arith.addf %245, %246 : vector<16x1xf32>
    %248 = tpu.reciprocal %247 : vector<16x1xf32> -> vector<16x1xf32>
    %249 = vector.broadcast %237 : vector<16x1xf32> to vector<16x32xf32>
    %250 = arith.subf %231, %249 : vector<16x32xf32>
    %251 = vector.broadcast %232 : vector<1x32xf32> to vector<16x32xf32>
    %252 = arith.mulf %251, %250 : vector<16x32xf32>
    %253 = vector.broadcast %248 : vector<16x1xf32> to vector<16x32xf32>
    %254 = arith.mulf %252, %253 : vector<16x32xf32>
    %255 = vector.broadcast %233 : vector<1x32xf32> to vector<16x32xf32>
    %256 = arith.addf %254, %255 : vector<16x32xf32>
    %c0_100 = arith.constant 0 : index
    %c0_101 = arith.constant 0 : index
    %257 = vector.load %arg15[%c0_100, %c0_101] : memref<32x64xf32, #tpu.memory_space<vmem>>, vector<32x64xf32>
    %cst_102 = arith.constant dense<0.000000e+00> : vector<16x64xf32>
    %258 = tpu.matmul %256, %257, %cst_102 {dimension_numbers = #tpu.dot_dimension_numbers<[1], [0], [0], [1], [0, 0, 1, 1], [], []>} : vector<16x32xf32>, vector<32x64xf32>, vector<16x64xf32> -> vector<16x64xf32>
    %c0_103 = arith.constant 0 : index
    %c0_104 = arith.constant 0 : index
    %259 = vector.load %arg16[%c0_103, %c0_104] : memref<1x64xf32, #tpu.memory_space<vmem>>, vector<1x64xf32>
    %260 = vector.broadcast %259 : vector<1x64xf32> to vector<16x64xf32>
    %261 = arith.addf %258, %260 : vector<16x64xf32>
    %cst_105 = arith.constant 0.000000e+00 : f32
    %262 = vector.broadcast %cst_105 : f32 to vector<16x64xf32>
    %263 = arith.maximumf %261, %262 : vector<16x64xf32>
    %c0_106 = arith.constant 0 : index
    %c0_107 = arith.constant 0 : index
    %264 = vector.load %arg17[%c0_106, %c0_107] : memref<64x32xf32, #tpu.memory_space<vmem>>, vector<64x32xf32>
    %cst_108 = arith.constant dense<0.000000e+00> : vector<16x32xf32>
    %265 = tpu.matmul %263, %264, %cst_108 {dimension_numbers = #tpu.dot_dimension_numbers<[1], [0], [0], [1], [0, 0, 1, 1], [], []>} : vector<16x64xf32>, vector<64x32xf32>, vector<16x32xf32> -> vector<16x32xf32>
    %c0_109 = arith.constant 0 : index
    %c0_110 = arith.constant 0 : index
    %266 = vector.load %arg18[%c0_109, %c0_110] : memref<1x32xf32, #tpu.memory_space<vmem>>, vector<1x32xf32>
    %267 = vector.broadcast %266 : vector<1x32xf32> to vector<16x32xf32>
    %268 = arith.addf %265, %267 : vector<16x32xf32>
    %269 = arith.addf %256, %268 : vector<16x32xf32>
    %c0_111 = arith.constant 0 : index
    %c0_112 = arith.constant 0 : index
    %270 = vector.load %arg19[%c0_111, %c0_112] : memref<1x32xf32, #tpu.memory_space<vmem>>, vector<1x32xf32>
    %c0_113 = arith.constant 0 : index
    %c0_114 = arith.constant 0 : index
    %271 = vector.load %arg20[%c0_113, %c0_114] : memref<1x32xf32, #tpu.memory_space<vmem>>, vector<1x32xf32>
    %cst_115 = arith.constant dense<0.000000e+00> : vector<16xf32>
    %272 = vector.multi_reduction <add>, %269, %cst_115 [1] : vector<16x32xf32> to vector<16xf32>
    %273 = vector.shape_cast %272 : vector<16xf32> to vector<16x1xf32>
    %cst_116 = arith.constant 3.200000e+01 : f32
    %274 = vector.broadcast %cst_116 : f32 to vector<16x1xf32>
    %275 = arith.divf %273, %274 : vector<16x1xf32>
    %276 = vector.broadcast %275 : vector<16x1xf32> to vector<16x32xf32>
    %277 = arith.subf %269, %276 : vector<16x32xf32>
    %278 = arith.mulf %277, %277 : vector<16x32xf32>
    %cst_117 = arith.constant dense<0.000000e+00> : vector<16xf32>
    %279 = vector.multi_reduction <add>, %278, %cst_117 [1] : vector<16x32xf32> to vector<16xf32>
    %280 = vector.shape_cast %279 : vector<16xf32> to vector<16x1xf32>
    %cst_118 = arith.constant 3.100000e+01 : f32
    %281 = vector.broadcast %cst_118 : f32 to vector<16x1xf32>
    %282 = arith.divf %280, %281 : vector<16x1xf32>
    %283 = math.sqrt %282 : vector<16x1xf32>
    %cst_119 = arith.constant 9.99999997E-7 : f32
    %284 = vector.broadcast %cst_119 : f32 to vector<16x1xf32>
    %285 = arith.addf %283, %284 : vector<16x1xf32>
    %286 = tpu.reciprocal %285 : vector<16x1xf32> -> vector<16x1xf32>
    %287 = vector.broadcast %275 : vector<16x1xf32> to vector<16x32xf32>
    %288 = arith.subf %269, %287 : vector<16x32xf32>
    %289 = vector.broadcast %270 : vector<1x32xf32> to vector<16x32xf32>
    %290 = arith.mulf %289, %288 : vector<16x32xf32>
    %291 = vector.broadcast %286 : vector<16x1xf32> to vector<16x32xf32>
    %292 = arith.mulf %290, %291 : vector<16x32xf32>
    %293 = vector.broadcast %271 : vector<1x32xf32> to vector<16x32xf32>
    %294 = arith.addf %292, %293 : vector<16x32xf32>
    %295 = vector.shape_cast %294 : vector<16x32xf32> to vector<2x8x32xf32>
    %c0_120 = arith.constant 0 : index
    %c0_121 = arith.constant 0 : index
    %c0_122 = arith.constant 0 : index
    %296 = vector.load %arg21[%c0_120, %c0_121, %c0_122] : memref<2x8x32xf32, #tpu.memory_space<vmem>>, vector<2x8x32xf32>
    tpu.vector_store %arg21[%c0_120, %c0_121, %c0_122], %295 {strides = array<i32>} : memref<2x8x32xf32, #tpu.memory_space<vmem>>, vector<2x8x32xf32>,
    return
  }
  func.func @transform_0(%arg0: i32) -> (i32, i32, i32) {
    %c0_i32 = arith.constant 0 : i32
    %c0_i32_0 = arith.constant 0 : i32
    %c0_i32_1 = arith.constant 0 : i32
    return %arg0, %c0_i32, %c0_i32_0 : i32, i32, i32
  }
  func.func @transform_1(%arg0: i32) -> (i32, i32, i32) {
    %c0_i32 = arith.constant 0 : i32
    %c0_i32_0 = arith.constant 0 : i32
    %c0_i32_1 = arith.constant 0 : i32
    return %arg0, %c0_i32, %c0_i32_0 : i32, i32, i32
  }
  func.func @transform_2(%arg0: i32) -> (i32, i32) {
    %c0_i32 = arith.constant 0 : i32
    %c0_i32_0 = arith.constant 0 : i32
    %c0_i32_1 = arith.constant 0 : i32
    return %c0_i32, %c0_i32_0 : i32, i32
  }
  func.func @transform_3(%arg0: i32) -> (i32, i32) {
    %c0_i32 = arith.constant 0 : i32
    %c0_i32_0 = arith.constant 0 : i32
    %c0_i32_1 = arith.constant 0 : i32
    return %c0_i32, %c0_i32_0 : i32, i32
  }
  func.func @transform_4(%arg0: i32) -> (i32, i32) {
    %c0_i32 = arith.constant 0 : i32
    %c0_i32_0 = arith.constant 0 : i32
    %c0_i32_1 = arith.constant 0 : i32
    return %c0_i32, %c0_i32_0 : i32, i32
  }
  func.func @transform_5(%arg0: i32) -> (i32, i32) {
    %c0_i32 = arith.constant 0 : i32
    %c0_i32_0 = arith.constant 0 : i32
    %c0_i32_1 = arith.constant 0 : i32
    return %c0_i32, %c0_i32_0 : i32, i32
  }
  func.func @transform_6(%arg0: i32) -> (i32, i32) {
    %c0_i32 = arith.constant 0 : i32
    %c0_i32_0 = arith.constant 0 : i32
    %c0_i32_1 = arith.constant 0 : i32
    return %c0_i32, %c0_i32_0 : i32, i32
  }
  func.func @transform_7(%arg0: i32) -> (i32, i32) {
    %c0_i32 = arith.constant 0 : i32
    %c0_i32_0 = arith.constant 0 : i32
    %c0_i32_1 = arith.constant 0 : i32
    return %c0_i32, %c0_i32_0 : i32, i32
  }
  func.func @transform_8(%arg0: i32) -> (i32, i32) {
    %c0_i32 = arith.constant 0 : i32
    %c0_i32_0 = arith.constant 0 : i32
    %c0_i32_1 = arith.constant 0 : i32
    return %c0_i32, %c0_i32_0 : i32, i32
  }
  func.func @transform_9(%arg0: i32) -> (i32, i32) {
    %c0_i32 = arith.constant 0 : i32
    %c0_i32_0 = arith.constant 0 : i32
    %c0_i32_1 = arith.constant 0 : i32
    return %c0_i32, %c0_i32_0 : i32, i32
  }
  func.func @transform_10(%arg0: i32) -> (i32, i32) {
    %c0_i32 = arith.constant 0 : i32
    %c0_i32_0 = arith.constant 0 : i32
    %c0_i32_1 = arith.constant 0 : i32
    return %c0_i32, %c0_i32_0 : i32, i32
  }
  func.func @transform_11(%arg0: i32) -> (i32, i32) {
    %c0_i32 = arith.constant 0 : i32
    %c0_i32_0 = arith.constant 0 : i32
    %c0_i32_1 = arith.constant 0 : i32
    return %c0_i32, %c0_i32_0 : i32, i32
  }
  func.func @transform_12(%arg0: i32) -> (i32, i32) {
    %c0_i32 = arith.constant 0 : i32
    %c0_i32_0 = arith.constant 0 : i32
    %c0_i32_1 = arith.constant 0 : i32
    return %c0_i32, %c0_i32_0 : i32, i32
  }
  func.func @transform_13(%arg0: i32) -> (i32, i32) {
    %c0_i32 = arith.constant 0 : i32
    %c0_i32_0 = arith.constant 0 : i32
    %c0_i32_1 = arith.constant 0 : i32
    return %c0_i32, %c0_i32_0 : i32, i32
  }
  func.func @transform_14(%arg0: i32) -> (i32, i32) {
    %c0_i32 = arith.constant 0 : i32
    %c0_i32_0 = arith.constant 0 : i32
    %c0_i32_1 = arith.constant 0 : i32
    return %c0_i32, %c0_i32_0 : i32, i32
  }
  func.func @transform_15(%arg0: i32) -> (i32, i32) {
    %c0_i32 = arith.constant 0 : i32
    %c0_i32_0 = arith.constant 0 : i32
    %c0_i32_1 = arith.constant 0 : i32
    return %c0_i32, %c0_i32_0 : i32, i32
  }
  func.func @transform_16(%arg0: i32) -> (i32, i32) {
    %c0_i32 = arith.constant 0 : i32
    %c0_i32_0 = arith.constant 0 : i32
    %c0_i32_1 = arith.constant 0 : i32
    return %c0_i32, %c0_i32_0 : i32, i32
  }
  func.func @transform_17(%arg0: i32) -> (i32, i32) {
    %c0_i32 = arith.constant 0 : i32
    %c0_i32_0 = arith.constant 0 : i32
    %c0_i32_1 = arith.constant 0 : i32
    return %c0_i32, %c0_i32_0 : i32, i32
  }
  func.func @transform_18(%arg0: i32) -> (i32, i32) {
    %c0_i32 = arith.constant 0 : i32
    %c0_i32_0 = arith.constant 0 : i32
    %c0_i32_1 = arith.constant 0 : i32
    return %c0_i32, %c0_i32_0 : i32, i32
  }
  func.func @transform_19(%arg0: i32) -> (i32, i32) {
    %c0_i32 = arith.constant 0 : i32
    %c0_i32_0 = arith.constant 0 : i32
    %c0_i32_1 = arith.constant 0 : i32
    return %c0_i32, %c0_i32_0 : i32, i32
  }
  func.func @transform_20(%arg0: i32) -> (i32, i32, i32) {
    %c0_i32 = arith.constant 0 : i32
    %c0_i32_0 = arith.constant 0 : i32
    %c0_i32_1 = arith.constant 0 : i32
    return %arg0, %c0_i32, %c0_i32_0 : i32, i32, i32
  }
}

module attributes {stable_mosaic.version = 11 : i64} {
  func.func @decoder_layer_kernel(%arg0: i32, %arg1: memref<2x8x32xf32, #tpu.memory_space<vmem>>, %arg2: memref<2x8x32xf32, #tpu.memory_space<vmem>>, %arg3: memref<32x32xf32, #tpu.memory_space<vmem>>, %arg4: memref<32x32xf32, #tpu.memory_space<vmem>>, %arg5: memref<32x32xf32, #tpu.memory_space<vmem>>, %arg6: memref<32x32xf32, #tpu.memory_space<vmem>>, %arg7: memref<1x32xf32, #tpu.memory_space<vmem>>, %arg8: memref<1x32xf32, #tpu.memory_space<vmem>>, %arg9: memref<32x32xf32, #tpu.memory_space<vmem>>, %arg10: memref<32x32xf32, #tpu.memory_space<vmem>>, %arg11: memref<32x32xf32, #tpu.memory_space<vmem>>, %arg12: memref<32x32xf32, #tpu.memory_space<vmem>>, %arg13: memref<1x32xf32, #tpu.memory_space<vmem>>, %arg14: memref<1x32xf32, #tpu.memory_space<vmem>>, %arg15: memref<32x64xf32, #tpu.memory_space<vmem>>, %arg16: memref<1x64xf32, #tpu.memory_space<vmem>>, %arg17: memref<64x32xf32, #tpu.memory_space<vmem>>, %arg18: memref<1x32xf32, #tpu.memory_space<vmem>>, %arg19: memref<1x32xf32, #tpu.memory_space<vmem>>, %arg20: memref<1x32xf32, #tpu.memory_space<vmem>>, %arg21: memref<2x8x32xf32, #tpu.memory_space<vmem>>, %arg22: memref<16x32xf32, #tpu.memory_space<vmem>>) attributes {dimension_semantics = [#tpu.dimension_semantics<parallel>], iteration_bounds = array<i64: 1>, scalar_prefetch = 0 : i64, scratch_operands = 1 : i64, tpu.core_type = #tpu.core_type<tc>, window_params = [{transform_indices = @transform_0, window_bounds = array<i64: 2, 8, 32>}, {transform_indices = @transform_1, window_bounds = array<i64: 2, 8, 32>}, {pipeline_mode = #tpu.pipeline_mode<synchronous>, transform_indices = @transform_2, window_bounds = array<i64: 32, 32>}, {pipeline_mode = #tpu.pipeline_mode<synchronous>, transform_indices = @transform_3, window_bounds = array<i64: 32, 32>}, {pipeline_mode = #tpu.pipeline_mode<synchronous>, transform_indices = @transform_4, window_bounds = array<i64: 32, 32>}, {pipeline_mode = #tpu.pipeline_mode<synchronous>, transform_indices = @transform_5, window_bounds = array<i64: 32, 32>}, {pipeline_mode = #tpu.pipeline_mode<synchronous>, transform_indices = @transform_6, window_bounds = array<i64: 1, 32>}, {pipeline_mode = #tpu.pipeline_mode<synchronous>, transform_indices = @transform_7, window_bounds = array<i64: 1, 32>}, {pipeline_mode = #tpu.pipeline_mode<synchronous>, transform_indices = @transform_8, window_bounds = array<i64: 32, 32>}, {pipeline_mode = #tpu.pipeline_mode<synchronous>, transform_indices = @transform_9, window_bounds = array<i64: 32, 32>}, {pipeline_mode = #tpu.pipeline_mode<synchronous>, transform_indices = @transform_10, window_bounds = array<i64: 32, 32>}, {pipeline_mode = #tpu.pipeline_mode<synchronous>, transform_indices = @transform_11, window_bounds = array<i64: 32, 32>}, {pipeline_mode = #tpu.pipeline_mode<synchronous>, transform_indices = @transform_12, window_bounds = array<i64: 1, 32>}, {pipeline_mode = #tpu.pipeline_mode<synchronous>, transform_indices = @transform_13, window_bounds = array<i64: 1, 32>}, {pipeline_mode = #tpu.pipeline_mode<synchronous>, transform_indices = @transform_14, window_bounds = array<i64: 32, 64>}, {pipeline_mode = #tpu.pipeline_mode<synchronous>, transform_indices = @transform_15, window_bounds = array<i64: 1, 64>}, {pipeline_mode = #tpu.pipeline_mode<synchronous>, transform_indices = @transform_16, window_bounds = array<i64: 64, 32>}, {pipeline_mode = #tpu.pipeline_mode<synchronous>, transform_indices = @transform_17, window_bounds = array<i64: 1, 32>}, {pipeline_mode = #tpu.pipeline_mode<synchronous>, transform_indices = @transform_18, window_bounds = array<i64: 1, 32>}, {pipeline_mode = #tpu.pipeline_mode<synchronous>, transform_indices = @transform_19, window_bounds = array<i64: 1, 32>}, {transform_indices = @transform_20, window_bounds = array<i64: 2, 8, 32>}]} {
    %c0 = arith.constant 0 : index
    %c0_0 = arith.constant 0 : index
    %c0_1 = arith.constant 0 : index
    %0 = vector.load %arg1[%c0, %c0_0, %c0_1] : memref<2x8x32xf32, #tpu.memory_space<vmem>>, vector<2x8x32xf32>
    %1 = vector.shape_cast %0 : vector<2x8x32xf32> to vector<16x32xf32>
    %c0_2 = arith.constant 0 : index
    %c0_3 = arith.constant 0 : index
    %c0_4 = arith.constant 0 : index
    %2 = vector.load %arg2[%c0_2, %c0_3, %c0_4] : memref<2x8x32xf32, #tpu.memory_space<vmem>>, vector<2x8x32xf32>
    %3 = vector.shape_cast %2 : vector<2x8x32xf32> to vector<16x32xf32>
    %c0_5 = arith.constant 0 : index
    %c0_6 = arith.constant 0 : index
    %4 = vector.load %arg3[%c0_5, %c0_6] : memref<32x32xf32, #tpu.memory_space<vmem>>, vector<32x32xf32>
    %c0_7 = arith.constant 0 : index
    %c0_8 = arith.constant 0 : index
    %5 = vector.load %arg4[%c0_7, %c0_8] : memref<32x32xf32, #tpu.memory_space<vmem>>, vector<32x32xf32>
    %c0_9 = arith.constant 0 : index
    %c0_10 = arith.constant 0 : index
    %6 = vector.load %arg5[%c0_9, %c0_10] : memref<32x32xf32, #tpu.memory_space<vmem>>, vector<32x32xf32>
    %c0_11 = arith.constant 0 : index
    %c0_12 = arith.constant 0 : index
    %7 = vector.load %arg6[%c0_11, %c0_12] : memref<32x32xf32, #tpu.memory_space<vmem>>, vector<32x32xf32>
    %cst = arith.constant dense<0.000000e+00> : vector<16x32xf32>
    %8 = tpu.matmul %1, %4, %cst {dimension_numbers = #tpu.dot_dimension_numbers<[1], [0], [0], [1], [0, 0, 1, 1], [], []>} : vector<16x32xf32>, vector<32x32xf32>, vector<16x32xf32> -> vector<16x32xf32>
    %cst_13 = arith.constant 0.176776692 : f32
    %9 = vector.broadcast %cst_13 : f32 to vector<16x32xf32>
    %10 = arith.mulf %8, %9 : vector<16x32xf32>
    %cst_14 = arith.constant dense<0.000000e+00> : vector<16x32xf32>
    %11 = tpu.matmul %1, %5, %cst_14 {dimension_numbers = #tpu.dot_dimension_numbers<[1], [0], [0], [1], [0, 0, 1, 1], [], []>} : vector<16x32xf32>, vector<32x32xf32>, vector<16x32xf32> -> vector<16x32xf32>
    %cst_15 = arith.constant dense<0.000000e+00> : vector<16x32xf32>
    %12 = tpu.matmul %1, %6, %cst_15 {dimension_numbers = #tpu.dot_dimension_numbers<[1], [0], [0], [1], [0, 0, 1, 1], [], []>} : vector<16x32xf32>, vector<32x32xf32>, vector<16x32xf32> -> vector<16x32xf32>
    %13 = tpu.iota {dimensions = array<i32: 0>} : vector<8x8xi32>
    %14 = tpu.iota {dimensions = array<i32: 1>} : vector<8x8xi32>
    %15 = arith.cmpi sgt, %14, %13 : vector<8x8xi32>
    %cst_16 = arith.constant 1.000000e+10 : f32
    %cst_17 = arith.constant 0.176776692 : f32
    %16 = arith.mulf %cst_16, %cst_17 : f32
    %cst_18 = arith.constant 0.000000e+00 : f32
    %17 = vector.broadcast %16 : f32 to vector<8x8xf32>
    %18 = vector.broadcast %cst_18 : f32 to vector<8x8xf32>
    %19 = arith.select %15, %17, %18 : vector<8x8xi1>, vector<8x8xf32>
    %20 = vector.extract_strided_slice %10 {offsets = [0, 0], sizes = [16, 8], strides = [1, 1]} : vector<16x32xf32> to vector<16x8xf32>
    %21 = vector.shape_cast %20 : vector<16x8xf32> to vector<2x8x8xf32>
    %22 = vector.extract_strided_slice %11 {offsets = [0, 0], sizes = [16, 8], strides = [1, 1]} : vector<16x32xf32> to vector<16x8xf32>
    %23 = vector.shape_cast %22 : vector<16x8xf32> to vector<2x8x8xf32>
    %24 = vector.extract_strided_slice %12 {offsets = [0, 0], sizes = [16, 8], strides = [1, 1]} : vector<16x32xf32> to vector<16x8xf32>
    %25 = vector.shape_cast %24 : vector<16x8xf32> to vector<2x8x8xf32>
    "tpu.trace_start"() <{level = 10 : i32, message = "bqd,bkd->bqk"}> : () -> ()
    %cst_19 = arith.constant dense<0.000000e+00> : vector<2x8x8xf32>
    %26 = tpu.matmul %21, %23, %cst_19 {dimension_numbers = #tpu.dot_dimension_numbers<[2], [2], [1], [1], [0, 0, 0, 1, 1, 1], [0], [0]>} : vector<2x8x8xf32>, vector<2x8x8xf32>, vector<2x8x8xf32> -> vector<2x8x8xf32>
    "tpu.trace_stop"() : () -> ()
    %27 = vector.shape_cast %19 : vector<8x8xf32> to vector<1x8x8xf32>
    %28 = vector.broadcast %27 : vector<1x8x8xf32> to vector<2x8x8xf32>
    %29 = arith.subf %26, %28 : vector<2x8x8xf32>
    %cst_20 = arith.constant dense<0xFF800000> : vector<2x8xf32>
    %30 = vector.multi_reduction <maximumf>, %29, %cst_20 [2] : vector<2x8x8xf32> to vector<2x8xf32>
    %31 = vector.shape_cast %30 : vector<2x8xf32> to vector<2x8x1xf32>
    %32 = vector.broadcast %31 : vector<2x8x1xf32> to vector<2x8x8xf32>
    %33 = arith.subf %29, %32 : vector<2x8x8xf32>
    %34 = math.exp %33 : vector<2x8x8xf32>
    %cst_21 = arith.constant dense<0.000000e+00> : vector<2x8xf32>
    %35 = vector.multi_reduction <add>, %34, %cst_21 [2] : vector<2x8x8xf32> to vector<2x8xf32>
    %36 = vector.shape_cast %35 : vector<2x8xf32> to vector<2x8x1xf32>
    %37 = tpu.reciprocal %36 : vector<2x8x1xf32> -> vector<2x8x1xf32>
    %38 = vector.broadcast %37 : vector<2x8x1xf32> to vector<2x8x8xf32>
    %39 = arith.mulf %34, %38 : vector<2x8x8xf32>
    "tpu.trace_start"() <{level = 10 : i32, message = "bqk,bkd->bqd"}> : () -> ()
    %cst_22 = arith.constant dense<0.000000e+00> : vector<2x8x8xf32>
    %40 = tpu.matmul %39, %25, %cst_22 {dimension_numbers = #tpu.dot_dimension_numbers<[2], [1], [1], [2], [0, 0, 0, 1, 1, 2], [0], [0]>} : vector<2x8x8xf32>, vector<2x8x8xf32>, vector<2x8x8xf32> -> vector<2x8x8xf32>
    "tpu.trace_stop"() : () -> ()
    %41 = vector.shape_cast %40 : vector<2x8x8xf32> to vector<16x8xf32>
    %c0_23 = arith.constant 0 : index
    %c0_24 = arith.constant 0 : index
    %42 = vector.load %arg22[%c0_23, %c0_24] : memref<16x32xf32, #tpu.memory_space<vmem>>, vector<16x8xf32>
    tpu.vector_store %arg22[%c0_23, %c0_24], %41 {strides = array<i32>} : memref<16x32xf32, #tpu.memory_space<vmem>>, vector<16x8xf32>,
    %43 = vector.extract_strided_slice %10 {offsets = [0, 8], sizes = [16, 8], strides = [1, 1]} : vector<16x32xf32> to vector<16x8xf32>
    %44 = vector.shape_cast %43 : vector<16x8xf32> to vector<2x8x8xf32>
    %45 = vector.extract_strided_slice %11 {offsets = [0, 8], sizes = [16, 8], strides = [1, 1]} : vector<16x32xf32> to vector<16x8xf32>
    %46 = vector.shape_cast %45 : vector<16x8xf32> to vector<2x8x8xf32>
    %47 = vector.extract_strided_slice %12 {offsets = [0, 8], sizes = [16, 8], strides = [1, 1]} : vector<16x32xf32> to vector<16x8xf32>
    %48 = vector.shape_cast %47 : vector<16x8xf32> to vector<2x8x8xf32>
    "tpu.trace_start"() <{level = 10 : i32, message = "bqd,bkd->bqk"}> : () -> ()
    %cst_25 = arith.constant dense<0.000000e+00> : vector<2x8x8xf32>
    %49 = tpu.matmul %44, %46, %cst_25 {dimension_numbers = #tpu.dot_dimension_numbers<[2], [2], [1], [1], [0, 0, 0, 1, 1, 1], [0], [0]>} : vector<2x8x8xf32>, vector<2x8x8xf32>, vector<2x8x8xf32> -> vector<2x8x8xf32>
    "tpu.trace_stop"() : () -> ()
    %50 = vector.shape_cast %19 : vector<8x8xf32> to vector<1x8x8xf32>
    %51 = vector.broadcast %50 : vector<1x8x8xf32> to vector<2x8x8xf32>
    %52 = arith.subf %49, %51 : vector<2x8x8xf32>
    %cst_26 = arith.constant dense<0xFF800000> : vector<2x8xf32>
    %53 = vector.multi_reduction <maximumf>, %52, %cst_26 [2] : vector<2x8x8xf32> to vector<2x8xf32>
    %54 = vector.shape_cast %53 : vector<2x8xf32> to vector<2x8x1xf32>
    %55 = vector.broadcast %54 : vector<2x8x1xf32> to vector<2x8x8xf32>
    %56 = arith.subf %52, %55 : vector<2x8x8xf32>
    %57 = math.exp %56 : vector<2x8x8xf32>
    %cst_27 = arith.constant dense<0.000000e+00> : vector<2x8xf32>
    %58 = vector.multi_reduction <add>, %57, %cst_27 [2] : vector<2x8x8xf32> to vector<2x8xf32>
    %59 = vector.shape_cast %58 : vector<2x8xf32> to vector<2x8x1xf32>
    %60 = tpu.reciprocal %59 : vector<2x8x1xf32> -> vector<2x8x1xf32>
    %61 = vector.broadcast %60 : vector<2x8x1xf32> to vector<2x8x8xf32>
    %62 = arith.mulf %57, %61 : vector<2x8x8xf32>
    "tpu.trace_start"() <{level = 10 : i32, message = "bqk,bkd->bqd"}> : () -> ()
    %cst_28 = arith.constant dense<0.000000e+00> : vector<2x8x8xf32>
    %63 = tpu.matmul %62, %48, %cst_28 {dimension_numbers = #tpu.dot_dimension_numbers<[2], [1], [1], [2], [0, 0, 0, 1, 1, 2], [0], [0]>} : vector<2x8x8xf32>, vector<2x8x8xf32>, vector<2x8x8xf32> -> vector<2x8x8xf32>
    "tpu.trace_stop"() : () -> ()
    %64 = vector.shape_cast %63 : vector<2x8x8xf32> to vector<16x8xf32>
    %c0_29 = arith.constant 0 : index
    %c8 = arith.constant 8 : index
    %65 = vector.load %arg22[%c0_29, %c8] : memref<16x32xf32, #tpu.memory_space<vmem>>, vector<16x8xf32>
    tpu.vector_store %arg22[%c0_29, %c8], %64 {strides = array<i32>} : memref<16x32xf32, #tpu.memory_space<vmem>>, vector<16x8xf32>,
    %66 = vector.extract_strided_slice %10 {offsets = [0, 16], sizes = [16, 8], strides = [1, 1]} : vector<16x32xf32> to vector<16x8xf32>
    %67 = vector.shape_cast %66 : vector<16x8xf32> to vector<2x8x8xf32>
    %68 = vector.extract_strided_slice %11 {offsets = [0, 16], sizes = [16, 8], strides = [1, 1]} : vector<16x32xf32> to vector<16x8xf32>
    %69 = vector.shape_cast %68 : vector<16x8xf32> to vector<2x8x8xf32>
    %70 = vector.extract_strided_slice %12 {offsets = [0, 16], sizes = [16, 8], strides = [1, 1]} : vector<16x32xf32> to vector<16x8xf32>
    %71 = vector.shape_cast %70 : vector<16x8xf32> to vector<2x8x8xf32>
    "tpu.trace_start"() <{level = 10 : i32, message = "bqd,bkd->bqk"}> : () -> ()
    %cst_30 = arith.constant dense<0.000000e+00> : vector<2x8x8xf32>
    %72 = tpu.matmul %67, %69, %cst_30 {dimension_numbers = #tpu.dot_dimension_numbers<[2], [2], [1], [1], [0, 0, 0, 1, 1, 1], [0], [0]>} : vector<2x8x8xf32>, vector<2x8x8xf32>, vector<2x8x8xf32> -> vector<2x8x8xf32>
    "tpu.trace_stop"() : () -> ()
    %73 = vector.shape_cast %19 : vector<8x8xf32> to vector<1x8x8xf32>
    %74 = vector.broadcast %73 : vector<1x8x8xf32> to vector<2x8x8xf32>
    %75 = arith.subf %72, %74 : vector<2x8x8xf32>
    %cst_31 = arith.constant dense<0xFF800000> : vector<2x8xf32>
    %76 = vector.multi_reduction <maximumf>, %75, %cst_31 [2] : vector<2x8x8xf32> to vector<2x8xf32>
    %77 = vector.shape_cast %76 : vector<2x8xf32> to vector<2x8x1xf32>
    %78 = vector.broadcast %77 : vector<2x8x1xf32> to vector<2x8x8xf32>
    %79 = arith.subf %75, %78 : vector<2x8x8xf32>
    %80 = math.exp %79 : vector<2x8x8xf32>
    %cst_32 = arith.constant dense<0.000000e+00> : vector<2x8xf32>
    %81 = vector.multi_reduction <add>, %80, %cst_32 [2] : vector<2x8x8xf32> to vector<2x8xf32>
    %82 = vector.shape_cast %81 : vector<2x8xf32> to vector<2x8x1xf32>
    %83 = tpu.reciprocal %82 : vector<2x8x1xf32> -> vector<2x8x1xf32>
    %84 = vector.broadcast %83 : vector<2x8x1xf32> to vector<2x8x8xf32>
    %85 = arith.mulf %80, %84 : vector<2x8x8xf32>
    "tpu.trace_start"() <{level = 10 : i32, message = "bqk,bkd->bqd"}> : () -> ()
    %cst_33 = arith.constant dense<0.000000e+00> : vector<2x8x8xf32>
    %86 = tpu.matmul %85, %71, %cst_33 {dimension_numbers = #tpu.dot_dimension_numbers<[2], [1], [1], [2], [0, 0, 0, 1, 1, 2], [0], [0]>} : vector<2x8x8xf32>, vector<2x8x8xf32>, vector<2x8x8xf32> -> vector<2x8x8xf32>
    "tpu.trace_stop"() : () -> ()
    %87 = vector.shape_cast %86 : vector<2x8x8xf32> to vector<16x8xf32>
    %c0_34 = arith.constant 0 : index
    %c16 = arith.constant 16 : index
    %88 = vector.load %arg22[%c0_34, %c16] : memref<16x32xf32, #tpu.memory_space<vmem>>, vector<16x8xf32>
    tpu.vector_store %arg22[%c0_34, %c16], %87 {strides = array<i32>} : memref<16x32xf32, #tpu.memory_space<vmem>>, vector<16x8xf32>,
    %89 = vector.extract_strided_slice %10 {offsets = [0, 24], sizes = [16, 8], strides = [1, 1]} : vector<16x32xf32> to vector<16x8xf32>
    %90 = vector.shape_cast %89 : vector<16x8xf32> to vector<2x8x8xf32>
    %91 = vector.extract_strided_slice %11 {offsets = [0, 24], sizes = [16, 8], strides = [1, 1]} : vector<16x32xf32> to vector<16x8xf32>
    %92 = vector.shape_cast %91 : vector<16x8xf32> to vector<2x8x8xf32>
    %93 = vector.extract_strided_slice %12 {offsets = [0, 24], sizes = [16, 8], strides = [1, 1]} : vector<16x32xf32> to vector<16x8xf32>
    %94 = vector.shape_cast %93 : vector<16x8xf32> to vector<2x8x8xf32>
    "tpu.trace_start"() <{level = 10 : i32, message = "bqd,bkd->bqk"}> : () -> ()
    %cst_35 = arith.constant dense<0.000000e+00> : vector<2x8x8xf32>
    %95 = tpu.matmul %90, %92, %cst_35 {dimension_numbers = #tpu.dot_dimension_numbers<[2], [2], [1], [1], [0, 0, 0, 1, 1, 1], [0], [0]>} : vector<2x8x8xf32>, vector<2x8x8xf32>, vector<2x8x8xf32> -> vector<2x8x8xf32>
    "tpu.trace_stop"() : () -> ()
    %96 = vector.shape_cast %19 : vector<8x8xf32> to vector<1x8x8xf32>
    %97 = vector.broadcast %96 : vector<1x8x8xf32> to vector<2x8x8xf32>
    %98 = arith.subf %95, %97 : vector<2x8x8xf32>
    %cst_36 = arith.constant dense<0xFF800000> : vector<2x8xf32>
    %99 = vector.multi_reduction <maximumf>, %98, %cst_36 [2] : vector<2x8x8xf32> to vector<2x8xf32>
    %100 = vector.shape_cast %99 : vector<2x8xf32> to vector<2x8x1xf32>
    %101 = vector.broadcast %100 : vector<2x8x1xf32> to vector<2x8x8xf32>
    %102 = arith.subf %98, %101 : vector<2x8x8xf32>
    %103 = math.exp %102 : vector<2x8x8xf32>
    %cst_37 = arith.constant dense<0.000000e+00> : vector<2x8xf32>
    %104 = vector.multi_reduction <add>, %103, %cst_37 [2] : vector<2x8x8xf32> to vector<2x8xf32>
    %105 = vector.shape_cast %104 : vector<2x8xf32> to vector<2x8x1xf32>
    %106 = tpu.reciprocal %105 : vector<2x8x1xf32> -> vector<2x8x1xf32>
    %107 = vector.broadcast %106 : vector<2x8x1xf32> to vector<2x8x8xf32>
    %108 = arith.mulf %103, %107 : vector<2x8x8xf32>
    "tpu.trace_start"() <{level = 10 : i32, message = "bqk,bkd->bqd"}> : () -> ()
    %cst_38 = arith.constant dense<0.000000e+00> : vector<2x8x8xf32>
    %109 = tpu.matmul %108, %94, %cst_38 {dimension_numbers = #tpu.dot_dimension_numbers<[2], [1], [1], [2], [0, 0, 0, 1, 1, 2], [0], [0]>} : vector<2x8x8xf32>, vector<2x8x8xf32>, vector<2x8x8xf32> -> vector<2x8x8xf32>
    "tpu.trace_stop"() : () -> ()
    %110 = vector.shape_cast %109 : vector<2x8x8xf32> to vector<16x8xf32>
    %c0_39 = arith.constant 0 : index
    %c24 = arith.constant 24 : index
    %111 = vector.load %arg22[%c0_39, %c24] : memref<16x32xf32, #tpu.memory_space<vmem>>, vector<16x8xf32>
    tpu.vector_store %arg22[%c0_39, %c24], %110 {strides = array<i32>} : memref<16x32xf32, #tpu.memory_space<vmem>>, vector<16x8xf32>,
    %c0_40 = arith.constant 0 : index
    %c0_41 = arith.constant 0 : index
    %112 = vector.load %arg22[%c0_40, %c0_41] : memref<16x32xf32, #tpu.memory_space<vmem>>, vector<16x32xf32>
    %cst_42 = arith.constant dense<0.000000e+00> : vector<16x32xf32>
    %113 = tpu.matmul %112, %7, %cst_42 {dimension_numbers = #tpu.dot_dimension_numbers<[1], [0], [0], [1], [0, 0, 1, 1], [], []>} : vector<16x32xf32>, vector<32x32xf32>, vector<16x32xf32> -> vector<16x32xf32>
    %114 = arith.addf %1, %113 : vector<16x32xf32>
    %c0_43 = arith.constant 0 : index
    %c0_44 = arith.constant 0 : index
    %115 = vector.load %arg7[%c0_43, %c0_44] : memref<1x32xf32, #tpu.memory_space<vmem>>, vector<1x32xf32>
    %c0_45 = arith.constant 0 : index
    %c0_46 = arith.constant 0 : index
    %116 = vector.load %arg8[%c0_45, %c0_46] : memref<1x32xf32, #tpu.memory_space<vmem>>, vector<1x32xf32>
    %cst_47 = arith.constant dense<0.000000e+00> : vector<16xf32>
    %117 = vector.multi_reduction <add>, %114, %cst_47 [1] : vector<16x32xf32> to vector<16xf32>
    %118 = vector.shape_cast %117 : vector<16xf32> to vector<16x1xf32>
    %cst_48 = arith.constant 3.200000e+01 : f32
    %119 = vector.broadcast %cst_48 : f32 to vector<16x1xf32>
    %120 = arith.divf %118, %119 : vector<16x1xf32>
    %121 = vector.broadcast %120 : vector<16x1xf32> to vector<16x32xf32>
    %122 = arith.subf %114, %121 : vector<16x32xf32>
    %123 = arith.mulf %122, %122 : vector<16x32xf32>
    %cst_49 = arith.constant dense<0.000000e+00> : vector<16xf32>
    %124 = vector.multi_reduction <add>, %123, %cst_49 [1] : vector<16x32xf32> to vector<16xf32>
    %125 = vector.shape_cast %124 : vector<16xf32> to vector<16x1xf32>
    %cst_50 = arith.constant 3.100000e+01 : f32
    %126 = vector.broadcast %cst_50 : f32 to vector<16x1xf32>
    %127 = arith.divf %125, %126 : vector<16x1xf32>
    %128 = math.sqrt %127 : vector<16x1xf32>
    %cst_51 = arith.constant 9.99999997E-7 : f32
    %129 = vector.broadcast %cst_51 : f32 to vector<16x1xf32>
    %130 = arith.addf %128, %129 : vector<16x1xf32>
    %131 = tpu.reciprocal %130 : vector<16x1xf32> -> vector<16x1xf32>
    %132 = vector.broadcast %120 : vector<16x1xf32> to vector<16x32xf32>
    %133 = arith.subf %114, %132 : vector<16x32xf32>
    %134 = vector.broadcast %115 : vector<1x32xf32> to vector<16x32xf32>
    %135 = arith.mulf %134, %133 : vector<16x32xf32>
    %136 = vector.broadcast %131 : vector<16x1xf32> to vector<16x32xf32>
    %137 = arith.mulf %135, %136 : vector<16x32xf32>
    %138 = vector.broadcast %116 : vector<1x32xf32> to vector<16x32xf32>
    %139 = arith.addf %137, %138 : vector<16x32xf32>
    %c0_52 = arith.constant 0 : index
    %c0_53 = arith.constant 0 : index
    %140 = vector.load %arg9[%c0_52, %c0_53] : memref<32x32xf32, #tpu.memory_space<vmem>>, vector<32x32xf32>
    %c0_54 = arith.constant 0 : index
    %c0_55 = arith.constant 0 : index
    %141 = vector.load %arg10[%c0_54, %c0_55] : memref<32x32xf32, #tpu.memory_space<vmem>>, vector<32x32xf32>
    %c0_56 = arith.constant 0 : index
    %c0_57 = arith.constant 0 : index
    %142 = vector.load %arg11[%c0_56, %c0_57] : memref<32x32xf32, #tpu.memory_space<vmem>>, vector<32x32xf32>
    %c0_58 = arith.constant 0 : index
    %c0_59 = arith.constant 0 : index
    %143 = vector.load %arg12[%c0_58, %c0_59] : memref<32x32xf32, #tpu.memory_space<vmem>>, vector<32x32xf32>
    %cst_60 = arith.constant dense<0.000000e+00> : vector<16x32xf32>
    %144 = tpu.matmul %139, %140, %cst_60 {dimension_numbers = #tpu.dot_dimension_numbers<[1], [0], [0], [1], [0, 0, 1, 1], [], []>} : vector<16x32xf32>, vector<32x32xf32>, vector<16x32xf32> -> vector<16x32xf32>
    %cst_61 = arith.constant 0.176776692 : f32
    %145 = vector.broadcast %cst_61 : f32 to vector<16x32xf32>
    %146 = arith.mulf %144, %145 : vector<16x32xf32>
    %cst_62 = arith.constant dense<0.000000e+00> : vector<16x32xf32>
    %147 = tpu.matmul %3, %141, %cst_62 {dimension_numbers = #tpu.dot_dimension_numbers<[1], [0], [0], [1], [0, 0, 1, 1], [], []>} : vector<16x32xf32>, vector<32x32xf32>, vector<16x32xf32> -> vector<16x32xf32>
    %cst_63 = arith.constant dense<0.000000e+00> : vector<16x32xf32>
    %148 = tpu.matmul %3, %142, %cst_63 {dimension_numbers = #tpu.dot_dimension_numbers<[1], [0], [0], [1], [0, 0, 1, 1], [], []>} : vector<16x32xf32>, vector<32x32xf32>, vector<16x32xf32> -> vector<16x32xf32>
    %149 = vector.extract_strided_slice %146 {offsets = [0, 0], sizes = [16, 8], strides = [1, 1]} : vector<16x32xf32> to vector<16x8xf32>
    %150 = vector.shape_cast %149 : vector<16x8xf32> to vector<2x8x8xf32>
    %151 = vector.extract_strided_slice %147 {offsets = [0, 0], sizes = [16, 8], strides = [1, 1]} : vector<16x32xf32> to vector<16x8xf32>
    %152 = vector.shape_cast %151 : vector<16x8xf32> to vector<2x8x8xf32>
    %153 = vector.extract_strided_slice %148 {offsets = [0, 0], sizes = [16, 8], strides = [1, 1]} : vector<16x32xf32> to vector<16x8xf32>
    %154 = vector.shape_cast %153 : vector<16x8xf32> to vector<2x8x8xf32>
    "tpu.trace_start"() <{level = 10 : i32, message = "bqd,bkd->bqk"}> : () -> ()
    %cst_64 = arith.constant dense<0.000000e+00> : vector<2x8x8xf32>
    %155 = tpu.matmul %150, %152, %cst_64 {dimension_numbers = #tpu.dot_dimension_numbers<[2], [2], [1], [1], [0, 0, 0, 1, 1, 1], [0], [0]>} : vector<2x8x8xf32>, vector<2x8x8xf32>, vector<2x8x8xf32> -> vector<2x8x8xf32>
    "tpu.trace_stop"() : () -> ()
    %cst_65 = arith.constant dense<0xFF800000> : vector<2x8xf32>
    %156 = vector.multi_reduction <maximumf>, %155, %cst_65 [2] : vector<2x8x8xf32> to vector<2x8xf32>
    %157 = vector.shape_cast %156 : vector<2x8xf32> to vector<2x8x1xf32>
    %158 = vector.broadcast %157 : vector<2x8x1xf32> to vector<2x8x8xf32>
    %159 = arith.subf %155, %158 : vector<2x8x8xf32>
    %160 = math.exp %159 : vector<2x8x8xf32>
    %cst_66 = arith.constant dense<0.000000e+00> : vector<2x8xf32>
    %161 = vector.multi_reduction <add>, %160, %cst_66 [2] : vector<2x8x8xf32> to vector<2x8xf32>
    %162 = vector.shape_cast %161 : vector<2x8xf32> to vector<2x8x1xf32>
    %163 = tpu.reciprocal %162 : vector<2x8x1xf32> -> vector<2x8x1xf32>
    %164 = vector.broadcast %163 : vector<2x8x1xf32> to vector<2x8x8xf32>
    %165 = arith.mulf %160, %164 : vector<2x8x8xf32>
    "tpu.trace_start"() <{level = 10 : i32, message = "bqk,bkd->bqd"}> : () -> ()
    %cst_67 = arith.constant dense<0.000000e+00> : vector<2x8x8xf32>
    %166 = tpu.matmul %165, %154, %cst_67 {dimension_numbers = #tpu.dot_dimension_numbers<[2], [1], [1], [2], [0, 0, 0, 1, 1, 2], [0], [0]>} : vector<2x8x8xf32>, vector<2x8x8xf32>, vector<2x8x8xf32> -> vector<2x8x8xf32>
    "tpu.trace_stop"() : () -> ()
    %167 = vector.shape_cast %166 : vector<2x8x8xf32> to vector<16x8xf32>
    %c0_68 = arith.constant 0 : index
    %c0_69 = arith.constant 0 : index
    %168 = vector.load %arg22[%c0_68, %c0_69] : memref<16x32xf32, #tpu.memory_space<vmem>>, vector<16x8xf32>
    tpu.vector_store %arg22[%c0_68, %c0_69], %167 {strides = array<i32>} : memref<16x32xf32, #tpu.memory_space<vmem>>, vector<16x8xf32>,
    %169 = vector.extract_strided_slice %146 {offsets = [0, 8], sizes = [16, 8], strides = [1, 1]} : vector<16x32xf32> to vector<16x8xf32>
    %170 = vector.shape_cast %169 : vector<16x8xf32> to vector<2x8x8xf32>
    %171 = vector.extract_strided_slice %147 {offsets = [0, 8], sizes = [16, 8], strides = [1, 1]} : vector<16x32xf32> to vector<16x8xf32>
    %172 = vector.shape_cast %171 : vector<16x8xf32> to vector<2x8x8xf32>
    %173 = vector.extract_strided_slice %148 {offsets = [0, 8], sizes = [16, 8], strides = [1, 1]} : vector<16x32xf32> to vector<16x8xf32>
    %174 = vector.shape_cast %173 : vector<16x8xf32> to vector<2x8x8xf32>
    "tpu.trace_start"() <{level = 10 : i32, message = "bqd,bkd->bqk"}> : () -> ()
    %cst_70 = arith.constant dense<0.000000e+00> : vector<2x8x8xf32>
    %175 = tpu.matmul %170, %172, %cst_70 {dimension_numbers = #tpu.dot_dimension_numbers<[2], [2], [1], [1], [0, 0, 0, 1, 1, 1], [0], [0]>} : vector<2x8x8xf32>, vector<2x8x8xf32>, vector<2x8x8xf32> -> vector<2x8x8xf32>
    "tpu.trace_stop"() : () -> ()
    %cst_71 = arith.constant dense<0xFF800000> : vector<2x8xf32>
    %176 = vector.multi_reduction <maximumf>, %175, %cst_71 [2] : vector<2x8x8xf32> to vector<2x8xf32>
    %177 = vector.shape_cast %176 : vector<2x8xf32> to vector<2x8x1xf32>
    %178 = vector.broadcast %177 : vector<2x8x1xf32> to vector<2x8x8xf32>
    %179 = arith.subf %175, %178 : vector<2x8x8xf32>
    %180 = math.exp %179 : vector<2x8x8xf32>
    %cst_72 = arith.constant dense<0.000000e+00> : vector<2x8xf32>
    %181 = vector.multi_reduction <add>, %180, %cst_72 [2] : vector<2x8x8xf32> to vector<2x8xf32>
    %182 = vector.shape_cast %181 : vector<2x8xf32> to vector<2x8x1xf32>
    %183 = tpu.reciprocal %182 : vector<2x8x1xf32> -> vector<2x8x1xf32>
    %184 = vector.broadcast %183 : vector<2x8x1xf32> to vector<2x8x8xf32>
    %185 = arith.mulf %180, %184 : vector<2x8x8xf32>
    "tpu.trace_start"() <{level = 10 : i32, message = "bqk,bkd->bqd"}> : () -> ()
    %cst_73 = arith.constant dense<0.000000e+00> : vector<2x8x8xf32>
    %186 = tpu.matmul %185, %174, %cst_73 {dimension_numbers = #tpu.dot_dimension_numbers<[2], [1], [1], [2], [0, 0, 0, 1, 1, 2], [0], [0]>} : vector<2x8x8xf32>, vector<2x8x8xf32>, vector<2x8x8xf32> -> vector<2x8x8xf32>
    "tpu.trace_stop"() : () -> ()
    %187 = vector.shape_cast %186 : vector<2x8x8xf32> to vector<16x8xf32>
    %c0_74 = arith.constant 0 : index
    %c8_75 = arith.constant 8 : index
    %188 = vector.load %arg22[%c0_74, %c8_75] : memref<16x32xf32, #tpu.memory_space<vmem>>, vector<16x8xf32>
    tpu.vector_store %arg22[%c0_74, %c8_75], %187 {strides = array<i32>} : memref<16x32xf32, #tpu.memory_space<vmem>>, vector<16x8xf32>,
    %189 = vector.extract_strided_slice %146 {offsets = [0, 16], sizes = [16, 8], strides = [1, 1]} : vector<16x32xf32> to vector<16x8xf32>
    %190 = vector.shape_cast %189 : vector<16x8xf32> to vector<2x8x8xf32>
    %191 = vector.extract_strided_slice %147 {offsets = [0, 16], sizes = [16, 8], strides = [1, 1]} : vector<16x32xf32> to vector<16x8xf32>
    %192 = vector.shape_cast %191 : vector<16x8xf32> to vector<2x8x8xf32>
    %193 = vector.extract_strided_slice %148 {offsets = [0, 16], sizes = [16, 8], strides = [1, 1]} : vector<16x32xf32> to vector<16x8xf32>
    %194 = vector.shape_cast %193 : vector<16x8xf32> to vector<2x8x8xf32>
    "tpu.trace_start"() <{level = 10 : i32, message = "bqd,bkd->bqk"}> : () -> ()
    %cst_76 = arith.constant dense<0.000000e+00> : vector<2x8x8xf32>
    %195 = tpu.matmul %190, %192, %cst_76 {dimension_numbers = #tpu.dot_dimension_numbers<[2], [2], [1], [1], [0, 0, 0, 1, 1, 1], [0], [0]>} : vector<2x8x8xf32>, vector<2x8x8xf32>, vector<2x8x8xf32> -> vector<2x8x8xf32>
    "tpu.trace_stop"() : () -> ()
    %cst_77 = arith.constant dense<0xFF800000> : vector<2x8xf32>
    %196 = vector.multi_reduction <maximumf>, %195, %cst_77 [2] : vector<2x8x8xf32> to vector<2x8xf32>
    %197 = vector.shape_cast %196 : vector<2x8xf32> to vector<2x8x1xf32>
    %198 = vector.broadcast %197 : vector<2x8x1xf32> to vector<2x8x8xf32>
    %199 = arith.subf %195, %198 : vector<2x8x8xf32>
    %200 = math.exp %199 : vector<2x8x8xf32>
    %cst_78 = arith.constant dense<0.000000e+00> : vector<2x8xf32>
    %201 = vector.multi_reduction <add>, %200, %cst_78 [2] : vector<2x8x8xf32> to vector<2x8xf32>
    %202 = vector.shape_cast %201 : vector<2x8xf32> to vector<2x8x1xf32>
    %203 = tpu.reciprocal %202 : vector<2x8x1xf32> -> vector<2x8x1xf32>
    %204 = vector.broadcast %203 : vector<2x8x1xf32> to vector<2x8x8xf32>
    %205 = arith.mulf %200, %204 : vector<2x8x8xf32>
    "tpu.trace_start"() <{level = 10 : i32, message = "bqk,bkd->bqd"}> : () -> ()
    %cst_79 = arith.constant dense<0.000000e+00> : vector<2x8x8xf32>
    %206 = tpu.matmul %205, %194, %cst_79 {dimension_numbers = #tpu.dot_dimension_numbers<[2], [1], [1], [2], [0, 0, 0, 1, 1, 2], [0], [0]>} : vector<2x8x8xf32>, vector<2x8x8xf32>, vector<2x8x8xf32> -> vector<2x8x8xf32>
    "tpu.trace_stop"() : () -> ()
    %207 = vector.shape_cast %206 : vector<2x8x8xf32> to vector<16x8xf32>
    %c0_80 = arith.constant 0 : index
    %c16_81 = arith.constant 16 : index
    %208 = vector.load %arg22[%c0_80, %c16_81] : memref<16x32xf32, #tpu.memory_space<vmem>>, vector<16x8xf32>
    tpu.vector_store %arg22[%c0_80, %c16_81], %207 {strides = array<i32>} : memref<16x32xf32, #tpu.memory_space<vmem>>, vector<16x8xf32>,
    %209 = vector.extract_strided_slice %146 {offsets = [0, 24], sizes = [16, 8], strides = [1, 1]} : vector<16x32xf32> to vector<16x8xf32>
    %210 = vector.shape_cast %209 : vector<16x8xf32> to vector<2x8x8xf32>
    %211 = vector.extract_strided_slice %147 {offsets = [0, 24], sizes = [16, 8], strides = [1, 1]} : vector<16x32xf32> to vector<16x8xf32>
    %212 = vector.shape_cast %211 : vector<16x8xf32> to vector<2x8x8xf32>
    %213 = vector.extract_strided_slice %148 {offsets = [0, 24], sizes = [16, 8], strides = [1, 1]} : vector<16x32xf32> to vector<16x8xf32>
    %214 = vector.shape_cast %213 : vector<16x8xf32> to vector<2x8x8xf32>
    "tpu.trace_start"() <{level = 10 : i32, message = "bqd,bkd->bqk"}> : () -> ()
    %cst_82 = arith.constant dense<0.000000e+00> : vector<2x8x8xf32>
    %215 = tpu.matmul %210, %212, %cst_82 {dimension_numbers = #tpu.dot_dimension_numbers<[2], [2], [1], [1], [0, 0, 0, 1, 1, 1], [0], [0]>} : vector<2x8x8xf32>, vector<2x8x8xf32>, vector<2x8x8xf32> -> vector<2x8x8xf32>
    "tpu.trace_stop"() : () -> ()
    %cst_83 = arith.constant dense<0xFF800000> : vector<2x8xf32>
    %216 = vector.multi_reduction <maximumf>, %215, %cst_83 [2] : vector<2x8x8xf32> to vector<2x8xf32>
    %217 = vector.shape_cast %216 : vector<2x8xf32> to vector<2x8x1xf32>
    %218 = vector.broadcast %217 : vector<2x8x1xf32> to vector<2x8x8xf32>
    %219 = arith.subf %215, %218 : vector<2x8x8xf32>
    %220 = math.exp %219 : vector<2x8x8xf32>
    %cst_84 = arith.constant dense<0.000000e+00> : vector<2x8xf32>
    %221 = vector.multi_reduction <add>, %220, %cst_84 [2] : vector<2x8x8xf32> to vector<2x8xf32>
    %222 = vector.shape_cast %221 : vector<2x8xf32> to vector<2x8x1xf32>
    %223 = tpu.reciprocal %222 : vector<2x8x1xf32> -> vector<2x8x1xf32>
    %224 = vector.broadcast %223 : vector<2x8x1xf32> to vector<2x8x8xf32>
    %225 = arith.mulf %220, %224 : vector<2x8x8xf32>
    "tpu.trace_start"() <{level = 10 : i32, message = "bqk,bkd->bqd"}> : () -> ()
    %cst_85 = arith.constant dense<0.000000e+00> : vector<2x8x8xf32>
    %226 = tpu.matmul %225, %214, %cst_85 {dimension_numbers = #tpu.dot_dimension_numbers<[2], [1], [1], [2], [0, 0, 0, 1, 1, 2], [0], [0]>} : vector<2x8x8xf32>, vector<2x8x8xf32>, vector<2x8x8xf32> -> vector<2x8x8xf32>
    "tpu.trace_stop"() : () -> ()
    %227 = vector.shape_cast %226 : vector<2x8x8xf32> to vector<16x8xf32>
    %c0_86 = arith.constant 0 : index
    %c24_87 = arith.constant 24 : index
    %228 = vector.load %arg22[%c0_86, %c24_87] : memref<16x32xf32, #tpu.memory_space<vmem>>, vector<16x8xf32>
    tpu.vector_store %arg22[%c0_86, %c24_87], %227 {strides = array<i32>} : memref<16x32xf32, #tpu.memory_space<vmem>>, vector<16x8xf32>,
    %c0_88 = arith.constant 0 : index
    %c0_89 = arith.constant 0 : index
    %229 = vector.load %arg22[%c0_88, %c0_89] : memref<16x32xf32, #tpu.memory_space<vmem>>, vector<16x32xf32>
    %cst_90 = arith.constant dense<0.000000e+00> : vector<16x32xf32>
    %230 = tpu.matmul %229, %143, %cst_90 {dimension_numbers = #tpu.dot_dimension_numbers<[1], [0], [0], [1], [0, 0, 1, 1], [], []>} : vector<16x32xf32>, vector<32x32xf32>, vector<16x32xf32> -> vector<16x32xf32>
    %231 = arith.addf %139, %230 : vector<16x32xf32>
    %c0_91 = arith.constant 0 : index
    %c0_92 = arith.constant 0 : index
    %232 = vector.load %arg13[%c0_91, %c0_92] : memref<1x32xf32, #tpu.memory_space<vmem>>, vector<1x32xf32>
    %c0_93 = arith.constant 0 : index
    %c0_94 = arith.constant 0 : index
    %233 = vector.load %arg14[%c0_93, %c0_94] : memref<1x32xf32, #tpu.memory_space<vmem>>, vector<1x32xf32>
    %cst_95 = arith.constant dense<0.000000e+00> : vector<16xf32>
    %234 = vector.multi_reduction <add>, %231, %cst_95 [1] : vector<16x32xf32> to vector<16xf32>
    %235 = vector.shape_cast %234 : vector<16xf32> to vector<16x1xf32>
    %cst_96 = arith.constant 3.200000e+01 : f32
    %236 = vector.broadcast %cst_96 : f32 to vector<16x1xf32>
    %237 = arith.divf %235, %236 : vector<16x1xf32>
    %238 = vector.broadcast %237 : vector<16x1xf32> to vector<16x32xf32>
    %239 = arith.subf %231, %238 : vector<16x32xf32>
    %240 = arith.mulf %239, %239 : vector<16x32xf32>
    %cst_97 = arith.constant dense<0.000000e+00> : vector<16xf32>
    %241 = vector.multi_reduction <add>, %240, %cst_97 [1] : vector<16x32xf32> to vector<16xf32>
    %242 = vector.shape_cast %241 : vector<16xf32> to vector<16x1xf32>
    %cst_98 = arith.constant 3.100000e+01 : f32
    %243 = vector.broadcast %cst_98 : f32 to vector<16x1xf32>
    %244 = arith.divf %242, %243 : vector<16x1xf32>
    %245 = math.sqrt %244 : vector<16x1xf32>
    %cst_99 = arith.constant 9.99999997E-7 : f32
    %246 = vector.broadcast %cst_99 : f32 to vector<16x1xf32>
    %247 = arith.addf %245, %246 : vector<16x1xf32>
    %248 = tpu.reciprocal %247 : vector<16x1xf32> -> vector<16x1xf32>
    %249 = vector.broadcast %237 : vector<16x1xf32> to vector<16x32xf32>
    %250 = arith.subf %231, %249 : vector<16x32xf32>
    %251 = vector.broadcast %232 : vector<1x32xf32> to vector<16x32xf32>
    %252 = arith.mulf %251, %250 : vector<16x32xf32>
    %253 = vector.broadcast %248 : vector<16x1xf32> to vector<16x32xf32>
    %254 = arith.mulf %252, %253 : vector<16x32xf32>
    %255 = vector.broadcast %233 : vector<1x32xf32> to vector<16x32xf32>
    %256 = arith.addf %254, %255 : vector<16x32xf32>
    %c0_100 = arith.constant 0 : index
    %c0_101 = arith.constant 0 : index
    %257 = vector.load %arg15[%c0_100, %c0_101] : memref<32x64xf32, #tpu.memory_space<vmem>>, vector<32x64xf32>
    %cst_102 = arith.constant dense<0.000000e+00> : vector<16x64xf32>
    %258 = tpu.matmul %256, %257, %cst_102 {dimension_numbers = #tpu.dot_dimension_numbers<[1], [0], [0], [1], [0, 0, 1, 1], [], []>} : vector<16x32xf32>, vector<32x64xf32>, vector<16x64xf32> -> vector<16x64xf32>
    %c0_103 = arith.constant 0 : index
    %c0_104 = arith.constant 0 : index
    %259 = vector.load %arg16[%c0_103, %c0_104] : memref<1x64xf32, #tpu.memory_space<vmem>>, vector<1x64xf32>
    %260 = vector.broadcast %259 : vector<1x64xf32> to vector<16x64xf32>
    %261 = arith.addf %258, %260 : vector<16x64xf32>
    %cst_105 = arith.constant 0.000000e+00 : f32
    %262 = vector.broadcast %cst_105 : f32 to vector<16x64xf32>
    %263 = arith.maximumf %261, %262 : vector<16x64xf32>
    %c0_106 = arith.constant 0 : index
    %c0_107 = arith.constant 0 : index
    %264 = vector.load %arg17[%c0_106, %c0_107] : memref<64x32xf32, #tpu.memory_space<vmem>>, vector<64x32xf32>
    %cst_108 = arith.constant dense<0.000000e+00> : vector<16x32xf32>
    %265 = tpu.matmul %263, %264, %cst_108 {dimension_numbers = #tpu.dot_dimension_numbers<[1], [0], [0], [1], [0, 0, 1, 1], [], []>} : vector<16x64xf32>, vector<64x32xf32>, vector<16x32xf32> -> vector<16x32xf32>
    %c0_109 = arith.constant 0 : index
    %c0_110 = arith.constant 0 : index
    %266 = vector.load %arg18[%c0_109, %c0_110] : memref<1x32xf32, #tpu.memory_space<vmem>>, vector<1x32xf32>
    %267 = vector.broadcast %266 : vector<1x32xf32> to vector<16x32xf32>
    %268 = arith.addf %265, %267 : vector<16x32xf32>
    %269 = arith.addf %256, %268 : vector<16x32xf32>
    %c0_111 = arith.constant 0 : index
    %c0_112 = arith.constant 0 : index
    %270 = vector.load %arg19[%c0_111, %c0_112] : memref<1x32xf32, #tpu.memory_space<vmem>>, vector<1x32xf32>
    %c0_113 = arith.constant 0 : index
    %c0_114 = arith.constant 0 : index
    %271 = vector.load %arg20[%c0_113, %c0_114] : memref<1x32xf32, #tpu.memory_space<vmem>>, vector<1x32xf32>
    %cst_115 = arith.constant dense<0.000000e+00> : vector<16xf32>
    %272 = vector.multi_reduction <add>, %269, %cst_115 [1] : vector<16x32xf32> to vector<16xf32>
    %273 = vector.shape_cast %272 : vector<16xf32> to vector<16x1xf32>
    %cst_116 = arith.constant 3.200000e+01 : f32
    %274 = vector.broadcast %cst_116 : f32 to vector<16x1xf32>
    %275 = arith.divf %273, %274 : vector<16x1xf32>
    %276 = vector.broadcast %275 : vector<16x1xf32> to vector<16x32xf32>
    %277 = arith.subf %269, %276 : vector<16x32xf32>
    %278 = arith.mulf %277, %277 : vector<16x32xf32>
    %cst_117 = arith.constant dense<0.000000e+00> : vector<16xf32>
    %279 = vector.multi_reduction <add>, %278, %cst_117 [1] : vector<16x32xf32> to vector<16xf32>
    %280 = vector.shape_cast %279 : vector<16xf32> to vector<16x1xf32>
    %cst_118 = arith.constant 3.100000e+01 : f32
    %281 = vector.broadcast %cst_118 : f32 to vector<16x1xf32>
    %282 = arith.divf %280, %281 : vector<16x1xf32>
    %283 = math.sqrt %282 : vector<16x1xf32>
    %cst_119 = arith.constant 9.99999997E-7 : f32
    %284 = vector.broadcast %cst_119 : f32 to vector<16x1xf32>
    %285 = arith.addf %283, %284 : vector<16x1xf32>
    %286 = tpu.reciprocal %285 : vector<16x1xf32> -> vector<16x1xf32>
    %287 = vector.broadcast %275 : vector<16x1xf32> to vector<16x32xf32>
    %288 = arith.subf %269, %287 : vector<16x32xf32>
    %289 = vector.broadcast %270 : vector<1x32xf32> to vector<16x32xf32>
    %290 = arith.mulf %289, %288 : vector<16x32xf32>
    %291 = vector.broadcast %286 : vector<16x1xf32> to vector<16x32xf32>
    %292 = arith.mulf %290, %291 : vector<16x32xf32>
    %293 = vector.broadcast %271 : vector<1x32xf32> to vector<16x32xf32>
    %294 = arith.addf %292, %293 : vector<16x32xf32>
    %295 = vector.shape_cast %294 : vector<16x32xf32> to vector<2x8x32xf32>
    %c0_120 = arith.constant 0 : index
    %c0_121 = arith.constant 0 : index
    %c0_122 = arith.constant 0 : index
    %296 = vector.load %arg21[%c0_120, %c0_121, %c0_122] : memref<2x8x32xf32, #tpu.memory_space<vmem>>, vector<2x8x32xf32>
    tpu.vector_store %arg21[%c0_120, %c0_121, %c0_122], %295 {strides = array<i32>} : memref<2x8x32xf32, #tpu.memory_space<vmem>>, vector<2x8x32xf32>,
    return
  }
  func.func @transform_0(%arg0: i32) -> (i32, i32, i32) {
    %c0_i32 = arith.constant 0 : i32
    %c0_i32_0 = arith.constant 0 : i32
    %c0_i32_1 = arith.constant 0 : i32
    return %arg0, %c0_i32, %c0_i32_0 : i32, i32, i32
  }
  func.func @transform_1(%arg0: i32) -> (i32, i32, i32) {
    %c0_i32 = arith.constant 0 : i32
    %c0_i32_0 = arith.constant 0 : i32
    %c0_i32_1 = arith.constant 0 : i32
    return %arg0, %c0_i32, %c0_i32_0 : i32, i32, i32
  }
  func.func @transform_2(%arg0: i32) -> (i32, i32) {
    %c0_i32 = arith.constant 0 : i32
    %c0_i32_0 = arith.constant 0 : i32
    %c0_i32_1 = arith.constant 0 : i32
    return %c0_i32, %c0_i32_0 : i32, i32
  }
  func.func @transform_3(%arg0: i32) -> (i32, i32) {
    %c0_i32 = arith.constant 0 : i32
    %c0_i32_0 = arith.constant 0 : i32
    %c0_i32_1 = arith.constant 0 : i32
    return %c0_i32, %c0_i32_0 : i32, i32
  }
  func.func @transform_4(%arg0: i32) -> (i32, i32) {
    %c0_i32 = arith.constant 0 : i32
    %c0_i32_0 = arith.constant 0 : i32
    %c0_i32_1 = arith.constant 0 : i32
    return %c0_i32, %c0_i32_0 : i32, i32
  }
  func.func @transform_5(%arg0: i32) -> (i32, i32) {
    %c0_i32 = arith.constant 0 : i32
    %c0_i32_0 = arith.constant 0 : i32
    %c0_i32_1 = arith.constant 0 : i32
    return %c0_i32, %c0_i32_0 : i32, i32
  }
  func.func @transform_6(%arg0: i32) -> (i32, i32) {
    %c0_i32 = arith.constant 0 : i32
    %c0_i32_0 = arith.constant 0 : i32
    %c0_i32_1 = arith.constant 0 : i32
    return %c0_i32, %c0_i32_0 : i32, i32
  }
  func.func @transform_7(%arg0: i32) -> (i32, i32) {
    %c0_i32 = arith.constant 0 : i32
    %c0_i32_0 = arith.constant 0 : i32
    %c0_i32_1 = arith.constant 0 : i32
    return %c0_i32, %c0_i32_0 : i32, i32
  }
  func.func @transform_8(%arg0: i32) -> (i32, i32) {
    %c0_i32 = arith.constant 0 : i32
    %c0_i32_0 = arith.constant 0 : i32
    %c0_i32_1 = arith.constant 0 : i32
    return %c0_i32, %c0_i32_0 : i32, i32
  }
  func.func @transform_9(%arg0: i32) -> (i32, i32) {
    %c0_i32 = arith.constant 0 : i32
    %c0_i32_0 = arith.constant 0 : i32
    %c0_i32_1 = arith.constant 0 : i32
    return %c0_i32, %c0_i32_0 : i32, i32
  }
  func.func @transform_10(%arg0: i32) -> (i32, i32) {
    %c0_i32 = arith.constant 0 : i32
    %c0_i32_0 = arith.constant 0 : i32
    %c0_i32_1 = arith.constant 0 : i32
    return %c0_i32, %c0_i32_0 : i32, i32
  }
  func.func @transform_11(%arg0: i32) -> (i32, i32) {
    %c0_i32 = arith.constant 0 : i32
    %c0_i32_0 = arith.constant 0 : i32
    %c0_i32_1 = arith.constant 0 : i32
    return %c0_i32, %c0_i32_0 : i32, i32
  }
  func.func @transform_12(%arg0: i32) -> (i32, i32) {
    %c0_i32 = arith.constant 0 : i32
    %c0_i32_0 = arith.constant 0 : i32
    %c0_i32_1 = arith.constant 0 : i32
    return %c0_i32, %c0_i32_0 : i32, i32
  }
  func.func @transform_13(%arg0: i32) -> (i32, i32) {
    %c0_i32 = arith.constant 0 : i32
    %c0_i32_0 = arith.constant 0 : i32
    %c0_i32_1 = arith.constant 0 : i32
    return %c0_i32, %c0_i32_0 : i32, i32
  }
  func.func @transform_14(%arg0: i32) -> (i32, i32) {
    %c0_i32 = arith.constant 0 : i32
    %c0_i32_0 = arith.constant 0 : i32
    %c0_i32_1 = arith.constant 0 : i32
    return %c0_i32, %c0_i32_0 : i32, i32
  }
  func.func @transform_15(%arg0: i32) -> (i32, i32) {
    %c0_i32 = arith.constant 0 : i32
    %c0_i32_0 = arith.constant 0 : i32
    %c0_i32_1 = arith.constant 0 : i32
    return %c0_i32, %c0_i32_0 : i32, i32
  }
  func.func @transform_16(%arg0: i32) -> (i32, i32) {
    %c0_i32 = arith.constant 0 : i32
    %c0_i32_0 = arith.constant 0 : i32
    %c0_i32_1 = arith.constant 0 : i32
    return %c0_i32, %c0_i32_0 : i32, i32
  }
  func.func @transform_17(%arg0: i32) -> (i32, i32) {
    %c0_i32 = arith.constant 0 : i32
    %c0_i32_0 = arith.constant 0 : i32
    %c0_i32_1 = arith.constant 0 : i32
    return %c0_i32, %c0_i32_0 : i32, i32
  }
  func.func @transform_18(%arg0: i32) -> (i32, i32) {
    %c0_i32 = arith.constant 0 : i32
    %c0_i32_0 = arith.constant 0 : i32
    %c0_i32_1 = arith.constant 0 : i32
    return %c0_i32, %c0_i32_0 : i32, i32
  }
  func.func @transform_19(%arg0: i32) -> (i32, i32) {
    %c0_i32 = arith.constant 0 : i32
    %c0_i32_0 = arith.constant 0 : i32
    %c0_i32_1 = arith.constant 0 : i32
    return %c0_i32, %c0_i32_0 : i32, i32
  }
  func.func @transform_20(%arg0: i32) -> (i32, i32, i32) {
    %c0_i32 = arith.constant 0 : i32
    %c0_i32_0 = arith.constant 0 : i32
    %c0_i32_1 = arith.constant 0 : i32
    return %arg0, %c0_i32, %c0_i32_0 : i32, i32, i32
  }
}

</mosaic_0001>

<bundles_post_ra>
// kernel: tpu_custom_call.1
= control target key start
LH: loop header
LB: loop body
LE: loop exit
PB: predicated region body
PF: predicated region fallthrough
CT: control target
= control target key end

     0   :  { %s5600_s0 = inlined_call_operand.hbm [shape: f32[2,8,32], index: 0, kind: input, shape index: {}]   ;;  %s5601_s1 = inlined_call_operand.hbm [shape: f32[2,8,32], index: 1, kind: input, shape index: {}]   ;;  %s5602_s2 = inlined_call_operand.vmem [shape: f32[32,32], index: 2, kind: input, shape index: {}]   ;;  %s5603_s3 = inlined_call_operand.vmem [shape: f32[32,32], index: 3, kind: input, shape index: {}]   ;;  %s5604_s4 = inlined_call_operand.vmem [shape: f32[32,32], index: 4, kind: input, shape index: {}]   ;;  %s5605_s5 = inlined_call_operand.hbm [shape: f32[32,32], index: 5, kind: input, shape index: {}]   ;;  %s5606_s6 = inlined_call_operand.vmem [shape: f32[1,32], index: 6, kind: input, shape index: {}]   ;;  %s5607_s7 = inlined_call_operand.vmem [shape: f32[1,32], index: 7, kind: input, shape index: {}]   ;;  %s5608_s8 = inlined_call_operand.hbm [shape: f32[32,32], index: 8, kind: input, shape index: {}]   ;;  %s5609_s9 = inlined_call_operand.hbm [shape: f32[32,32], index: 9, kind: input, shape index: {}]   ;;  %s5610_s10 = inlined_call_operand.hbm [shape: f32[32,32], index: 10, kind: input, shape index: {}]   ;;  %s5611_s11 = inlined_call_operand.hbm [shape: f32[32,32], index: 11, kind: input, shape index: {}]   ;;  %s5612_s12 = inlined_call_operand.vmem [shape: f32[1,32], index: 12, kind: input, shape index: {}]   ;;  %s5613_s13 = inlined_call_operand.vmem [shape: f32[1,32], index: 13, kind: input, shape index: {}]   ;;  %s5614_s14 = inlined_call_operand.hbm [shape: f32[32,64], index: 14, kind: input, shape index: {}]   ;;  %s5615_s15 = inlined_call_operand.vmem [shape: f32[1,64], index: 15, kind: input, shape index: {}]   ;;  %s5616_s16 = inlined_call_operand.vmem [shape: f32[64,32], index: 16, kind: input, shape index: {}]   ;;  %s5617_s17 = inlined_call_operand.vmem [shape: f32[1,32], index: 17, kind: input, shape index: {}]   ;;  %s5618_s18 = inlined_call_operand.vmem [shape: f32[1,32], index: 18, kind: input, shape index: {}]   ;;  %s5619_s19 = inlined_call_operand.vmem [shape: f32[1,32], index: 19, kind: input, shape index: {}]   ;;  %s5620_s20 = inlined_call_operand.hbm [shape: f32[2,8,32], index: 20, kind: output, shape index: {}]  }
   0x1   :  { %5627 = sst [smem:[#allocation24_spill]] %s5600_s0 }
   0x2   :  { %5628 = sst [smem:[#allocation25_spill]] %s5601_s1 }
   0x3   :  { %5629 = sst [smem:[#allocation26_spill]] %s5602_s2 }
   0x4   :  { %5630 = sst [smem:[#allocation27_spill]] %s5603_s3 }
   0x5   :  { %5631 = sst [smem:[#allocation28_spill]] %s5604_s4 }
   0x6   :  { %5632 = sst [smem:[#allocation29_spill]] %s5620_s20 }
   0x7   :  { %25 = vsyncpa [#allocation4], 0 }
   0x8   :  { %26 = vsyncpa [#allocation7], 0 }
   0x9   :  { %27 = vsyncpa [#allocation10], 0 }
   0xa   :  { %28 = vsyncpa [#allocation13], 0 }
   0xb   :  { %29 = vsyncpa [#allocation16], 0 }
   0xc   :  { %30 = vsyncpa [#allocation5], 0  ;;  %s4838_s1 = smov [#allocation6]   ;;  %s4839_s23 = smov [#allocation9]  }
   0xd   :  { %s48_s22 = sshll.u32 %s4838_s1, 4  ;;  %s82_s24 = sshll.u32 %s4839_s23, 4  ;;  %s49_s22 = int_to_ptr.vmem [resolvable:$true] %s48_s22  ;;  %s4961_s24 = int_to_ptr.vmem [resolvable:$true] %s82_s24 }
   0xe   :  { %s5633_s3 = sld [smem:[#allocation25_spill]] }
  0x14   :  { %s4628_s26 = scalar_lea.hbm %s5633_s3, 256 }
  0x15   :  { %p4629_p0 = scmp.ne.s32.totalorder %s5633_s3, %s4628_s26  ;;  %p4632_p1 = scmp.lt.u32.totalorder %s4628_s26, %s5633_s3 }
  0x17   :  { %p4634_p2 = pnand %p4632_p1, %p4629_p0 }
  0x19   :  { %4637 = shalt.err (!%p4634_p2)
}
  0x1a   :  { %s4638_s30 = scalar_lea.vmem %s49_s22, 256  ;;  %p4643_p4 = scmp.lt.s32.totalorder %s49_s22, %s49_s22 }
  0x1b   :  { %p4639_p3 = scmp.ne.s32.totalorder %s49_s22, %s4638_s30  ;;  %p4644_p5 = scmp.lt.s32.totalorder %s4638_s30, %s4638_s30 }
  0x1d   :  { %p4645_p6 = por %p4644_p5, %p4643_p4 }
  0x1f   :  { %p4646_p7 = pnand %p4645_p6, %p4639_p3 }
  0x21   :  { %4649 = shalt.err (!%p4646_p7)
}
  0x22   :  { %s4840_s0 = smov 128   ;;  %s4841_s21 = smov 8  }
  0x23   :  { %54 = dma.hbm_to_vmem [thread:$0]  %s5633_s3, 256, %s49_s22, [#allocation7], %s4840_s0, %s4840_s0, %s4841_s21  }
  0x24   :  { %s4650_s26 = scalar_lea.hbm %s5608_s8, 512 }
  0x25   :  { %p4651_p8 = scmp.ne.s32.totalorder %s5608_s8, %s4650_s26  ;;  %p4654_p9 = scmp.lt.u32.totalorder %s4650_s26, %s5608_s8 }
  0x27   :  { %p4656_p10 = pnand %p4654_p9, %p4651_p8 }
  0x29   :  { %4659 = shalt.err (!%p4656_p10)
}
  0x2a   :  { %s4660_s30 = scalar_lea.vmem %s4961_s24, 512  ;;  %p4665_p12 = scmp.lt.s32.totalorder %s4961_s24, %s4961_s24 }
  0x2b   :  { %p4661_p11 = scmp.ne.s32.totalorder %s4961_s24, %s4660_s30  ;;  %p4666_p13 = scmp.lt.s32.totalorder %s4660_s30, %s4660_s30 }
  0x2d   :  { %p4667_p0 = por %p4666_p13, %p4665_p12 }
  0x2f   :  { %p4668_p1 = pnand %p4667_p0, %p4661_p11 }
  0x31   :  { %4671 = shalt.err (!%p4668_p1)
}
  0x32   :  { %88 = dma.hbm_to_vmem [thread:$0]  %s5608_s8, 512, %s4961_s24, [#allocation10], %s4840_s0, %s4840_s0, %s4841_s21  }
  0x33   :  { %s4842_s1 = smov [#allocation12]   ;;  %s4843_s2 = smov [#allocation3]  }
  0x34   :  { %s106_s23 = sshll.u32 %s4842_s1, 4  ;;  %s36_s25 = sshll.u32 %s4843_s2, 4  ;;  %s107_s23 = int_to_ptr.vmem [resolvable:$true] %s106_s23  ;;  %s4998_s25 = int_to_ptr.vmem [resolvable:$true] %s36_s25 }
  0x35   :  { %s4672_s28 = scalar_lea.hbm %s5610_s10, 512 }
  0x36   :  { %p4673_p2 = scmp.ne.s32.totalorder %s5610_s10, %s4672_s28  ;;  %p4676_p3 = scmp.lt.u32.totalorder %s4672_s28, %s5610_s10 }
  0x38   :  { %p4678_p4 = pnand %p4676_p3, %p4673_p2 }
  0x3a   :  { %4681 = shalt.err (!%p4678_p4)
}
  0x3b   :  { %s4682_s8 = scalar_lea.vmem %s107_s23, 512  ;;  %p4687_p6 = scmp.lt.s32.totalorder %s107_s23, %s107_s23 }
  0x3c   :  { %p4683_p5 = scmp.ne.s32.totalorder %s107_s23, %s4682_s8  ;;  %p4688_p7 = scmp.lt.s32.totalorder %s4682_s8, %s4682_s8 }
  0x3e   :  { %p4689_p8 = por %p4688_p7, %p4687_p6 }
  0x40   :  { %p4690_p9 = pnand %p4689_p8, %p4683_p5 }
  0x42   :  { %4693 = shalt.err (!%p4690_p9)
}
  0x43   :  { %112 = dma.hbm_to_vmem [thread:$0]  %s5610_s10, 512, %s107_s23, [#allocation13], %s4840_s0, %s4840_s0, %s4841_s21  }
  0x44   :  { %s5634_s20 = sld [smem:[#allocation24_spill]] }
  0x4a   :  { %s4694_s2 = scalar_lea.hbm %s5634_s20, 256 }
  0x4b   :  { %p4695_p10 = scmp.ne.s32.totalorder %s5634_s20, %s4694_s2  ;;  %p4698_p11 = scmp.lt.u32.totalorder %s4694_s2, %s5634_s20 }
  0x4d   :  { %p4700_p12 = pnand %p4698_p11, %p4695_p10 }
  0x4f   :  { %4703 = shalt.err (!%p4700_p12)
}
  0x50   :  { %s4704_s29 = scalar_lea.vmem %s4998_s25, 256  ;;  %p4709_p0 = scmp.lt.s32.totalorder %s4998_s25, %s4998_s25 }
  0x51   :  { %p4705_p13 = scmp.ne.s32.totalorder %s4998_s25, %s4704_s29  ;;  %p4710_p1 = scmp.lt.s32.totalorder %s4704_s29, %s4704_s29 }
  0x53   :  { %p4711_p2 = por %p4710_p1, %p4709_p0 }
  0x55   :  { %p4712_p3 = pnand %p4711_p2, %p4705_p13 }
  0x57   :  { %4715 = shalt.err (!%p4712_p3)
}
  0x58   :  { %42 = dma.hbm_to_vmem [thread:$0]  %s5634_s20, 256, %s4998_s25, [#allocation4], %s4840_s0, %s4840_s0, %s4841_s21  }
  0x59   :  { %s4844_s30 = smov [#allocation8]   ;;  %s4845_s24 = smov [#allocation11]  }
  0x5a   :  { %s66_s8 = sshll.u32 %s4844_s30, 4  ;;  %s94_s22 = sshll.u32 %s4845_s24, 4  ;;  %s67_s8 = int_to_ptr.vmem [resolvable:$true] %s66_s8  ;;  %s5035_s22 = int_to_ptr.vmem [resolvable:$true] %s94_s22 }
  0x5b   :  { %s4716_s2 = scalar_lea.hbm %s5605_s5, 512 }
  0x5c   :  { %p4717_p4 = scmp.ne.s32.totalorder %s5605_s5, %s4716_s2  ;;  %p4720_p5 = scmp.lt.u32.totalorder %s4716_s2, %s5605_s5 }
  0x5e   :  { %p4722_p6 = pnand %p4720_p5, %p4717_p4 }
  0x60   :  { %4725 = shalt.err (!%p4722_p6)
}
  0x61   :  { %s4726_s25 = scalar_lea.vmem %s67_s8, 512  ;;  %p4731_p8 = scmp.lt.s32.totalorder %s67_s8, %s67_s8 }
  0x62   :  { %p4727_p7 = scmp.ne.s32.totalorder %s67_s8, %s4726_s25  ;;  %p4732_p9 = scmp.lt.s32.totalorder %s4726_s25, %s4726_s25 }
  0x64   :  { %p4733_p10 = por %p4732_p9, %p4731_p8 }
  0x66   :  { %p4734_p11 = pnand %p4733_p10, %p4727_p7 }
  0x68   :  { %4737 = shalt.err (!%p4734_p11)
}
  0x69   :  { %72 = dma.hbm_to_vmem [thread:$0]  %s5605_s5, 512, %s67_s8, [#allocation7], %s4840_s0, %s4840_s0, %s4841_s21  }
  0x6a   :  { %s4738_s30 = scalar_lea.hbm %s5609_s9, 512 }
  0x6b   :  { %p4739_p12 = scmp.ne.s32.totalorder %s5609_s9, %s4738_s30  ;;  %p4742_p13 = scmp.lt.u32.totalorder %s4738_s30, %s5609_s9 }
  0x6d   :  { %p4744_p0 = pnand %p4742_p13, %p4739_p12 }
  0x6f   :  { %4747 = shalt.err (!%p4744_p0)
}
  0x70   :  { %s4748_s26 = scalar_lea.vmem %s5035_s22, 512  ;;  %p4753_p2 = scmp.lt.s32.totalorder %s5035_s22, %s5035_s22 }
  0x71   :  { %p4749_p1 = scmp.ne.s32.totalorder %s5035_s22, %s4748_s26  ;;  %p4754_p3 = scmp.lt.s32.totalorder %s4748_s26, %s4748_s26 }
  0x73   :  { %p4755_p4 = por %p4754_p3, %p4753_p2 }
  0x75   :  { %p4756_p5 = pnand %p4755_p4, %p4749_p1 }
  0x77   :  { %4759 = shalt.err (!%p4756_p5)
}
  0x78   :  { %100 = dma.hbm_to_vmem [thread:$0]  %s5609_s9, 512, %s5035_s22, [#allocation10], %s4840_s0, %s4840_s0, %s4841_s21  }
  0x79   :  { %s4846_s27 = smov [#allocation14]   ;;  %s4847_s4 = smov [#allocation15]  }
  0x7a   :  { %s118_s28 = sshll.u32 %s4846_s27, 4  ;;  %s134_s25 = sshll.u32 %s4847_s4, 4  ;;  %s119_s28 = int_to_ptr.vmem [resolvable:$true] %s118_s28  ;;  %s5072_s25 = int_to_ptr.vmem [resolvable:$true] %s134_s25 }
  0x7b   :  { %s4760_s10 = scalar_lea.hbm %s5611_s11, 512 }
  0x7c   :  { %p4761_p6 = scmp.ne.s32.totalorder %s5611_s11, %s4760_s10  ;;  %p4764_p7 = scmp.lt.u32.totalorder %s4760_s10, %s5611_s11 }
  0x7e   :  { %p4766_p8 = pnand %p4764_p7, %p4761_p6 }
  0x80   :  { %4769 = shalt.err (!%p4766_p8)
}
  0x81   :  { %s4770_s9 = scalar_lea.vmem %s119_s28, 512  ;;  %p4775_p10 = scmp.lt.s32.totalorder %s119_s28, %s119_s28 }
  0x82   :  { %p4771_p9 = scmp.ne.s32.totalorder %s119_s28, %s4770_s9  ;;  %p4776_p11 = scmp.lt.s32.totalorder %s4770_s9, %s4770_s9 }
  0x84   :  { %p4777_p12 = por %p4776_p11, %p4775_p10 }
  0x86   :  { %p4778_p13 = pnand %p4777_p12, %p4771_p9 }
  0x88   :  { %4781 = shalt.err (!%p4778_p13)
}
  0x89   :  { %124 = dma.hbm_to_vmem [thread:$0]  %s5611_s11, 512, %s119_s28, [#allocation13], %s4840_s0, %s4840_s0, %s4841_s21  }
  0x8a   :  { %s4782_s5 = scalar_lea.hbm %s5614_s14, 512 }
  0x8b   :  { %p4783_p0 = scmp.ne.s32.totalorder %s5614_s14, %s4782_s5  ;;  %p4786_p1 = scmp.lt.u32.totalorder %s4782_s5, %s5614_s14 }
  0x8d   :  { %p4788_p2 = pnand %p4786_p1, %p4783_p0 }
  0x8f   :  { %4791 = shalt.err (!%p4788_p2)
}
  0x90   :  { %s4792_s29 = scalar_lea.vmem %s5072_s25, 512  ;;  %p4797_p4 = scmp.lt.s32.totalorder %s5072_s25, %s5072_s25 }
  0x91   :  { %p4793_p3 = scmp.ne.s32.totalorder %s5072_s25, %s4792_s29  ;;  %p4798_p5 = scmp.lt.s32.totalorder %s4792_s29, %s4792_s29 }
  0x93   :  { %p4799_p6 = por %p4798_p5, %p4797_p4 }
  0x95   :  { %p4800_p7 = pnand %p4799_p6, %p4793_p3 }
  0x97   :  { %4803 = shalt.err (!%p4800_p7)
}
  0x98   :  { %140 = dma.hbm_to_vmem [thread:$0]  %s5614_s14, 512, %s5072_s25, [#allocation16], %s4840_s0, %s4840_s0, %s4841_s21  }
  0x99   :  { %4826 = dma.done.wait [#allocation4], 256  }
  0x9a   :  { %4827 = vsyncadd [#allocation4], 4294967040 }
  0x9b   :  { %4828 = dma.done.wait [#allocation7], 768  }
  0x9c   :  { %4829 = vsyncadd [#allocation7], 4294966528 }
  0x9d   :  { %4830 = dma.done.wait [#allocation10], 1024  }
  0x9e   :  { %4831 = vsyncadd [#allocation10], 4294966272 }
  0x9f   :  { %4832 = dma.done.wait [#allocation13], 1024  }
  0xa0   :  { %4833 = vsyncadd [#allocation13], 4294966272 }
  0xa1   :  { %4834 = dma.done.wait [#allocation16], 512  }
  0xa2   :  { %4835 = vsyncadd [#allocation16], 4294966784  ;;  %vm195_vm0 = vcmask 261120   ;;  %s5635_s30 = sld [smem:[#allocation26_spill]]  ;;  %v5121_v5 = vld [vmem:[#allocation3] sm:$0xff]  ;;  %s5636_s26 = sld [smem:[#allocation27_spill]]  ;;  %v429_v27 = vlaneseq }
  0xa3   :  { %4164 = vmatprep.mubr.msk.f32.mxu1 %vm195_vm0, %v5121_v5  ;;  %4186 = vmatprep.mubr.msk.f32.mxu0 %vm195_vm0, %v5121_v5  ;;  %v5139_v12 = vld [vmem:[#allocation3 + $0x8] sm:$0xff]  ;;  %v4848_v14 = vmov 0.0   ;;  %vm4849_vm1 = vmmov 0   ;;  %vm435_vm2 = vcmask 64512   ;;  %s4850_s11 = smov 120   ;;  %s5637_s23 = sld [smem:[#allocation28_spill]] }
  0xa4   :  { %v430_v28 = vshrl.u32 %v429_v27, 7  ;;  %v432_v29 = vand.u32 127, %v429_v27  ;;  %s4851_s22 = smov 112   ;;  %s4852_s1 = smov 104   ;;  %vm1102_vm4 = vcmask 130112   ;;  %vm1445_vm5 = vcmask 195712  }
  0xa5   :  { %s4853_s2 = smov 16   ;;  %vm1788_vm6 = vcmask 261312   ;;  %vm3787_vm15 = vcmask 523264  }
  0xa6   :  { %vm433_vm3 = vcmp.gt.s32.totalorder %v432_v29, %v430_v28 }
  0xa7   :  { %v5194_v30 = vsel %vm433_vm3, 1.7677669e+09, %v4848_v14 }
  0xa8   :  { %v179_v0 = vld [vmem:[%s5635_s30] sm:$0xff]  ;;  %v180_v1 = vld [vmem:[%s5635_s30 + $0x8] sm:$0xff]  ;;  %v181_v2 = vld [vmem:[%s5635_s30 + $0x10] sm:$0xff] }
  0xa9   :  { %v4434_v3 = vpack.c.bf16 %v180_v1, %v179_v0  ;;  %v182_v4 = vld [vmem:[%s5635_s30 + $0x18] sm:$0xff]  ;;  %v183_v7 = vld [vmem:[%s5636_s26] sm:$0xff]  ;;  %v184_v8 = vld [vmem:[%s5636_s26 + $0x8] sm:$0xff] }
  0xaa   :  { %v4438_v6 = vpack.c.bf16 %v182_v4, %v181_v2  ;;  %v4442_v9 = vpack.c.bf16 %v184_v8, %v183_v7  ;;  %v185_v10 = vld [vmem:[%s5636_s26 + $0x10] sm:$0xff]  ;;  %v186_v11 = vld [vmem:[%s5636_s26 + $0x18] sm:$0xff]  ;;  %v187_v21 = vld [vmem:[%s5637_s23] sm:$0xff]  ;;  %s4854_s26 = smov 24  }
  0xab   :  { %4435 = vmatprep.subr.bf16.mxu1 %v4434_v3  ;;  %v4446_v13 = vpack.c.bf16 %v186_v11, %v185_v10  ;;  %v188_v22 = vld [vmem:[%s5637_s23 + $0x8] sm:$0xff]  ;;  %v189_v23 = vld [vmem:[%s5637_s23 + $0x10] sm:$0xff]  ;;  %v190_v25 = vld [vmem:[%s5637_s23 + $0x18] sm:$0xff] }
  0xac   :  { %4437 = vmatpush3.bf16.msra.mxu1 %v4434_v3  ;;  %v4450_v24 = vpack.c.bf16 %v188_v22, %v187_v21  ;;  %v4454_v26 = vpack.c.bf16 %v190_v25, %v189_v23 }
  0xad   :  { %4439 = vmatprep.subr.bf16.mxu1 %v4438_v6 }
  0xae   :  { %4451 = vmatprep.subr.bf16.mxu0 %v4450_v24 }
  0xaf   :  { %4453 = vmatpush3.bf16.msra.mxu0 %v4450_v24 }
  0xb0   :  { %4441 = vmatpush3.bf16.msra.mxu1 %v4438_v6  ;;  %4455 = vmatprep.subr.bf16.mxu0 %v4454_v26 }
  0xb1   :  { %4443 = vmatprep.subr.bf16.mxu1 %v4442_v9 }
  0xb3   :  { %4165 = vmatmul.mubr.msk.f32.vlgmr.msra.gmra.mrb[0].mxu1 %vm195_vm0, %v5139_v12  ;;  %4457 = vmatpush3.bf16.msra.mxu0 %v4454_v26 }
  0xb4   :  { %4445 = vmatpush3.bf16.msra.mxu1 %v4442_v9  ;;  %4175 = vmatprep.mubr.msk.f32.mxu1 %vm195_vm0, %v5121_v5 }
  0xb5   :  { %4447 = vmatprep.subr.bf16.mxu1 %v4446_v13  ;;  %4199 = vmatprep.subr.mxu0 %v4848_v14 }
  0xb6   :  { %4187 = vmatmul.mubr.msk.f32.vlgmr.msra.gmra.mrb[0].mxu0 %vm195_vm0, %v5139_v12 }
  0xb7   :  { %4201 = vmatprep.mubr.msk.f32.mxu0 %vm4849_vm1, %v4848_v14 }
  0xb8   :  { %4449 = vmatpush3.bf16.msra.mxu1 %v4446_v13 }
  0xb9   :  { %4189 = vmatprep.subr.mxu1 %v4848_v14 }
  0xbb   :  { %4176 = vmatmul.mubr.msk.f32.vlgmr.msra.gmra.mrb[2].mxu1 %vm195_vm0, %v5139_v12 }
  0xbc   :  { %4191 = vmatprep.mubr.msk.f32.mxu1 %vm4849_vm1, %v4848_v14 }
 0x186   :  { %v4166_v15 = vpop.f32.mrb[0].mxu1 }
 0x187   :  { %v268_v16 = vpop.f32.mrb[1].mxu1  ;;  %v5169_v20 = vmul.f32 0.17677669, %v4166_v15 }
 0x188   :  { %v5158_v19 = vmul.f32 0.17677669, %v268_v16 }
 0x189   :  { %v5204_v49 = vpop.f32.mrb[0].mxu0 }
 0x18a   :  { %v5206_v50 = vpop.f32.mrb[1].mxu0 }
 0x18b   :  { %4200 = vmatpush3.msra.mxu0 %v5206_v50 }
 0x18c   :  { %4209 = vmatprep.subr.mxu0 %v4848_v14 }
 0x18e   :  { %v5150_v17 = vpop.f32.mrb[2].mxu1 }
 0x18f   :  { %840 = vrot.lane.b32.xlu1 %v5150_v17, %s4850_s11  ;;  %v5154_v18 = vpop.f32.mrb[3].mxu1 }
 0x190   :  { %4190 = vmatpush3.xpose.msk.msra.mxu1 %vm435_vm2, %v5154_v18 }
 0x191   :  { %4194 = vmatprep.subr.mxu1 %v4848_v14 }
 0x193   :  { %760 = vrot.lane.b32.xlu1 %v5158_v19, %s4850_s11  ;;  %4192 = vmatmul.mubr.msk.f32.vlgmr.msra.gmra.mrb[4].mxu1 %vm435_vm2, %v5158_v19 }
 0x194   :  { %4195 = vmatpush3.xpose.msk.msra.mxu1 %vm435_vm2, %v5150_v17  ;;  %4196 = vmatprep.mubr.msk.f32.mxu1 %vm4849_vm1, %v4848_v14 }
 0x195   :  { %4204 = vmatprep.subr.mxu1 %v4848_v14 }
 0x197   :  { %4197 = vmatmul.mubr.msk.f32.vlgmr.msra.gmra.mrb[6].mxu1 %vm435_vm2, %v5169_v20 }
 0x198   :  { %4206 = vmatprep.mubr.msk.f32.mxu1 %vm4849_vm1, %v4848_v14  ;;  %4205 = vmatpush3.msra.mxu1 %v5204_v49 }
 0x199   :  { %4214 = vmatprep.subr.mxu1 %v4848_v14 }
 0x201   :  { %v841_v51 = vpop.permute.xlu1 %840 }
 0x205   :  { %v761_v52 = vpop.permute.xlu1 %760 }
 0x266   :  { %v508_v31 = vpop.f32.mrb[4].mxu1 }
 0x267   :  { %v588_v32 = vsub.f32 %v508_v31, %v5194_v30  ;;  %v4193_v33 = vpop.f32.mrb[5].mxu1 }
 0x269   :  { %v590_v34 = vsel %vm435_vm2, %v588_v32, -inf }
 0x26a   :  { %591 = vmax.xlane.f32.xlu0 %v590_v34  ;;  %v584_v35 = vpop.f32.mrb[6].mxu1 }
 0x26b   :  { %v589_v36 = vsub.f32 %v584_v35, %v5194_v30  ;;  %v4198_v37 = vpop.f32.mrb[7].mxu1 }
 0x26d   :  { %v593_v38 = vsel %vm435_vm2, %v589_v36, -inf }
 0x26e   :  { %594 = vmax.xlane.f32.xlu0 %v593_v38 }
 0x284   :  { %762 = vrot.lane.b32.xlu0 %v5154_v18, %s4850_s11 }
 0x2f7   :  { %v592_v39 = vpop.xlane.xlu0 %591 }
 0x2f8   :  { %v596_v40 = vsub.f32 %v588_v32, %v592_v39 }
 0x2fa   :  { %v598_v41 = vmul.f32 1.442695, %v596_v40 }
 0x2fb   :  { %v595_v42 = vpop.xlane.xlu0 %594 }
 0x2fc   :  { %4540 = vpow2.f32 %v598_v41  ;;  %v597_v43 = vsub.f32 %v589_v36, %v595_v42 }
 0x2fe   :  { %v600_v44 = vmul.f32 1.442695, %v597_v43 }
 0x2ff   :  { %v763_v57 = vpop.permute.xlu0 %762 }
 0x300   :  { %4542 = vpow2.f32 %v600_v44 }
 0x306   :  { %v4541_v45 = vpop.eup %4540 }
 0x307   :  { %v602_v46 = vsel %vm435_vm2, %v4541_v45, 0.0 }
 0x308   :  { %603 = vadd.xlane.f32.xlu1 %v602_v46 }
 0x30a   :  { %v4543_v47 = vpop.eup %4542 }
 0x30b   :  { %v605_v48 = vsel %vm435_vm2, %v4543_v47, 0.0 }
 0x30c   :  { %606 = vadd.xlane.f32.xlu1 %v605_v48 }
 0x31d   :  { %838 = vrot.lane.b32.xlu1 %v5169_v20, %s4850_s11 }
 0x395   :  { %v604_v53 = vpop.xlane.xlu1 %603 }
 0x396   :  { %4544 = vrcp.f32 %v604_v53 }
 0x399   :  { %v607_v54 = vpop.xlane.xlu1 %606 }
 0x39a   :  { %4546 = vrcp.f32 %v607_v54 }
 0x39d   :  { %v839_v60 = vpop.permute.xlu1 %838 }
 0x3a0   :  { %v4545_v55 = vpop.eup %4544 }
 0x3a1   :  { %v610_v56 = vmul.f32 %v4545_v55, %v4541_v45 }
 0x3a3   :  { %4202 = vmatmul.mubr.msk.f32.vlgmr.msra.gmra.mrb[2].mxu0 %vm435_vm2, %v610_v56 }
 0x3a4   :  { %v4547_v58 = vpop.eup %4546  ;;  %4210 = vmatpush3.xpose.msk.msra.mxu0 %vm435_vm2, %v763_v57  ;;  %4211 = vmatprep.mubr.msk.f32.mxu0 %vm4849_vm1, %v4848_v14 }
 0x3a5   :  { %v611_v59 = vmul.f32 %v4547_v58, %v4543_v47  ;;  %4219 = vmatprep.subr.mxu0 %v4848_v14 }
 0x3a7   :  { %4207 = vmatmul.mubr.msk.f32.vlgmr.msra.gmra.mrb[8].mxu1 %vm435_vm2, %v611_v59  ;;  %4212 = vmatmul.mubr.msk.f32.vlgmr.msra.gmra.mrb[4].mxu0 %vm435_vm2, %v761_v52 }
 0x3a8   :  { %4215 = vmatpush3.xpose.msk.msra.mxu1 %vm435_vm2, %v841_v51  ;;  %4216 = vmatprep.mubr.msk.f32.mxu1 %vm4849_vm1, %v4848_v14 }
 0x3a9   :  { %4224 = vmatprep.subr.mxu1 %v4848_v14  ;;  %4221 = vmatprep.mubr.msk.f32.mxu0 %vm4849_vm1, %v4848_v14 }
 0x3ab   :  { %4217 = vmatmul.mubr.msk.f32.vlgmr.msra.gmra.mrb[10].mxu1 %vm435_vm2, %v839_v60 }
 0x3ac   :  { %4226 = vmatprep.mubr.msk.f32.mxu1 %vm4849_vm1, %v4848_v14 }
 0x476   :  { %v681_v61 = vpop.f32.mrb[2].mxu0 }
 0x477   :  { %758 = vst.msk [vmem:[#allocation2] sm:$0xff] %vm435_vm2, %v681_v61  ;;  %v4203_v62 = vpop.f32.mrb[3].mxu0 }
 0x47a   :  { %v754_v63 = vpop.f32.mrb[8].mxu1  ;;  %v834_v0 = vpop.f32.mrb[4].mxu0 }
 0x47b   :  { %759 = vst.msk [vmem:[#allocation2 + $0x8] sm:$0xff] %vm435_vm2, %v754_v63  ;;  %v916_v1 = vsub.f32 %v834_v0, %v5194_v30  ;;  %v4208_v2 = vpop.f32.mrb[9].mxu1  ;;  %v4213_v3 = vpop.f32.mrb[5].mxu0 }
 0x47d   :  { %v918_v4 = vsel %vm435_vm2, %v916_v1, -inf }
 0x47e   :  { %919 = vmax.xlane.f32.xlu0 %v918_v4  ;;  %v912_v6 = vpop.f32.mrb[10].mxu1 }
 0x47f   :  { %v917_v7 = vsub.f32 %v912_v6, %v5194_v30  ;;  %v4218_v8 = vpop.f32.mrb[11].mxu1 }
 0x481   :  { %v921_v9 = vsel %vm435_vm2, %v917_v7, -inf }
 0x482   :  { %922 = vmax.xlane.f32.xlu1 %v921_v9 }
 0x493   :  { %1018 = vrot.lane.b32.xlu1 %v5204_v49, %s4850_s11 }
 0x494   :  { %941 = vrot.lane.b32.xlu0 %v5206_v50, %s4850_s11 }
 0x497   :  { %1107 = vrot.lane.b32.xlu1 %v5154_v18, %s4851_s22 }
 0x49b   :  { %1185 = vrot.lane.b32.xlu1 %v5150_v17, %s4851_s22 }
 0x49f   :  { %1183 = vrot.lane.b32.xlu1 %v5169_v20, %s4851_s22 }
 0x50b   :  { %v920_v10 = vpop.xlane.xlu0 %919 }
 0x50c   :  { %v924_v11 = vsub.f32 %v916_v1, %v920_v10 }
 0x50e   :  { %v926_v13 = vmul.f32 1.442695, %v924_v11 }
 0x50f   :  { %v942_v15 = vpop.permute.xlu0 %941  ;;  %v923_v16 = vpop.xlane.xlu1 %922 }
 0x510   :  { %4548 = vpow2.f32 %v926_v13  ;;  %v925_v21 = vsub.f32 %v917_v7, %v923_v16  ;;  %4220 = vmatpush3.msra.mxu0 %v942_v15 }
 0x511   :  { %4229 = vmatprep.subr.mxu0 %v4848_v14 }
 0x512   :  { %v928_v22 = vmul.f32 1.442695, %v925_v21 }
 0x513   :  { %v1019_v23 = vpop.permute.xlu1 %1018 }
 0x514   :  { %4550 = vpow2.f32 %v928_v22  ;;  %4225 = vmatpush3.msra.mxu1 %v1019_v23 }
 0x515   :  { %4234 = vmatprep.subr.mxu1 %v4848_v14 }
 0x517   :  { %v1108_v31 = vpop.permute.xlu1 %1107 }
 0x51a   :  { %v4549_v24 = vpop.eup %4548 }
 0x51b   :  { %v930_v25 = vsel %vm435_vm2, %v4549_v24, 0.0  ;;  %v1186_v35 = vpop.permute.xlu1 %1185 }
 0x51c   :  { %931 = vadd.xlane.f32.xlu0 %v930_v25 }
 0x51e   :  { %v4551_v26 = vpop.eup %4550 }
 0x51f   :  { %v933_v27 = vsel %vm435_vm2, %v4551_v26, 0.0  ;;  %v1184_v38 = vpop.permute.xlu1 %1183 }
 0x520   :  { %934 = vadd.xlane.f32.xlu0 %v933_v27 }
 0x536   :  { %1105 = vrot.lane.b32.xlu0 %v5158_v19, %s4851_s22 }
 0x5a9   :  { %v932_v28 = vpop.xlane.xlu0 %931 }
 0x5aa   :  { %4552 = vrcp.f32 %v932_v28 }
 0x5ad   :  { %v935_v29 = vpop.xlane.xlu0 %934 }
 0x5ae   :  { %4554 = vrcp.f32 %v935_v29 }
 0x5b1   :  { %v1106_v37 = vpop.permute.xlu0 %1105 }
 0x5b4   :  { %v4553_v32 = vpop.eup %4552 }
 0x5b5   :  { %v938_v33 = vmul.f32 %v4553_v32, %v4549_v24 }
 0x5b7   :  { %4222 = vmatmul.mubr.msk.f32.vlgmr.msra.gmra.mrb[6].mxu0 %vm435_vm2, %v938_v33 }
 0x5b8   :  { %v4555_v34 = vpop.eup %4554  ;;  %4230 = vmatpush3.xpose.msk.msra.mxu0 %vm435_vm2, %v1108_v31  ;;  %4231 = vmatprep.mubr.msk.f32.mxu0 %vm4849_vm1, %v4848_v14 }
 0x5b9   :  { %v939_v36 = vmul.f32 %v4555_v34, %v4551_v26  ;;  %4239 = vmatprep.subr.mxu0 %v4848_v14 }
 0x5bb   :  { %4227 = vmatmul.mubr.msk.f32.vlgmr.msra.gmra.mrb[12].mxu1 %vm435_vm2, %v939_v36  ;;  %4232 = vmatmul.mubr.msk.f32.vlgmr.msra.gmra.mrb[8].mxu0 %vm435_vm2, %v1106_v37 }
 0x5bc   :  { %4235 = vmatpush3.xpose.msk.msra.mxu1 %vm435_vm2, %v1186_v35  ;;  %4236 = vmatprep.mubr.msk.f32.mxu1 %vm4849_vm1, %v4848_v14 }
 0x5bd   :  { %4244 = vmatprep.subr.mxu1 %v4848_v14  ;;  %4241 = vmatprep.mubr.msk.f32.mxu0 %vm4849_vm1, %v4848_v14 }
 0x5bf   :  { %4237 = vmatmul.mubr.msk.f32.vlgmr.msra.gmra.mrb[14].mxu1 %vm435_vm2, %v1184_v38 }
 0x5c0   :  { %4246 = vmatprep.mubr.msk.f32.mxu1 %vm4849_vm1, %v4848_v14 }
 0x68a   :  { %v5268_v39 = vpop.f32.mrb[6].mxu0 }
 0x68b   :  { %v4223_v40 = vpop.f32.mrb[7].mxu0 }
 0x68e   :  { %v5270_v41 = vpop.f32.mrb[12].mxu1  ;;  %v1179_v42 = vpop.f32.mrb[8].mxu0 }
 0x68f   :  { %v1261_v43 = vsub.f32 %v1179_v42, %v5194_v30  ;;  %v4228_v44 = vpop.f32.mrb[13].mxu1  ;;  %v4233_v45 = vpop.f32.mrb[9].mxu0 }
 0x691   :  { %v1263_v46 = vsel %vm435_vm2, %v1261_v43, -inf }
 0x692   :  { %1264 = vmax.xlane.f32.xlu0 %v1263_v46  ;;  %v1257_v47 = vpop.f32.mrb[14].mxu1 }
 0x693   :  { %v1262_v48 = vsub.f32 %v1257_v47, %v5194_v30  ;;  %v4238_v51 = vpop.f32.mrb[15].mxu1  ;;  %v192_v47 = vld [vmem:[#allocation8 + $0x8] sm:$0xff] }
 0x694   :  { %v193_v51 = vld [vmem:[#allocation8 + $0x10] sm:$0xff] }
 0x695   :  { %v1266_v52 = vsel %vm435_vm2, %v1262_v48, -inf }
 0x696   :  { %1267 = vmax.xlane.f32.xlu1 %v1266_v52  ;;  %v194_v52 = vld [vmem:[#allocation8 + $0x18] sm:$0xff] }
 0x6a7   :  { %1361 = vrot.lane.b32.xlu1 %v5204_v49, %s4851_s22 }
 0x6a8   :  { %1285 = vrot.lane.b32.xlu0 %v5206_v50, %s4851_s22 }
 0x6ab   :  { %1450 = vrot.lane.b32.xlu1 %v5154_v18, %s4852_s1 }
 0x6af   :  { %1528 = vrot.lane.b32.xlu1 %v5150_v17, %s4852_s1 }
 0x6b3   :  { %1526 = vrot.lane.b32.xlu1 %v5169_v20, %s4852_s1 }
 0x71f   :  { %v1265_v53 = vpop.xlane.xlu0 %1264 }
 0x720   :  { %v1269_v54 = vsub.f32 %v1261_v43, %v1265_v53  ;;  %v4462_v53 = vpack.c.bf16 %v194_v52, %v193_v51  ;;  %v3985_v51 = vld [vmem:[%s5607_s7] ss:$0 sm:$0xff]  ;;  %s4855_s7 = smov [#allocation17]  }
 0x721   :  { %s3936_s20 = sshll.u32 %s4855_s7, 4  ;;  %s3937_s20 = int_to_ptr.vmem [resolvable:$true] %s3936_s20 }
 0x722   :  { %v1271_v55 = vmul.f32 1.442695, %v1269_v54  ;;  %p4809_p9 = scmp.lt.s32.totalorder %s3937_s20, %s3937_s20 }
 0x723   :  { %v1286_v56 = vpop.permute.xlu0 %1285  ;;  %v1268_v57 = vpop.xlane.xlu1 %1267 }
 0x724   :  { %4556 = vpow2.f32 %v1271_v55  ;;  %v1270_v58 = vsub.f32 %v1262_v48, %v1268_v57  ;;  %4240 = vmatpush3.msra.mxu0 %v1286_v56 }
 0x725   :  { %4249 = vmatprep.subr.mxu0 %v4848_v14 }
 0x726   :  { %v1273_v59 = vmul.f32 1.442695, %v1270_v58 }
 0x727   :  { %v1362_v60 = vpop.permute.xlu1 %1361 }
 0x728   :  { %4558 = vpow2.f32 %v1273_v59  ;;  %4245 = vmatpush3.msra.mxu1 %v1362_v60 }
 0x729   :  { %4254 = vmatprep.subr.mxu1 %v4848_v14 }
 0x72b   :  { %v1451_v0 = vpop.permute.xlu1 %1450 }
 0x72e   :  { %v4557_v17 = vpop.eup %4556 }
 0x72f   :  { %v1275_v18 = vsel %vm435_vm2, %v4557_v17, 0.0  ;;  %v1529_v4 = vpop.permute.xlu1 %1528 }
 0x730   :  { %1276 = vadd.xlane.f32.xlu0 %v1275_v18 }
 0x732   :  { %v4559_v20 = vpop.eup %4558 }
 0x733   :  { %v1278_v61 = vsel %vm435_vm2, %v4559_v20, 0.0  ;;  %v1527_v7 = vpop.permute.xlu1 %1526 }
 0x734   :  { %1279 = vadd.xlane.f32.xlu0 %v1278_v61 }
 0x74a   :  { %1448 = vrot.lane.b32.xlu0 %v5158_v19, %s4852_s1 }
 0x7bd   :  { %v1277_v62 = vpop.xlane.xlu0 %1276 }
 0x7be   :  { %4560 = vrcp.f32 %v1277_v62 }
 0x7c1   :  { %v1280_v63 = vpop.xlane.xlu0 %1279 }
 0x7c2   :  { %4562 = vrcp.f32 %v1280_v63 }
 0x7c5   :  { %v1449_v19 = vpop.permute.xlu0 %1448 }
 0x7c8   :  { %v4561_v1 = vpop.eup %4560 }
 0x7c9   :  { %v1283_v2 = vmul.f32 %v4561_v1, %v4557_v17 }
 0x7cb   :  { %4242 = vmatmul.mubr.msk.f32.vlgmr.msra.gmra.mrb[10].mxu0 %vm435_vm2, %v1283_v2 }
 0x7cc   :  { %v4563_v3 = vpop.eup %4562  ;;  %4250 = vmatpush3.xpose.msk.msra.mxu0 %vm435_vm2, %v1451_v0  ;;  %4251 = vmatprep.mubr.msk.f32.mxu0 %vm4849_vm1, %v4848_v14 }
 0x7cd   :  { %v1284_v6 = vmul.f32 %v4563_v3, %v4559_v20  ;;  %4259 = vmatprep.subr.mxu0 %v4848_v14 }
 0x7cf   :  { %4247 = vmatmul.mubr.msk.f32.vlgmr.msra.gmra.mrb[16].mxu1 %vm435_vm2, %v1284_v6  ;;  %4252 = vmatmul.mubr.msk.f32.vlgmr.msra.gmra.mrb[12].mxu0 %vm435_vm2, %v1449_v19 }
 0x7d0   :  { %4255 = vmatpush3.xpose.msk.msra.mxu1 %vm435_vm2, %v1529_v4  ;;  %4256 = vmatprep.mubr.msk.f32.mxu1 %vm4849_vm1, %v4848_v14 }
 0x7d1   :  { %4264 = vmatprep.subr.mxu1 %v4848_v14  ;;  %4261 = vmatprep.mubr.msk.f32.mxu0 %vm4849_vm1, %v4848_v14 }
 0x7d3   :  { %4257 = vmatmul.mubr.msk.f32.vlgmr.msra.gmra.mrb[18].mxu1 %vm435_vm2, %v1527_v7 }
 0x7d4   :  { %4266 = vmatprep.mubr.msk.f32.mxu1 %vm4849_vm1, %v4848_v14 }
 0x89e   :  { %v1357_v8 = vpop.f32.mrb[10].mxu0 }
 0x89f   :  { %v4243_v9 = vpop.f32.mrb[11].mxu0 }
 0x8a0   :  { %v1940_v9 = vld [vmem:[#allocation11] sm:$0xff] }
 0x8a2   :  { %v1433_v10 = vpop.f32.mrb[16].mxu1  ;;  %v1522_v11 = vpop.f32.mrb[12].mxu0 }
 0x8a3   :  { %v1604_v13 = vsub.f32 %v1522_v11, %v5194_v30  ;;  %v4248_v15 = vpop.f32.mrb[17].mxu1  ;;  %v4253_v16 = vpop.f32.mrb[13].mxu0  ;;  %v1936_v11 = vld [vmem:[#allocation9] sm:$0xff] }
 0x8a4   :  { %v1937_v15 = vld [vmem:[#allocation9 + $0x8] sm:$0xff]  ;;  %v1942_v16 = vld [vmem:[#allocation11 + $0x10] sm:$0xff] }
 0x8a5   :  { %v1606_v21 = vsel %vm435_vm2, %v1604_v13, -inf }
 0x8a6   :  { %1607 = vmax.xlane.f32.xlu0 %v1606_v21  ;;  %v1600_v22 = vpop.f32.mrb[18].mxu1  ;;  %v1943_v21 = vld [vmem:[#allocation11 + $0x18] sm:$0xff] }
 0x8a7   :  { %v1605_v23 = vsub.f32 %v1600_v22, %v5194_v30  ;;  %v4258_v24 = vpop.f32.mrb[19].mxu1  ;;  %v4466_v22 = vpack.c.bf16 %v1937_v15, %v1936_v11 }
 0x8a8   :  { %v1938_v24 = vld [vmem:[#allocation9 + $0x10] sm:$0xff] }
 0x8a9   :  { %v1609_v25 = vsel %vm435_vm2, %v1605_v23, -inf }
 0x8aa   :  { %1610 = vmax.xlane.f32.xlu1 %v1609_v25  ;;  %v1939_v25 = vld [vmem:[#allocation9 + $0x18] sm:$0xff] }
 0x8bb   :  { %1704 = vrot.lane.b32.xlu1 %v5204_v49, %s4852_s1 }
 0x8bf   :  { %1096 = vrot.lane.b32.xlu1 %v5268_v39, %s4841_s21 }
 0x8c3   :  { %1098 = vrot.lane.b32.xlu1 %v5270_v41, %s4841_s21 }
 0x8c7   :  { %1441 = vrot.lane.b32.xlu1 %v1433_v10, %s4853_s2  ;;  %v1941_v10 = vld [vmem:[#allocation11 + $0x8] sm:$0xff] }
 0x933   :  { %v1608_v26 = vpop.xlane.xlu0 %1607 }
 0x934   :  { %v1612_v27 = vsub.f32 %v1604_v13, %v1608_v26  ;;  %v4474_v13 = vpack.c.bf16 %v1941_v10, %v1940_v9  ;;  %v4470_v26 = vpack.c.bf16 %v1939_v25, %v1938_v24 }
 0x936   :  { %v1614_v28 = vmul.f32 1.442695, %v1612_v27  ;;  %v177_v27 = vld [vmem:[#allocation6] sm:$0xff] }
 0x937   :  { %v1611_v30 = vpop.xlane.xlu1 %1610 }
 0x938   :  { %4564 = vpow2.f32 %v1614_v28  ;;  %v1613_v29 = vsub.f32 %v1605_v23, %v1611_v30  ;;  %v4478_v23 = vpack.c.bf16 %v1943_v21, %v1942_v16  ;;  %v178_v28 = vld [vmem:[#allocation6 + $0x8] sm:$0xff]  ;;  %v1944_v30 = vld [vmem:[#allocation12] sm:$0xff] }
 0x93a   :  { %v1616_v31 = vmul.f32 1.442695, %v1613_v29  ;;  %v1945_v29 = vld [vmem:[#allocation12 + $0x8] sm:$0xff] }
 0x93b   :  { %v1705_v32 = vpop.permute.xlu1 %1704 }
 0x93c   :  { %4566 = vpow2.f32 %v1616_v31  ;;  %4265 = vmatpush3.msra.mxu1 %v1705_v32  ;;  %v4482_v31 = vpack.c.bf16 %v1945_v29, %v1944_v30 }
 0x93d   :  { %4467 = vmatprep.subr.bf16.mxu1 %v4466_v22 }
 0x93f   :  { %v1097_v49 = vpop.permute.xlu1 %1096 }
 0x940   :  { %1103 = vst.msk [vmem:[#allocation2] sm:$0xff] %vm1102_vm4, %v1097_v49 }
 0x942   :  { %v4565_v33 = vpop.eup %4564 }
 0x943   :  { %v1099_v34 = vpop.permute.xlu1 %1098  ;;  %v1618_v35 = vsel %vm435_vm2, %v4565_v33, 0.0 }
 0x944   :  { %1104 = vst.msk [vmem:[#allocation2 + $0x8] sm:$0xff] %vm1102_vm4, %v1099_v34  ;;  %1619 = vadd.xlane.f32.xlu0 %v1618_v35 }
 0x946   :  { %v4567_v36 = vpop.eup %4566 }
 0x947   :  { %v1442_v37 = vpop.permute.xlu1 %1441  ;;  %v1621_v38 = vsel %vm435_vm2, %v4567_v36, 0.0 }
 0x948   :  { %1447 = vst.msk [vmem:[#allocation2 + $0x8] sm:$0xff] %vm1445_vm5, %v1442_v37  ;;  %1622 = vadd.xlane.f32.xlu0 %v1621_v38 }
 0x95e   :  { %1628 = vrot.lane.b32.xlu0 %v5206_v50, %s4852_s1  ;;  %v191_v50 = vld [vmem:[#allocation8] sm:$0xff] }
 0x95f   :  { %v4458_v48 = vpack.c.bf16 %v192_v47, %v191_v50  ;;  %v3984_v50 = vld [vmem:[%s5606_s6] ss:$0 sm:$0xff] }
 0x962   :  { %1439 = vrot.lane.b32.xlu0 %v1357_v8, %s4853_s2 }
 0x9d1   :  { %v1620_v39 = vpop.xlane.xlu0 %1619 }
 0x9d2   :  { %4568 = vrcp.f32 %v1620_v39 }
 0x9d5   :  { %v1623_v40 = vpop.xlane.xlu0 %1622 }
 0x9d6   :  { %4570 = vrcp.f32 %v1623_v40 }
 0x9d9   :  { %v1629_v41 = vpop.permute.xlu0 %1628 }
 0x9da   :  { %4260 = vmatpush3.msra.mxu0 %v1629_v41 }
 0x9db   :  { %4459 = vmatprep.subr.bf16.mxu0 %v4458_v48 }
 0x9dc   :  { %v4569_v42 = vpop.eup %4568 }
 0x9dd   :  { %v1626_v43 = vmul.f32 %v4569_v42, %v4565_v33  ;;  %v1440_v44 = vpop.permute.xlu0 %1439 }
 0x9de   :  { %1446 = vst.msk [vmem:[#allocation2] sm:$0xff] %vm1445_vm5, %v1440_v44 }
 0x9df   :  { %4262 = vmatmul.mubr.msk.f32.vlgmr.msra.gmra.mrb[14].mxu0 %vm435_vm2, %v1626_v43 }
 0x9e0   :  { %v4571_v45 = vpop.eup %4570  ;;  %4461 = vmatpush3.bf16.msra.mxu0 %v4458_v48 }
 0x9e1   :  { %v1627_v46 = vmul.f32 %v4571_v45, %v4567_v36  ;;  %4463 = vmatprep.subr.bf16.mxu0 %v4462_v53 }
 0x9e3   :  { %4267 = vmatmul.mubr.msk.f32.vlgmr.msra.gmra.mrb[20].mxu1 %vm435_vm2, %v1627_v46 }
 0x9e4   :  { %4465 = vmatpush3.bf16.msra.mxu0 %v4462_v53  ;;  %4469 = vmatpush3.bf16.msra.mxu1 %v4466_v22 }
 0x9e5   :  { %4475 = vmatprep.subr.bf16.mxu0 %v4474_v13  ;;  %4471 = vmatprep.subr.bf16.mxu1 %v4470_v26 }
 0x9e8   :  { %4473 = vmatpush3.bf16.msra.mxu1 %v4470_v26 }
 0x9e9   :  { %4483 = vmatprep.subr.bf16.mxu1 %v4482_v31 }
 0xab2   :  { %v1700_v54 = vpop.f32.mrb[14].mxu0 }
 0xab3   :  { %1782 = vrot.lane.b32.xlu0 %v1700_v54, %s4854_s26  ;;  %v4263_v55 = vpop.f32.mrb[15].mxu0 }
 0xab6   :  { %v1776_v56 = vpop.f32.mrb[20].mxu1 }
 0xab7   :  { %1784 = vrot.lane.b32.xlu1 %v1776_v56, %s4854_s26  ;;  %v4268_v57 = vpop.f32.mrb[21].mxu1  ;;  %v1946_v56 = vld [vmem:[#allocation12 + $0x10] sm:$0xff] }
 0xab8   :  { %v1947_v57 = vld [vmem:[#allocation12 + $0x18] sm:$0xff] }
 0xb25   :  { %v1783_v58 = vpop.permute.xlu0 %1782 }
 0xb26   :  { %1789 = vst.msk [vmem:[#allocation2] sm:$0xff] %vm1788_vm6, %v1783_v58 }
 0xb29   :  { %v1785_v59 = vpop.permute.xlu1 %1784 }
 0xb2a   :  { %1790 = vst.msk [vmem:[#allocation2 + $0x8] sm:$0xff] %vm1788_vm6, %v1785_v59 }
 0xb2d   :  { %v1791_v60 = vld [vmem:[#allocation2] sm:$0xff] }
 0xb2e   :  { %4277 = vmatprep.mubr.msk.f32.mxu0 %vm195_vm0, %v1791_v60  ;;  %v4486_v60 = vpack.c.bf16 %v1947_v57, %v1946_v56 }
 0xb31   :  { %v1792_v17 = vld [vmem:[#allocation2 + $0x8] sm:$0xff] }
 0xb32   :  { %4278 = vmatmul.mubr.msk.f32.vlgmr.msra.gmra.mrb[16].mxu0 %vm195_vm0, %v1792_v17 }
 0xb33   :  { %4477 = vmatpush3.bf16.msra.mxu0 %v4474_v13  ;;  %4299 = vmatprep.mubr.msk.f32.mxu0 %vm195_vm0, %v177_v27 }
 0xb34   :  { %4479 = vmatprep.subr.bf16.mxu0 %v4478_v23 }
 0xb37   :  { %4481 = vmatpush3.bf16.msra.mxu0 %v4478_v23 }
 0xb38   :  { %4313 = vmatprep.subr.mxu0 %v4848_v14 }
 0xb3a   :  { %4300 = vmatmul.mubr.msk.f32.vlgmr.msra.gmra.mrb[18].mxu0 %vm195_vm0, %v178_v28 }
 0xb3b   :  { %4315 = vmatprep.mubr.msk.f32.mxu0 %vm4849_vm1, %v4848_v14 }
 0xc05   :  { %v4279_v18 = vpop.f32.mrb[16].mxu0 }
 0xc06   :  { %v1875_v20 = vadd.f32 %v4279_v18, %v5139_v12  ;;  %v1865_v61 = vpop.f32.mrb[17].mxu0 }
 0xc07   :  { %v1874_v62 = vadd.f32 %v1865_v61, %v5121_v5 }
 0xc08   :  { %v1881_v63 = vsel %vm195_vm0, %v1875_v20, 0.0 }
 0xc09   :  { %1882 = vadd.xlane.f32.xlu1 %v1881_v63  ;;  %v1878_v0 = vsel %vm195_vm0, %v1874_v62, 0.0 }
 0xc0a   :  { %1879 = vadd.xlane.f32.xlu0 %v1878_v0 }
 0xc0d   :  { %v5371_v17 = vpop.f32.mrb[18].mxu0 }
 0xc0e   :  { %v5373_v18 = vpop.f32.mrb[19].mxu0 }
 0xc0f   :  { %4314 = vmatpush3.xpose.msk.msra.mxu0 %vm435_vm2, %v5373_v18 }
 0xc10   :  { %4323 = vmatprep.subr.mxu0 %v4848_v14 }
 0xc96   :  { %v1883_v1 = vpop.xlane.xlu1 %1882 }
 0xc97   :  { %v1886_v2 = vmul.f32 0.03125, %v1883_v1  ;;  %v1880_v3 = vpop.xlane.xlu0 %1879 }
 0xc98   :  { %v1885_v4 = vmul.f32 0.03125, %v1880_v3 }
 0xc99   :  { %v5340_v6 = vsub.f32 %v1875_v20, %v1886_v2 }
 0xc9a   :  { %v1887_v19 = vsub.f32 %v1874_v62, %v1885_v4 }
 0xc9b   :  { %v1890_v12 = vmul.f32 %v5340_v6, %v5340_v6  ;;  %v1925_v53 = vmul.f32 %v3984_v50, %v5340_v6 }
 0xc9c   :  { %v1889_v7 = vmul.f32 %v1887_v19, %v1887_v19  ;;  %v1924_v47 = vmul.f32 %v3984_v50, %v1887_v19 }
 0xc9d   :  { %v1894_v5 = vsel %vm195_vm0, %v1890_v12, 0.0 }
 0xc9e   :  { %v1891_v8 = vsel %vm195_vm0, %v1889_v7, 0.0 }
 0xc9f   :  { %1892 = vadd.xlane.f32.xlu0 %v1891_v8 }
 0xca3   :  { %1895 = vadd.xlane.f32.xlu0 %v1894_v5 }
 0xd2c   :  { %v1893_v32 = vpop.xlane.xlu0 %1892 }
 0xd2d   :  { %v1898_v49 = vmul.f32 0.032258064, %v1893_v32 }
 0xd2f   :  { %4572 = vrsqrt.f32 %v1898_v49  ;;  %vm1902_vm7 = vcmp.eq.f32.partialorder %v1898_v49, inf  ;;  %v1905_v37 = vand.u32 2147483648, %v1898_v49  ;;  %vm1904_vm8 = vcmp.eq.f32.partialorder %v1898_v49, 0.0 }
 0xd30   :  { %v1896_v33 = vpop.xlane.xlu0 %1895 }
 0xd31   :  { %v1899_v34 = vmul.f32 0.032258064, %v1896_v33 }
 0xd33   :  { %4574 = vrsqrt.f32 %v1899_v34  ;;  %vm1909_vm9 = vcmp.eq.f32.partialorder %v1899_v34, inf  ;;  %v1912_v43 = vand.u32 2147483648, %v1899_v34  ;;  %vm1911_vm10 = vcmp.eq.f32.partialorder %v1899_v34, 0.0 }
 0xd39   :  { %v4573_v35 = vpop.eup %4572 }
 0xd3a   :  { %v1901_v36 = vmul.f32 %v4573_v35, %v1898_v49 }
 0xd3c   :  { %v1903_v38 = vsel %vm1902_vm7, %v1898_v49, %v1901_v36 }
 0xd3d   :  { %v4575_v39 = vpop.eup %4574  ;;  %v1906_v40 = vsel %vm1904_vm8, %v1905_v37, %v1903_v38 }
 0xd3e   :  { %v1908_v41 = vmul.f32 %v4575_v39, %v1899_v34  ;;  %v1914_v42 = vadd.f32 1e-06, %v1906_v40 }
 0xd40   :  { %v1910_v44 = vsel %vm1909_vm9, %v1899_v34, %v1908_v41  ;;  %4576 = vrcp.f32 %v1914_v42 }
 0xd41   :  { %v1913_v45 = vsel %vm1911_vm10, %v1912_v43, %v1910_v44 }
 0xd42   :  { %v1915_v46 = vadd.f32 1e-06, %v1913_v45 }
 0xd44   :  { %4578 = vrcp.f32 %v1915_v46 }
 0xd4a   :  { %v4577_v48 = vpop.eup %4576 }
 0xd4b   :  { %v1926_v52 = vmul.f32 %v4577_v48, %v1924_v47 }
 0xd4d   :  { %v5358_v54 = vadd.f32 %v3985_v51, %v1926_v52 }
 0xd4e   :  { %v4579_v55 = vpop.eup %4578 }
 0xd4f   :  { %v1927_v58 = vmul.f32 %v4579_v55, %v1925_v53  ;;  %4288 = vmatprep.mubr.msk.f32.mxu1 %vm195_vm0, %v5358_v54 }
 0xd51   :  { %v5362_v59 = vadd.f32 %v3985_v51, %v1927_v58 }
 0xd53   :  { %4289 = vmatmul.mubr.msk.f32.vlgmr.msra.gmra.mrb[22].mxu1 %vm195_vm0, %v5362_v59 }
 0xd54   :  { %4485 = vmatpush3.bf16.msra.mxu1 %v4482_v31  ;;  %4310 = vmatprep.mubr.msk.f32.mxu1 %vm195_vm0, %v177_v27 }
 0xd55   :  { %4487 = vmatprep.subr.bf16.mxu1 %v4486_v60 }
 0xd58   :  { %4489 = vmatpush3.bf16.msra.mxu1 %v4486_v60 }
 0xd59   :  { %4318 = vmatprep.subr.mxu1 %v4848_v14 }
 0xd5b   :  { %4311 = vmatmul.mubr.msk.f32.vlgmr.msra.gmra.mrb[24].mxu1 %vm195_vm0, %v178_v28 }
 0xd5c   :  { %4320 = vmatprep.mubr.msk.f32.mxu1 %vm4849_vm1, %v4848_v14 }
 0xd61   :  { %4319 = vmatpush3.xpose.msk.msra.mxu1 %vm435_vm2, %v5371_v17 }
 0xd62   :  { %4328 = vmatprep.subr.mxu1 %v4848_v14 }
 0xe26   :  { %v4290_v20 = vpop.f32.mrb[22].mxu1 }
 0xe27   :  { %v5381_v61 = vmul.f32 0.17677669, %v4290_v20  ;;  %v2024_v62 = vpop.f32.mrb[23].mxu1 }
 0xe28   :  { %v5383_v63 = vmul.f32 0.17677669, %v2024_v62 }
 0xe29   :  { %4321 = vmatmul.mubr.msk.f32.vlgmr.msra.gmra.mrb[26].mxu1 %vm435_vm2, %v5381_v61 }
 0xe2a   :  { %4316 = vmatmul.mubr.msk.f32.vlgmr.msra.gmra.mrb[20].mxu0 %vm435_vm2, %v5383_v63  ;;  %4330 = vmatprep.mubr.msk.f32.mxu1 %vm4849_vm1, %v4848_v14 }
 0xe2b   :  { %4325 = vmatprep.mubr.msk.f32.mxu0 %vm4849_vm1, %v4848_v14 }
 0xe2e   :  { %v5393_v0 = vpop.f32.mrb[24].mxu1 }
 0xe2f   :  { %v5395_v1 = vpop.f32.mrb[25].mxu1  ;;  %4329 = vmatpush3.msra.mxu1 %v5393_v0 }
 0xe30   :  { %4324 = vmatpush3.msra.mxu0 %v5395_v1  ;;  %4338 = vmatprep.subr.mxu1 %v4848_v14 }
 0xe31   :  { %4333 = vmatprep.subr.mxu0 %v4848_v14 }
 0xefc   :  { %v2339_v2 = vpop.f32.mrb[26].mxu1 }
 0xefd   :  { %v2263_v3 = vpop.f32.mrb[20].mxu0  ;;  %v4322_v4 = vpop.f32.mrb[27].mxu1  ;;  %v2346_v6 = vsel %vm435_vm2, %v2339_v2, -inf }
 0xefe   :  { %2347 = vmax.xlane.f32.xlu1 %v2346_v6  ;;  %v4317_v19 = vpop.f32.mrb[21].mxu0  ;;  %v2343_v7 = vsel %vm435_vm2, %v2263_v3, -inf }
 0xeff   :  { %2344 = vmax.xlane.f32.xlu0 %v2343_v7 }
 0xf8b   :  { %v2348_v8 = vpop.xlane.xlu1 %2347 }
 0xf8c   :  { %v2350_v12 = vsub.f32 %v2339_v2, %v2348_v8  ;;  %v2345_v5 = vpop.xlane.xlu0 %2344 }
 0xf8d   :  { %v2349_v9 = vsub.f32 %v2263_v3, %v2345_v5 }
 0xf8e   :  { %v2353_v10 = vmul.f32 1.442695, %v2350_v12 }
 0xf8f   :  { %v2351_v11 = vmul.f32 1.442695, %v2349_v9 }
 0xf90   :  { %4580 = vpow2.f32 %v2353_v10 }
 0xf91   :  { %4582 = vpow2.f32 %v2351_v11 }
 0xf9a   :  { %v4581_v13 = vpop.eup %4580 }
 0xf9b   :  { %v4583_v15 = vpop.eup %4582  ;;  %v2358_v16 = vsel %vm435_vm2, %v4581_v13, 0.0 }
 0xf9c   :  { %2359 = vadd.xlane.f32.xlu1 %v2358_v16  ;;  %v2355_v21 = vsel %vm435_vm2, %v4583_v15, 0.0 }
 0xf9d   :  { %2356 = vadd.xlane.f32.xlu0 %v2355_v21 }
 0xfad   :  { %2593 = vrot.lane.b32.xlu1 %v5371_v17, %s4850_s11 }
 0xfb1   :  { %2513 = vrot.lane.b32.xlu1 %v5383_v63, %s4850_s11 }
 0xfb3   :  { %2515 = vrot.lane.b32.xlu0 %v5373_v18, %s4850_s11 }
 0xfb5   :  { %2591 = vrot.lane.b32.xlu1 %v5381_v61, %s4850_s11 }
0x1029   :  { %v2360_v22 = vpop.xlane.xlu1 %2359 }
0x102a   :  { %4584 = vrcp.f32 %v2360_v22  ;;  %v2357_v23 = vpop.xlane.xlu0 %2356 }
0x102b   :  { %4586 = vrcp.f32 %v2357_v23 }
0x102d   :  { %v2594_v24 = vpop.permute.xlu1 %2593 }
0x102e   :  { %v2516_v29 = vpop.permute.xlu0 %2515 }
0x1031   :  { %v2514_v26 = vpop.permute.xlu1 %2513 }
0x1034   :  { %v4585_v25 = vpop.eup %4584 }
0x1035   :  { %v4587_v27 = vpop.eup %4586  ;;  %v2364_v28 = vmul.f32 %v4585_v25, %v4581_v13  ;;  %v2592_v31 = vpop.permute.xlu1 %2591 }
0x1036   :  { %v2363_v30 = vmul.f32 %v4587_v27, %v4583_v15 }
0x1037   :  { %4331 = vmatmul.mubr.msk.f32.vlgmr.msra.gmra.mrb[28].mxu1 %vm435_vm2, %v2364_v28 }
0x1038   :  { %4339 = vmatpush3.xpose.msk.msra.mxu1 %vm435_vm2, %v2594_v24  ;;  %4326 = vmatmul.mubr.msk.f32.vlgmr.msra.gmra.mrb[22].mxu0 %vm435_vm2, %v2363_v30 }
0x1039   :  { %4334 = vmatpush3.xpose.msk.msra.mxu0 %vm435_vm2, %v2516_v29  ;;  %4340 = vmatprep.mubr.msk.f32.mxu1 %vm4849_vm1, %v4848_v14 }
0x103a   :  { %4335 = vmatprep.mubr.msk.f32.mxu0 %vm4849_vm1, %v4848_v14  ;;  %4348 = vmatprep.subr.mxu1 %v4848_v14 }
0x103b   :  { %4341 = vmatmul.mubr.msk.f32.vlgmr.msra.gmra.mrb[30].mxu1 %vm435_vm2, %v2592_v31  ;;  %4343 = vmatprep.subr.mxu0 %v4848_v14 }
0x103c   :  { %4336 = vmatmul.mubr.msk.f32.vlgmr.msra.gmra.mrb[24].mxu0 %vm435_vm2, %v2514_v26  ;;  %4350 = vmatprep.mubr.msk.f32.mxu1 %vm4849_vm1, %v4848_v14 }
0x103d   :  { %4345 = vmatprep.mubr.msk.f32.mxu0 %vm4849_vm1, %v4848_v14 }
0x110a   :  { %v2507_v32 = vpop.f32.mrb[28].mxu1 }
0x110b   :  { %2512 = vst.msk [vmem:[#allocation2 + $0x8] sm:$0xff] %vm435_vm2, %v2507_v32  ;;  %v2434_v49 = vpop.f32.mrb[22].mxu0  ;;  %v4332_v33 = vpop.f32.mrb[29].mxu1 }
0x110c   :  { %2511 = vst.msk [vmem:[#allocation2] sm:$0xff] %vm435_vm2, %v2434_v49  ;;  %v4327_v34 = vpop.f32.mrb[23].mxu0 }
0x110e   :  { %v2665_v35 = vpop.f32.mrb[30].mxu1 }
0x110f   :  { %v2587_v36 = vpop.f32.mrb[24].mxu0  ;;  %v4342_v37 = vpop.f32.mrb[31].mxu1  ;;  %v2672_v38 = vsel %vm435_vm2, %v2665_v35, -inf }
0x1110   :  { %2673 = vmax.xlane.f32.xlu1 %v2672_v38  ;;  %v4337_v39 = vpop.f32.mrb[25].mxu0  ;;  %v2669_v40 = vsel %vm435_vm2, %v2587_v36, -inf }
0x1111   :  { %2670 = vmax.xlane.f32.xlu0 %v2669_v40 }
0x1121   :  { %2769 = vrot.lane.b32.xlu1 %v5393_v0, %s4850_s11 }
0x1125   :  { %2857 = vrot.lane.b32.xlu1 %v5373_v18, %s4851_s22 }
0x1127   :  { %2692 = vrot.lane.b32.xlu0 %v5395_v1, %s4850_s11 }
0x1129   :  { %2935 = vrot.lane.b32.xlu1 %v5371_v17, %s4851_s22 }
0x112d   :  { %2933 = vrot.lane.b32.xlu1 %v5381_v61, %s4851_s22 }
0x119d   :  { %v2674_v41 = vpop.xlane.xlu1 %2673 }
0x119e   :  { %v2676_v42 = vsub.f32 %v2665_v35, %v2674_v41  ;;  %v2671_v43 = vpop.xlane.xlu0 %2670 }
0x119f   :  { %v2675_v44 = vsub.f32 %v2587_v36, %v2671_v43 }
0x11a0   :  { %v2679_v45 = vmul.f32 1.442695, %v2676_v42 }
0x11a1   :  { %v2677_v46 = vmul.f32 1.442695, %v2675_v44  ;;  %v2770_v50 = vpop.permute.xlu1 %2769 }
0x11a2   :  { %4588 = vpow2.f32 %v2679_v45  ;;  %4349 = vmatpush3.msra.mxu1 %v2770_v50  ;;  %v2693_v47 = vpop.permute.xlu0 %2692 }
0x11a3   :  { %4344 = vmatpush3.msra.mxu0 %v2693_v47  ;;  %4358 = vmatprep.subr.mxu1 %v4848_v14  ;;  %4590 = vpow2.f32 %v2677_v46 }
0x11a4   :  { %4353 = vmatprep.subr.mxu0 %v4848_v14 }
0x11a5   :  { %v2858_v57 = vpop.permute.xlu1 %2857 }
0x11a9   :  { %v2936_v60 = vpop.permute.xlu1 %2935 }
0x11ac   :  { %v4589_v48 = vpop.eup %4588 }
0x11ad   :  { %v2684_v51 = vsel %vm435_vm2, %v4589_v48, 0.0  ;;  %v4591_v52 = vpop.eup %4590  ;;  %v2934_v3 = vpop.permute.xlu1 %2933 }
0x11ae   :  { %2685 = vadd.xlane.f32.xlu0 %v2684_v51  ;;  %v2681_v53 = vsel %vm435_vm2, %v4591_v52, 0.0 }
0x11b2   :  { %2682 = vadd.xlane.f32.xlu0 %v2681_v53 }
0x11c8   :  { %2855 = vrot.lane.b32.xlu0 %v5383_v63, %s4851_s22 }
0x123b   :  { %v2686_v55 = vpop.xlane.xlu0 %2685 }
0x123c   :  { %4592 = vrcp.f32 %v2686_v55 }
0x123f   :  { %v2683_v56 = vpop.xlane.xlu0 %2682 }
0x1240   :  { %4594 = vrcp.f32 %v2683_v56 }
0x1243   :  { %v2856_v4 = vpop.permute.xlu0 %2855 }
0x1246   :  { %v4593_v58 = vpop.eup %4592 }
0x1247   :  { %v2690_v20 = vmul.f32 %v4593_v58, %v4589_v48 }
0x1249   :  { %4351 = vmatmul.mubr.msk.f32.vlgmr.msra.gmra.mrb[32].mxu1 %vm435_vm2, %v2690_v20 }
0x124a   :  { %v4595_v62 = vpop.eup %4594  ;;  %4359 = vmatpush3.xpose.msk.msra.mxu1 %vm435_vm2, %v2936_v60  ;;  %4360 = vmatprep.mubr.msk.f32.mxu1 %vm4849_vm1, %v4848_v14 }
0x124b   :  { %v2689_v2 = vmul.f32 %v4595_v62, %v4591_v52  ;;  %4368 = vmatprep.subr.mxu1 %v4848_v14 }
0x124d   :  { %4346 = vmatmul.mubr.msk.f32.vlgmr.msra.gmra.mrb[26].mxu0 %vm435_vm2, %v2689_v2  ;;  %4361 = vmatmul.mubr.msk.f32.vlgmr.msra.gmra.mrb[34].mxu1 %vm435_vm2, %v2934_v3 }
0x124e   :  { %4354 = vmatpush3.xpose.msk.msra.mxu0 %vm435_vm2, %v2858_v57  ;;  %4355 = vmatprep.mubr.msk.f32.mxu0 %vm4849_vm1, %v4848_v14 }
0x124f   :  { %4363 = vmatprep.subr.mxu0 %v4848_v14  ;;  %4370 = vmatprep.mubr.msk.f32.mxu1 %vm4849_vm1, %v4848_v14 }
0x1251   :  { %4356 = vmatmul.mubr.msk.f32.vlgmr.msra.gmra.mrb[28].mxu0 %vm435_vm2, %v2856_v4 }
0x1252   :  { %4365 = vmatprep.mubr.msk.f32.mxu0 %vm4849_vm1, %v4848_v14 }
0x131c   :  { %v5465_v6 = vpop.f32.mrb[32].mxu1 }
0x131d   :  { %v4352_v19 = vpop.f32.mrb[33].mxu1 }
0x1320   :  { %v5467_v7 = vpop.f32.mrb[26].mxu0  ;;  %v3007_v8 = vpop.f32.mrb[34].mxu1 }
0x1321   :  { %v4347_v12 = vpop.f32.mrb[27].mxu0  ;;  %v4362_v5 = vpop.f32.mrb[35].mxu1  ;;  %v3014_v9 = vsel %vm435_vm2, %v3007_v8, -inf }
0x1322   :  { %3015 = vmax.xlane.f32.xlu1 %v3014_v9  ;;  %v1950_v5 = vld [vmem:[#allocation14 + $0x10] sm:$0xff]  ;;  %v1951_v9 = vld [vmem:[#allocation14 + $0x18] sm:$0xff] }
0x1324   :  { %v2929_v10 = vpop.f32.mrb[28].mxu0 }
0x1325   :  { %v4357_v11 = vpop.f32.mrb[29].mxu0  ;;  %v3011_v13 = vsel %vm435_vm2, %v2929_v10, -inf }
0x1326   :  { %3012 = vmax.xlane.f32.xlu0 %v3011_v13 }
0x1333   :  { %3109 = vrot.lane.b32.xlu1 %v5393_v0, %s4851_s22 }
0x1337   :  { %3197 = vrot.lane.b32.xlu1 %v5373_v18, %s4852_s1 }
0x133b   :  { %3275 = vrot.lane.b32.xlu1 %v5371_v17, %s4852_s1 }
0x133c   :  { %3033 = vrot.lane.b32.xlu0 %v5395_v1, %s4851_s22 }
0x133f   :  { %3273 = vrot.lane.b32.xlu1 %v5381_v61, %s4852_s1 }
0x13af   :  { %v3016_v15 = vpop.xlane.xlu1 %3015 }
0x13b0   :  { %v3018_v16 = vsub.f32 %v3007_v8, %v3016_v15  ;;  %v1949_v8 = vld [vmem:[#allocation14 + $0x8] sm:$0xff] }
0x13b2   :  { %v3021_v21 = vmul.f32 1.442695, %v3018_v16 }
0x13b3   :  { %v3110_v22 = vpop.permute.xlu1 %3109  ;;  %v3013_v23 = vpop.xlane.xlu0 %3012 }
0x13b4   :  { %4596 = vpow2.f32 %v3021_v21  ;;  %v3017_v24 = vsub.f32 %v2929_v10, %v3013_v23  ;;  %4369 = vmatpush3.msra.mxu1 %v3110_v22  ;;  %v4494_v10 = vpack.c.bf16 %v1951_v9, %v1950_v5 }
0x13b5   :  { %4378 = vmatprep.subr.mxu1 %v4848_v14 }
0x13b6   :  { %v3019_v18 = vmul.f32 1.442695, %v3017_v24 }
0x13b7   :  { %v3034_v25 = vpop.permute.xlu0 %3033  ;;  %v3198_v29 = vpop.permute.xlu1 %3197 }
0x13b8   :  { %4598 = vpow2.f32 %v3019_v18  ;;  %4364 = vmatpush3.msra.mxu0 %v3034_v25 }
0x13b9   :  { %4373 = vmatprep.subr.mxu0 %v4848_v14 }
0x13bb   :  { %v3276_v32 = vpop.permute.xlu1 %3275 }
0x13be   :  { %v4597_v17 = vpop.eup %4596 }
0x13bf   :  { %v3026_v26 = vsel %vm435_vm2, %v4597_v17, 0.0 }
0x13c0   :  { %3027 = vadd.xlane.f32.xlu0 %v3026_v26 }
0x13c2   :  { %v4599_v61 = vpop.eup %4598 }
0x13c3   :  { %v3023_v27 = vsel %vm435_vm2, %v4599_v61, 0.0 }
0x13c4   :  { %3024 = vadd.xlane.f32.xlu0 %v3023_v27 }
0x13da   :  { %3195 = vrot.lane.b32.xlu0 %v5383_v63, %s4852_s1  ;;  %v3274_v63 = vpop.permute.xlu1 %3273 }
0x144d   :  { %v3028_v28 = vpop.xlane.xlu0 %3027 }
0x144e   :  { %4600 = vrcp.f32 %v3028_v28 }
0x1451   :  { %v3025_v30 = vpop.xlane.xlu0 %3024 }
0x1452   :  { %4602 = vrcp.f32 %v3025_v30 }
0x1455   :  { %v3196_v35 = vpop.permute.xlu0 %3195 }
0x1458   :  { %v4601_v31 = vpop.eup %4600 }
0x1459   :  { %v3032_v49 = vmul.f32 %v4601_v31, %v4597_v17 }
0x145b   :  { %4371 = vmatmul.mubr.msk.f32.vlgmr.msra.gmra.mrb[36].mxu1 %vm435_vm2, %v3032_v49 }
0x145c   :  { %v4603_v33 = vpop.eup %4602  ;;  %4379 = vmatpush3.xpose.msk.msra.mxu1 %vm435_vm2, %v3276_v32  ;;  %4380 = vmatprep.mubr.msk.f32.mxu1 %vm4849_vm1, %v4848_v14 }
0x145d   :  { %v3031_v34 = vmul.f32 %v4603_v33, %v4599_v61  ;;  %4388 = vmatprep.subr.mxu1 %v4848_v14 }
0x145f   :  { %4366 = vmatmul.mubr.msk.f32.vlgmr.msra.gmra.mrb[30].mxu0 %vm435_vm2, %v3031_v34  ;;  %4381 = vmatmul.mubr.msk.f32.vlgmr.msra.gmra.mrb[38].mxu1 %vm435_vm2, %v3274_v63 }
0x1460   :  { %4374 = vmatpush3.xpose.msk.msra.mxu0 %vm435_vm2, %v3198_v29  ;;  %4375 = vmatprep.mubr.msk.f32.mxu0 %vm4849_vm1, %v4848_v14 }
0x1461   :  { %4383 = vmatprep.subr.mxu0 %v4848_v14  ;;  %4390 = vmatprep.mubr.msk.f32.mxu1 %vm4849_vm1, %v4848_v14 }
0x1463   :  { %4376 = vmatmul.mubr.msk.f32.vlgmr.msra.gmra.mrb[32].mxu0 %vm435_vm2, %v3196_v35  ;;  %v3679_v35 = vld [vmem:[#allocation15 + $0x8] sm:$0xff] }
0x1464   :  { %4385 = vmatprep.mubr.msk.f32.mxu0 %vm4849_vm1, %v4848_v14 }
0x152e   :  { %v3181_v36 = vpop.f32.mrb[36].mxu1 }
0x152f   :  { %v4372_v37 = vpop.f32.mrb[37].mxu1 }
0x1532   :  { %v3105_v38 = vpop.f32.mrb[30].mxu0  ;;  %v3347_v39 = vpop.f32.mrb[38].mxu1 }
0x1533   :  { %v4367_v40 = vpop.f32.mrb[31].mxu0  ;;  %v4382_v41 = vpop.f32.mrb[39].mxu1  ;;  %v3354_v42 = vsel %vm435_vm2, %v3347_v39, -inf }
0x1534   :  { %3355 = vmax.xlane.f32.xlu1 %v3354_v42  ;;  %v3772_v40 = vld [vmem:[%s5616_s16] sm:$0xff]  ;;  %v3773_v41 = vld [vmem:[%s5616_s16 + $0x8] sm:$0xff]  ;;  %v3774_v42 = vld [vmem:[%s5616_s16 + $0x10] sm:$0xff] }
0x1536   :  { %v3269_v43 = vpop.f32.mrb[32].mxu0 }
0x1537   :  { %v4377_v44 = vpop.f32.mrb[33].mxu0  ;;  %v3351_v45 = vsel %vm435_vm2, %v3269_v43, -inf }
0x1538   :  { %3352 = vmax.xlane.f32.xlu0 %v3351_v45  ;;  %v3775_v44 = vld [vmem:[%s5616_s16 + $0x18] sm:$0xff] }
0x1539   :  { %v4510_v45 = vpack.c.bf16 %v3775_v44, %v3774_v42 }
0x1545   :  { %3449 = vrot.lane.b32.xlu1 %v5393_v0, %s4852_s1 }
0x1549   :  { %2847 = vrot.lane.b32.xlu1 %v5467_v7, %s4841_s21 }
0x154d   :  { %2849 = vrot.lane.b32.xlu1 %v5465_v6, %s4841_s21 }
0x1551   :  { %3189 = vrot.lane.b32.xlu1 %v3181_v36, %s4853_s2  ;;  %v3680_v36 = vld [vmem:[#allocation15 + $0x10] sm:$0xff] }
0x15c1   :  { %v3356_v14 = vpop.xlane.xlu1 %3355 }
0x15c2   :  { %v3358_v46 = vsub.f32 %v3347_v39, %v3356_v14  ;;  %v3776_v14 = vld [vmem:[%s5616_s16 + $0x20] sm:$0xff] }
0x15c4   :  { %v3361_v50 = vmul.f32 1.442695, %v3358_v46  ;;  %v3777_v46 = vld [vmem:[%s5616_s16 + $0x28] sm:$0xff] }
0x15c5   :  { %v3450_v47 = vpop.permute.xlu1 %3449  ;;  %v3353_v48 = vpop.xlane.xlu0 %3352 }
0x15c6   :  { %4604 = vpow2.f32 %v3361_v50  ;;  %v3357_v51 = vsub.f32 %v3269_v43, %v3353_v48  ;;  %4389 = vmatpush3.msra.mxu1 %v3450_v47  ;;  %v4506_v43 = vpack.c.bf16 %v3773_v41, %v3772_v40  ;;  %v4514_v50 = vpack.c.bf16 %v3777_v46, %v3776_v14 }
0x15c8   :  { %v3359_v52 = vmul.f32 1.442695, %v3357_v51 }
0x15c9   :  { %v2848_v53 = vpop.permute.xlu1 %2847 }
0x15ca   :  { %4606 = vpow2.f32 %v3359_v52  ;;  %2853 = vst.msk [vmem:[#allocation2] sm:$0xff] %vm1102_vm4, %v2848_v53 }
0x15cd   :  { %v2850_v0 = vpop.permute.xlu1 %2849 }
0x15ce   :  { %2854 = vst.msk [vmem:[#allocation2 + $0x8] sm:$0xff] %vm1102_vm4, %v2850_v0 }
0x15d0   :  { %v4605_v55 = vpop.eup %4604 }
0x15d1   :  { %v3190_v56 = vpop.permute.xlu1 %3189  ;;  %v3366_v57 = vsel %vm435_vm2, %v4605_v55, 0.0 }
0x15d2   :  { %3194 = vst.msk [vmem:[#allocation2 + $0x8] sm:$0xff] %vm1445_vm5, %v3190_v56  ;;  %3367 = vadd.xlane.f32.xlu0 %v3366_v57 }
0x15d4   :  { %v4607_v58 = vpop.eup %4606 }
0x15d5   :  { %v3363_v60 = vsel %vm435_vm2, %v4607_v58, 0.0 }
0x15d6   :  { %3364 = vadd.xlane.f32.xlu0 %v3363_v60 }
0x15ec   :  { %3373 = vrot.lane.b32.xlu0 %v5395_v1, %s4852_s1  ;;  %v1948_v1 = vld [vmem:[#allocation14] sm:$0xff] }
0x15ed   :  { %v4490_v12 = vpack.c.bf16 %v1949_v8, %v1948_v1  ;;  %v4019_v1 = vld [vmem:[%s5613_s13] ss:$0 sm:$0xff] }
0x15f0   :  { %3187 = vrot.lane.b32.xlu0 %v3105_v38, %s4853_s2  ;;  %v3681_v38 = vld [vmem:[#allocation15 + $0x18] sm:$0xff] }
0x15f1   :  { %v4502_v39 = vpack.c.bf16 %v3681_v38, %v3680_v36 }
0x165f   :  { %v3368_v20 = vpop.xlane.xlu0 %3367 }
0x1660   :  { %4608 = vrcp.f32 %v3368_v20 }
0x1663   :  { %v3365_v62 = vpop.xlane.xlu0 %3364 }
0x1664   :  { %4610 = vrcp.f32 %v3365_v62 }
0x1667   :  { %v3374_v2 = vpop.permute.xlu0 %3373 }
0x1668   :  { %4384 = vmatpush3.msra.mxu0 %v3374_v2 }
0x1669   :  { %4491 = vmatprep.subr.bf16.mxu0 %v4490_v12 }
0x166a   :  { %v4609_v3 = vpop.eup %4608 }
0x166b   :  { %v3372_v4 = vmul.f32 %v4609_v3, %v4605_v55  ;;  %v3188_v6 = vpop.permute.xlu0 %3187 }
0x166c   :  { %3193 = vst.msk [vmem:[#allocation2] sm:$0xff] %vm1445_vm5, %v3188_v6  ;;  %v4018_v6 = vld [vmem:[%s5612_s12] ss:$0 sm:$0xff] }
0x166d   :  { %4391 = vmatmul.mubr.msk.f32.vlgmr.msra.gmra.mrb[40].mxu1 %vm435_vm2, %v3372_v4 }
0x166e   :  { %v4611_v19 = vpop.eup %4610 }
0x166f   :  { %v3371_v7 = vmul.f32 %v4611_v19, %v4607_v58 }
0x1671   :  { %4386 = vmatmul.mubr.msk.f32.vlgmr.msra.gmra.mrb[34].mxu0 %vm435_vm2, %v3371_v7 }
0x1672   :  { %4493 = vmatpush3.bf16.msra.mxu0 %v4490_v12 }
0x1673   :  { %4495 = vmatprep.subr.bf16.mxu0 %v4494_v10 }
0x1676   :  { %4497 = vmatpush3.bf16.msra.mxu0 %v4494_v10 }
0x1677   :  { %4507 = vmatprep.subr.bf16.mxu0 %v4506_v43 }
0x1740   :  { %v3521_v11 = vpop.f32.mrb[40].mxu1 }
0x1741   :  { %3529 = vrot.lane.b32.xlu1 %v3521_v11, %s4854_s26  ;;  %v4392_v13 = vpop.f32.mrb[41].mxu1 }
0x1742   :  { %v3778_v13 = vld [vmem:[%s5616_s16 + $0x30] sm:$0xff] }
0x1744   :  { %v3445_v15 = vpop.f32.mrb[34].mxu0 }
0x1745   :  { %3527 = vrot.lane.b32.xlu0 %v3445_v15, %s4854_s26  ;;  %v4387_v16 = vpop.f32.mrb[35].mxu0  ;;  %v3779_v15 = vld [vmem:[%s5616_s16 + $0x38] sm:$0xff] }
0x1746   :  { %v4518_v16 = vpack.c.bf16 %v3779_v15, %v3778_v13 }
0x17b3   :  { %v3530_v21 = vpop.permute.xlu1 %3529 }
0x17b4   :  { %3534 = vst.msk [vmem:[#allocation2 + $0x8] sm:$0xff] %vm1788_vm6, %v3530_v21  ;;  %v4020_v21 = vld [vmem:[%s5615_s15] ss:$0 sm:$0xff] }
0x17b7   :  { %v3528_v22 = vpop.permute.xlu0 %3527 }
0x17b8   :  { %3533 = vst.msk [vmem:[#allocation2] sm:$0xff] %vm1788_vm6, %v3528_v22 }
0x17bb   :  { %v3536_v24 = vld [vmem:[#allocation2 + $0x8] sm:$0xff] }
0x17bf   :  { %v3535_v23 = vld [vmem:[#allocation2] sm:$0xff] }
0x17c0   :  { %4401 = vmatprep.mubr.msk.f32.mxu0 %vm195_vm0, %v3535_v23 }
0x17c1   :  { %4402 = vmatmul.mubr.msk.f32.vlgmr.msra.gmra.mrb[36].mxu0 %vm195_vm0, %v3536_v24 }
0x17c2   :  { %4509 = vmatpush3.bf16.msra.mxu0 %v4506_v43 }
0x17c3   :  { %4511 = vmatprep.subr.bf16.mxu0 %v4510_v45 }
0x17c6   :  { %4513 = vmatpush3.bf16.msra.mxu0 %v4510_v45 }
0x17c7   :  { %4515 = vmatprep.subr.bf16.mxu0 %v4514_v50 }
0x17ca   :  { %4517 = vmatpush3.bf16.msra.mxu0 %v4514_v50 }
0x17cb   :  { %4519 = vmatprep.subr.bf16.mxu0 %v4518_v16 }
0x17ce   :  { %4521 = vmatpush3.bf16.msra.mxu0 %v4518_v16 }
0x1894   :  { %v4403_v18 = vpop.f32.mrb[36].mxu0 }
0x1895   :  { %v3619_v25 = vadd.f32 %v4403_v18, %v5362_v59  ;;  %v3609_v17 = vpop.f32.mrb[37].mxu0 }
0x1896   :  { %v3618_v26 = vadd.f32 %v3609_v17, %v5358_v54  ;;  %v3678_v54 = vld [vmem:[#allocation15] sm:$0xff] }
0x1897   :  { %v3625_v61 = vsel %vm195_vm0, %v3619_v25, 0.0  ;;  %v4498_v37 = vpack.c.bf16 %v3679_v35, %v3678_v54 }
0x1898   :  { %3626 = vadd.xlane.f32.xlu1 %v3625_v61  ;;  %v3622_v27 = vsel %vm195_vm0, %v3618_v26, 0.0 }
0x1899   :  { %3623 = vadd.xlane.f32.xlu0 %v3622_v27  ;;  %4499 = vmatprep.subr.bf16.mxu1 %v4498_v37 }
0x189a   :  { %4501 = vmatpush3.bf16.msra.mxu1 %v4498_v37 }
0x189b   :  { %4503 = vmatprep.subr.bf16.mxu1 %v4502_v39 }
0x189e   :  { %4505 = vmatpush3.bf16.msra.mxu1 %v4502_v39 }
0x1925   :  { %v3627_v28 = vpop.xlane.xlu1 %3626 }
0x1926   :  { %v3629_v30 = vmul.f32 0.03125, %v3627_v28  ;;  %v3624_v29 = vpop.xlane.xlu0 %3623 }
0x1927   :  { %v3628_v31 = vmul.f32 0.03125, %v3624_v29 }
0x1928   :  { %v3631_v32 = vsub.f32 %v3619_v25, %v3629_v30 }
0x1929   :  { %v3630_v49 = vsub.f32 %v3618_v26, %v3628_v31  ;;  %v4023_v26 = vld [vmem:[%s5617_s17] ss:$0 sm:$0xff] }
0x192a   :  { %v3633_v63 = vmul.f32 %v3631_v32, %v3631_v32  ;;  %v3667_v12 = vmul.f32 %v4018_v6, %v3631_v32 }
0x192b   :  { %v3632_v33 = vmul.f32 %v3630_v49, %v3630_v49  ;;  %v3666_v19 = vmul.f32 %v4018_v6, %v3630_v49 }
0x192c   :  { %v3637_v59 = vsel %vm195_vm0, %v3633_v63, 0.0 }
0x192d   :  { %v3634_v34 = vsel %vm195_vm0, %v3632_v33, 0.0 }
0x192e   :  { %3635 = vadd.xlane.f32.xlu0 %v3634_v34 }
0x1932   :  { %3638 = vadd.xlane.f32.xlu0 %v3637_v59 }
0x19bb   :  { %v3636_v47 = vpop.xlane.xlu0 %3635 }
0x19bc   :  { %v3640_v48 = vmul.f32 0.032258064, %v3636_v47 }
0x19be   :  { %4612 = vrsqrt.f32 %v3640_v48  ;;  %vm3644_vm11 = vcmp.eq.f32.partialorder %v3640_v48, inf  ;;  %v3647_v55 = vand.u32 2147483648, %v3640_v48  ;;  %vm3646_vm12 = vcmp.eq.f32.partialorder %v3640_v48, 0.0 }
0x19bf   :  { %v3639_v51 = vpop.xlane.xlu0 %3638 }
0x19c0   :  { %v3641_v52 = vmul.f32 0.032258064, %v3639_v51 }
0x19c2   :  { %4614 = vrsqrt.f32 %v3641_v52  ;;  %vm3651_vm13 = vcmp.eq.f32.partialorder %v3641_v52, inf  ;;  %v3654_v62 = vand.u32 2147483648, %v3641_v52  ;;  %vm3653_vm14 = vcmp.eq.f32.partialorder %v3641_v52, 0.0 }
0x19c8   :  { %v4613_v53 = vpop.eup %4612 }
0x19c9   :  { %v3643_v0 = vmul.f32 %v4613_v53, %v3640_v48 }
0x19cb   :  { %v3645_v56 = vsel %vm3644_vm11, %v3640_v48, %v3643_v0 }
0x19cc   :  { %v4615_v57 = vpop.eup %4614  ;;  %v3648_v58 = vsel %vm3646_vm12, %v3647_v55, %v3645_v56  ;;  %v4026_v56 = vld [vmem:[%s5618_s18] ss:$0 sm:$0xff]  ;;  %s4804_s18 = scalar_lea.vmem %s3937_s20, 256 }
0x19cd   :  { %v3650_v60 = vmul.f32 %v4615_v57, %v3641_v52  ;;  %v3656_v20 = vadd.f32 1e-06, %v3648_v58  ;;  %p4805_p8 = scmp.ne.s32.totalorder %s3937_s20, %s4804_s18  ;;  %p4810_p10 = scmp.lt.s32.totalorder %s4804_s18, %s4804_s18 }
0x19cf   :  { %v3652_v2 = vsel %vm3651_vm13, %v3641_v52, %v3650_v60  ;;  %4616 = vrcp.f32 %v3656_v20  ;;  %v4027_v20 = vld [vmem:[%s5619_s19] ss:$0 sm:$0xff]  ;;  %p4811_p11 = por %p4810_p10, %p4809_p9 }
0x19d0   :  { %v3655_v3 = vsel %vm3653_vm14, %v3654_v62, %v3652_v2 }
0x19d1   :  { %v3657_v4 = vadd.f32 1e-06, %v3655_v3  ;;  %p4812_p12 = pnand %p4811_p11, %p4805_p8 }
0x19d3   :  { %4618 = vrcp.f32 %v3657_v4 }
0x19d9   :  { %v4617_v7 = vpop.eup %4616 }
0x19da   :  { %v3668_v8 = vmul.f32 %v4617_v7, %v3666_v19 }
0x19dc   :  { %v3676_v5 = vadd.f32 %v4019_v1, %v3668_v8 }
0x19dd   :  { %v4619_v9 = vpop.eup %4618 }
0x19de   :  { %v3669_v10 = vmul.f32 %v4619_v9, %v3667_v12  ;;  %4412 = vmatprep.mubr.msk.f32.mxu1 %vm195_vm0, %v3676_v5 }
0x19e0   :  { %v3677_v11 = vadd.f32 %v4019_v1, %v3669_v10 }
0x19e2   :  { %4413 = vmatmul.mubr.msk.f32.vlgmr.msra.gmra.mrb[42].mxu1 %vm195_vm0, %v3677_v11 }
0x1ab5   :  { %v4414_v22 = vpop.f32.mrb[42].mxu1 }
0x1ab6   :  { %v3767_v23 = vadd.f32 %v4414_v22, %v4020_v21  ;;  %v3761_v24 = vpop.f32.mrb[43].mxu1 }
0x1ab7   :  { %v3762_v18 = vadd.f32 %v4020_v21, %v3761_v24 }
0x1ab8   :  { %v3771_v17 = vmax.f32 %v3767_v23, 0.0 }
0x1ab9   :  { %v3770_v25 = vmax.f32 %v3762_v18, 0.0 }
0x1abb   :  { %4431 = vmatprep.mubr.msk.f32.mxu0 %vm3787_vm15, %v3770_v25 }
0x1abc   :  { %4432 = vmatmul.mubr.msk.f32.vlgmr.msra.gmra.mrb[38].mxu0 %vm3787_vm15, %v3771_v17 }
0x1b8f   :  { %v4433_v61 = vpop.f32.mrb[38].mxu0 }
0x1b90   :  { %v3866_v27 = vadd.f32 %v4433_v61, %v4023_v26  ;;  %v3860_v28 = vpop.f32.mrb[39].mxu0 }
0x1b91   :  { %v3861_v30 = vadd.f32 %v4023_v26, %v3860_v28 }
0x1b92   :  { %v3870_v29 = vadd.f32 %v3866_v27, %v3677_v11 }
0x1b93   :  { %v3869_v31 = vadd.f32 %v3861_v30, %v3676_v5 }
0x1b94   :  { %v3876_v32 = vsel %vm195_vm0, %v3870_v29, 0.0 }
0x1b95   :  { %3877 = vadd.xlane.f32.xlu1 %v3876_v32  ;;  %v3873_v49 = vsel %vm195_vm0, %v3869_v31, 0.0 }
0x1b96   :  { %3874 = vadd.xlane.f32.xlu0 %v3873_v49 }
0x1c22   :  { %v3878_v33 = vpop.xlane.xlu1 %3877 }
0x1c23   :  { %v3880_v34 = vmul.f32 0.03125, %v3878_v33  ;;  %v3875_v63 = vpop.xlane.xlu0 %3874 }
0x1c24   :  { %v3879_v59 = vmul.f32 0.03125, %v3875_v63 }
0x1c25   :  { %v3882_v54 = vsub.f32 %v3870_v29, %v3880_v34 }
0x1c26   :  { %v3881_v35 = vsub.f32 %v3869_v31, %v3879_v59 }
0x1c27   :  { %v3884_v36 = vmul.f32 %v3882_v54, %v3882_v54  ;;  %v3918_v57 = vmul.f32 %v4026_v56, %v3882_v54 }
0x1c28   :  { %v3883_v37 = vmul.f32 %v3881_v35, %v3881_v35  ;;  %v3917_v60 = vmul.f32 %v4026_v56, %v3881_v35 }
0x1c29   :  { %v3888_v38 = vsel %vm195_vm0, %v3884_v36, 0.0 }
0x1c2a   :  { %3889 = vadd.xlane.f32.xlu1 %v3888_v38  ;;  %v3885_v39 = vsel %vm195_vm0, %v3883_v37, 0.0 }
0x1c2b   :  { %3886 = vadd.xlane.f32.xlu0 %v3885_v39 }
0x1cb7   :  { %v3890_v40 = vpop.xlane.xlu1 %3889 }
0x1cb8   :  { %v3892_v41 = vmul.f32 0.032258064, %v3890_v40  ;;  %v3887_v42 = vpop.xlane.xlu0 %3886 }
0x1cb9   :  { %v3891_v43 = vmul.f32 0.032258064, %v3887_v42 }
0x1cba   :  { %4620 = vrsqrt.f32 %v3892_v41  ;;  %vm3902_vm1 = vcmp.eq.f32.partialorder %v3892_v41, inf  ;;  %v3905_v46 = vand.u32 2147483648, %v3892_v41  ;;  %vm3904_vm2 = vcmp.eq.f32.partialorder %v3892_v41, 0.0 }
0x1cbb   :  { %4622 = vrsqrt.f32 %v3891_v43  ;;  %vm3895_vm3 = vcmp.eq.f32.partialorder %v3891_v43, inf  ;;  %v3898_v48 = vand.u32 2147483648, %v3891_v43  ;;  %vm3897_vm4 = vcmp.eq.f32.partialorder %v3891_v43, 0.0 }
0x1cc4   :  { %v4621_v44 = vpop.eup %4620 }
0x1cc5   :  { %v4623_v45 = vpop.eup %4622  ;;  %v3901_v14 = vmul.f32 %v4621_v44, %v3892_v41 }
0x1cc6   :  { %v3894_v50 = vmul.f32 %v4623_v45, %v3891_v43 }
0x1cc7   :  { %v3903_v47 = vsel %vm3902_vm1, %v3892_v41, %v3901_v14 }
0x1cc8   :  { %v3906_v51 = vsel %vm3904_vm2, %v3905_v46, %v3903_v47  ;;  %v3896_v52 = vsel %vm3895_vm3, %v3891_v43, %v3894_v50 }
0x1cc9   :  { %v3908_v53 = vadd.f32 1e-06, %v3906_v51  ;;  %v3899_v0 = vsel %vm3897_vm4, %v3898_v48, %v3896_v52 }
0x1cca   :  { %v3907_v55 = vadd.f32 1e-06, %v3899_v0 }
0x1ccb   :  { %4624 = vrcp.f32 %v3908_v53 }
0x1ccc   :  { %4626 = vrcp.f32 %v3907_v55 }
0x1cd5   :  { %v4625_v58 = vpop.eup %4624 }
0x1cd6   :  { %v4627_v62 = vpop.eup %4626  ;;  %v3920_v2 = vmul.f32 %v4625_v58, %v3918_v57 }
0x1cd7   :  { %v3919_v3 = vmul.f32 %v4627_v62, %v3917_v60 }
0x1cd8   :  { %v3928_v4 = vadd.f32 %v4027_v20, %v3920_v2 }
0x1cd9   :  { %v3927_v6 = vadd.f32 %v4027_v20, %v3919_v3 }
0x1cda   :  { %3930 = vst.msk [vmem:[#allocation17 + $0x8] sm:$0xff] %vm195_vm0, %v3928_v4 }
0x1cdb   :  { %3929 = vst.msk [vmem:[#allocation17] sm:$0xff] %vm195_vm0, %v3927_v6 }
0x1cdc   :  { %4815 = shalt.err (!%p4812_p12)
}
0x1cdd   :  { %s5638_s11 = sld [smem:[#allocation29_spill]] }
0x1ce3   :  { %s4816_s28 = scalar_lea.hbm %s5638_s11, 256 }
0x1ce4   :  { %p4817_p13 = scmp.ne.s32.totalorder %s5638_s11, %s4816_s28  ;;  %p4820_p0 = scmp.lt.u32.totalorder %s4816_s28, %s5638_s11 }
0x1ce6   :  { %p4822_p1 = pnand %p4820_p0, %p4817_p13 }
0x1ce8   :  { %4825 = shalt.err (!%p4822_p1)
}
0x1ce9   :  { %3942 = dma.vmem_to_hbm [thread:$0]  %s3937_s20, 256, %s5638_s11, [#allocation5], %s4840_s0, %s4840_s0, %s4841_s21  }
0x1cea   :  { %4836 = dma.done.wait [#allocation5], 256  }
0x1ceb   :  { %4837 = vsyncadd [#allocation5], 4294967040 }
0x1cec   :  { %3946 = vsyncpa [#allocation4], 1 }
0x1ced   :  { %3947 = vsyncpa [#allocation7], 1 }
0x1cee   :  { %3948 = vsyncpa [#allocation10], 1 }
0x1cef   :  { %3949 = vsyncpa [#allocation13], 1 }
0x1cf0   :  { %3950 = vsyncpa [#allocation16], 1 }
0x1cf1   :  { %3951 = vsyncpa [#allocation5], 1 }

// kernel: tpu_custom_call.1
= control target key start
LH: loop header
LB: loop body
LE: loop exit
PB: predicated region body
PF: predicated region fallthrough
CT: control target
= control target key end

     0   :  { %s5600_s0 = inlined_call_operand.hbm [shape: f32[2,8,32], index: 0, kind: input, shape index: {}]   ;;  %s5601_s1 = inlined_call_operand.hbm [shape: f32[2,8,32], index: 1, kind: input, shape index: {}]   ;;  %s5602_s2 = inlined_call_operand.vmem [shape: f32[32,32], index: 2, kind: input, shape index: {}]   ;;  %s5603_s3 = inlined_call_operand.vmem [shape: f32[32,32], index: 3, kind: input, shape index: {}]   ;;  %s5604_s4 = inlined_call_operand.vmem [shape: f32[32,32], index: 4, kind: input, shape index: {}]   ;;  %s5605_s5 = inlined_call_operand.hbm [shape: f32[32,32], index: 5, kind: input, shape index: {}]   ;;  %s5606_s6 = inlined_call_operand.vmem [shape: f32[1,32], index: 6, kind: input, shape index: {}]   ;;  %s5607_s7 = inlined_call_operand.vmem [shape: f32[1,32], index: 7, kind: input, shape index: {}]   ;;  %s5608_s8 = inlined_call_operand.hbm [shape: f32[32,32], index: 8, kind: input, shape index: {}]   ;;  %s5609_s9 = inlined_call_operand.hbm [shape: f32[32,32], index: 9, kind: input, shape index: {}]   ;;  %s5610_s10 = inlined_call_operand.hbm [shape: f32[32,32], index: 10, kind: input, shape index: {}]   ;;  %s5611_s11 = inlined_call_operand.hbm [shape: f32[32,32], index: 11, kind: input, shape index: {}]   ;;  %s5612_s12 = inlined_call_operand.vmem [shape: f32[1,32], index: 12, kind: input, shape index: {}]   ;;  %s5613_s13 = inlined_call_operand.vmem [shape: f32[1,32], index: 13, kind: input, shape index: {}]   ;;  %s5614_s14 = inlined_call_operand.hbm [shape: f32[32,64], index: 14, kind: input, shape index: {}]   ;;  %s5615_s15 = inlined_call_operand.vmem [shape: f32[1,64], index: 15, kind: input, shape index: {}]   ;;  %s5616_s16 = inlined_call_operand.vmem [shape: f32[64,32], index: 16, kind: input, shape index: {}]   ;;  %s5617_s17 = inlined_call_operand.vmem [shape: f32[1,32], index: 17, kind: input, shape index: {}]   ;;  %s5618_s18 = inlined_call_operand.vmem [shape: f32[1,32], index: 18, kind: input, shape index: {}]   ;;  %s5619_s19 = inlined_call_operand.vmem [shape: f32[1,32], index: 19, kind: input, shape index: {}]   ;;  %s5620_s20 = inlined_call_operand.hbm [shape: f32[2,8,32], index: 20, kind: output, shape index: {}]  }
   0x1   :  { %5627 = sst [smem:[#allocation24_spill]] %s5600_s0 }
   0x2   :  { %5628 = sst [smem:[#allocation25_spill]] %s5601_s1 }
   0x3   :  { %5629 = sst [smem:[#allocation26_spill]] %s5602_s2 }
   0x4   :  { %5630 = sst [smem:[#allocation27_spill]] %s5603_s3 }
   0x5   :  { %5631 = sst [smem:[#allocation28_spill]] %s5604_s4 }
   0x6   :  { %5632 = sst [smem:[#allocation29_spill]] %s5620_s20 }
   0x7   :  { %25 = vsyncpa [#allocation4], 0 }
   0x8   :  { %26 = vsyncpa [#allocation7], 0 }
   0x9   :  { %27 = vsyncpa [#allocation10], 0 }
   0xa   :  { %28 = vsyncpa [#allocation13], 0 }
   0xb   :  { %29 = vsyncpa [#allocation16], 0 }
   0xc   :  { %30 = vsyncpa [#allocation5], 0  ;;  %s4838_s1 = smov [#allocation6]   ;;  %s4839_s23 = smov [#allocation9]  }
   0xd   :  { %s48_s22 = sshll.u32 %s4838_s1, 4  ;;  %s82_s24 = sshll.u32 %s4839_s23, 4  ;;  %s49_s22 = int_to_ptr.vmem [resolvable:$true] %s48_s22  ;;  %s4961_s24 = int_to_ptr.vmem [resolvable:$true] %s82_s24 }
   0xe   :  { %s5633_s3 = sld [smem:[#allocation25_spill]] }
  0x14   :  { %s4628_s26 = scalar_lea.hbm %s5633_s3, 256 }
  0x15   :  { %p4629_p0 = scmp.ne.s32.totalorder %s5633_s3, %s4628_s26  ;;  %p4632_p1 = scmp.lt.u32.totalorder %s4628_s26, %s5633_s3 }
  0x17   :  { %p4634_p2 = pnand %p4632_p1, %p4629_p0 }
  0x19   :  { %4637 = shalt.err (!%p4634_p2)
}
  0x1a   :  { %s4638_s30 = scalar_lea.vmem %s49_s22, 256  ;;  %p4643_p4 = scmp.lt.s32.totalorder %s49_s22, %s49_s22 }
  0x1b   :  { %p4639_p3 = scmp.ne.s32.totalorder %s49_s22, %s4638_s30  ;;  %p4644_p5 = scmp.lt.s32.totalorder %s4638_s30, %s4638_s30 }
  0x1d   :  { %p4645_p6 = por %p4644_p5, %p4643_p4 }
  0x1f   :  { %p4646_p7 = pnand %p4645_p6, %p4639_p3 }
  0x21   :  { %4649 = shalt.err (!%p4646_p7)
}
  0x22   :  { %s4840_s0 = smov 128   ;;  %s4841_s21 = smov 8  }
  0x23   :  { %54 = dma.hbm_to_vmem [thread:$0]  %s5633_s3, 256, %s49_s22, [#allocation7], %s4840_s0, %s4840_s0, %s4841_s21  }
  0x24   :  { %s4650_s26 = scalar_lea.hbm %s5608_s8, 512 }
  0x25   :  { %p4651_p8 = scmp.ne.s32.totalorder %s5608_s8, %s4650_s26  ;;  %p4654_p9 = scmp.lt.u32.totalorder %s4650_s26, %s5608_s8 }
  0x27   :  { %p4656_p10 = pnand %p4654_p9, %p4651_p8 }
  0x29   :  { %4659 = shalt.err (!%p4656_p10)
}
  0x2a   :  { %s4660_s30 = scalar_lea.vmem %s4961_s24, 512  ;;  %p4665_p12 = scmp.lt.s32.totalorder %s4961_s24, %s4961_s24 }
  0x2b   :  { %p4661_p11 = scmp.ne.s32.totalorder %s4961_s24, %s4660_s30  ;;  %p4666_p13 = scmp.lt.s32.totalorder %s4660_s30, %s4660_s30 }
  0x2d   :  { %p4667_p0 = por %p4666_p13, %p4665_p12 }
  0x2f   :  { %p4668_p1 = pnand %p4667_p0, %p4661_p11 }
  0x31   :  { %4671 = shalt.err (!%p4668_p1)
}
  0x32   :  { %88 = dma.hbm_to_vmem [thread:$0]  %s5608_s8, 512, %s4961_s24, [#allocation10], %s4840_s0, %s4840_s0, %s4841_s21  }
  0x33   :  { %s4842_s1 = smov [#allocation12]   ;;  %s4843_s2 = smov [#allocation3]  }
  0x34   :  { %s106_s23 = sshll.u32 %s4842_s1, 4  ;;  %s36_s25 = sshll.u32 %s4843_s2, 4  ;;  %s107_s23 = int_to_ptr.vmem [resolvable:$true] %s106_s23  ;;  %s4998_s25 = int_to_ptr.vmem [resolvable:$true] %s36_s25 }
  0x35   :  { %s4672_s28 = scalar_lea.hbm %s5610_s10, 512 }
  0x36   :  { %p4673_p2 = scmp.ne.s32.totalorder %s5610_s10, %s4672_s28  ;;  %p4676_p3 = scmp.lt.u32.totalorder %s4672_s28, %s5610_s10 }
  0x38   :  { %p4678_p4 = pnand %p4676_p3, %p4673_p2 }
  0x3a   :  { %4681 = shalt.err (!%p4678_p4)
}
  0x3b   :  { %s4682_s8 = scalar_lea.vmem %s107_s23, 512  ;;  %p4687_p6 = scmp.lt.s32.totalorder %s107_s23, %s107_s23 }
  0x3c   :  { %p4683_p5 = scmp.ne.s32.totalorder %s107_s23, %s4682_s8  ;;  %p4688_p7 = scmp.lt.s32.totalorder %s4682_s8, %s4682_s8 }
  0x3e   :  { %p4689_p8 = por %p4688_p7, %p4687_p6 }
  0x40   :  { %p4690_p9 = pnand %p4689_p8, %p4683_p5 }
  0x42   :  { %4693 = shalt.err (!%p4690_p9)
}
  0x43   :  { %112 = dma.hbm_to_vmem [thread:$0]  %s5610_s10, 512, %s107_s23, [#allocation13], %s4840_s0, %s4840_s0, %s4841_s21  }
  0x44   :  { %s5634_s20 = sld [smem:[#allocation24_spill]] }
  0x4a   :  { %s4694_s2 = scalar_lea.hbm %s5634_s20, 256 }
  0x4b   :  { %p4695_p10 = scmp.ne.s32.totalorder %s5634_s20, %s4694_s2  ;;  %p4698_p11 = scmp.lt.u32.totalorder %s4694_s2, %s5634_s20 }
  0x4d   :  { %p4700_p12 = pnand %p4698_p11, %p4695_p10 }
  0x4f   :  { %4703 = shalt.err (!%p4700_p12)
}
  0x50   :  { %s4704_s29 = scalar_lea.vmem %s4998_s25, 256  ;;  %p4709_p0 = scmp.lt.s32.totalorder %s4998_s25, %s4998_s25 }
  0x51   :  { %p4705_p13 = scmp.ne.s32.totalorder %s4998_s25, %s4704_s29  ;;  %p4710_p1 = scmp.lt.s32.totalorder %s4704_s29, %s4704_s29 }
  0x53   :  { %p4711_p2 = por %p4710_p1, %p4709_p0 }
  0x55   :  { %p4712_p3 = pnand %p4711_p2, %p4705_p13 }
  0x57   :  { %4715 = shalt.err (!%p4712_p3)
}
  0x58   :  { %42 = dma.hbm_to_vmem [thread:$0]  %s5634_s20, 256, %s4998_s25, [#allocation4], %s4840_s0, %s4840_s0, %s4841_s21  }
  0x59   :  { %s4844_s30 = smov [#allocation8]   ;;  %s4845_s24 = smov [#allocation11]  }
  0x5a   :  { %s66_s8 = sshll.u32 %s4844_s30, 4  ;;  %s94_s22 = sshll.u32 %s4845_s24, 4  ;;  %s67_s8 = int_to_ptr.vmem [resolvable:$true] %s66_s8  ;;  %s5035_s22 = int_to_ptr.vmem [resolvable:$true] %s94_s22 }
  0x5b   :  { %s4716_s2 = scalar_lea.hbm %s5605_s5, 512 }
  0x5c   :  { %p4717_p4 = scmp.ne.s32.totalorder %s5605_s5, %s4716_s2  ;;  %p4720_p5 = scmp.lt.u32.totalorder %s4716_s2, %s5605_s5 }
  0x5e   :  { %p4722_p6 = pnand %p4720_p5, %p4717_p4 }
  0x60   :  { %4725 = shalt.err (!%p4722_p6)
}
  0x61   :  { %s4726_s25 = scalar_lea.vmem %s67_s8, 512  ;;  %p4731_p8 = scmp.lt.s32.totalorder %s67_s8, %s67_s8 }
  0x62   :  { %p4727_p7 = scmp.ne.s32.totalorder %s67_s8, %s4726_s25  ;;  %p4732_p9 = scmp.lt.s32.totalorder %s4726_s25, %s4726_s25 }
  0x64   :  { %p4733_p10 = por %p4732_p9, %p4731_p8 }
  0x66   :  { %p4734_p11 = pnand %p4733_p10, %p4727_p7 }
  0x68   :  { %4737 = shalt.err (!%p4734_p11)
}
  0x69   :  { %72 = dma.hbm_to_vmem [thread:$0]  %s5605_s5, 512, %s67_s8, [#allocation7], %s4840_s0, %s4840_s0, %s4841_s21  }
  0x6a   :  { %s4738_s30 = scalar_lea.hbm %s5609_s9, 512 }
  0x6b   :  { %p4739_p12 = scmp.ne.s32.totalorder %s5609_s9, %s4738_s30  ;;  %p4742_p13 = scmp.lt.u32.totalorder %s4738_s30, %s5609_s9 }
  0x6d   :  { %p4744_p0 = pnand %p4742_p13, %p4739_p12 }
  0x6f   :  { %4747 = shalt.err (!%p4744_p0)
}
  0x70   :  { %s4748_s26 = scalar_lea.vmem %s5035_s22, 512  ;;  %p4753_p2 = scmp.lt.s32.totalorder %s5035_s22, %s5035_s22 }
  0x71   :  { %p4749_p1 = scmp.ne.s32.totalorder %s5035_s22, %s4748_s26  ;;  %p4754_p3 = scmp.lt.s32.totalorder %s4748_s26, %s4748_s26 }
  0x73   :  { %p4755_p4 = por %p4754_p3, %p4753_p2 }
  0x75   :  { %p4756_p5 = pnand %p4755_p4, %p4749_p1 }
  0x77   :  { %4759 = shalt.err (!%p4756_p5)
}
  0x78   :  { %100 = dma.hbm_to_vmem [thread:$0]  %s5609_s9, 512, %s5035_s22, [#allocation10], %s4840_s0, %s4840_s0, %s4841_s21  }
  0x79   :  { %s4846_s27 = smov [#allocation14]   ;;  %s4847_s4 = smov [#allocation15]  }
  0x7a   :  { %s118_s28 = sshll.u32 %s4846_s27, 4  ;;  %s134_s25 = sshll.u32 %s4847_s4, 4  ;;  %s119_s28 = int_to_ptr.vmem [resolvable:$true] %s118_s28  ;;  %s5072_s25 = int_to_ptr.vmem [resolvable:$true] %s134_s25 }
  0x7b   :  { %s4760_s10 = scalar_lea.hbm %s5611_s11, 512 }
  0x7c   :  { %p4761_p6 = scmp.ne.s32.totalorder %s5611_s11, %s4760_s10  ;;  %p4764_p7 = scmp.lt.u32.totalorder %s4760_s10, %s5611_s11 }
  0x7e   :  { %p4766_p8 = pnand %p4764_p7, %p4761_p6 }
  0x80   :  { %4769 = shalt.err (!%p4766_p8)
}
  0x81   :  { %s4770_s9 = scalar_lea.vmem %s119_s28, 512  ;;  %p4775_p10 = scmp.lt.s32.totalorder %s119_s28, %s119_s28 }
  0x82   :  { %p4771_p9 = scmp.ne.s32.totalorder %s119_s28, %s4770_s9  ;;  %p4776_p11 = scmp.lt.s32.totalorder %s4770_s9, %s4770_s9 }
  0x84   :  { %p4777_p12 = por %p4776_p11, %p4775_p10 }
  0x86   :  { %p4778_p13 = pnand %p4777_p12, %p4771_p9 }
  0x88   :  { %4781 = shalt.err (!%p4778_p13)
}
  0x89   :  { %124 = dma.hbm_to_vmem [thread:$0]  %s5611_s11, 512, %s119_s28, [#allocation13], %s4840_s0, %s4840_s0, %s4841_s21  }
  0x8a   :  { %s4782_s5 = scalar_lea.hbm %s5614_s14, 512 }
  0x8b   :  { %p4783_p0 = scmp.ne.s32.totalorder %s5614_s14, %s4782_s5  ;;  %p4786_p1 = scmp.lt.u32.totalorder %s4782_s5, %s5614_s14 }
  0x8d   :  { %p4788_p2 = pnand %p4786_p1, %p4783_p0 }
  0x8f   :  { %4791 = shalt.err (!%p4788_p2)
}
  0x90   :  { %s4792_s29 = scalar_lea.vmem %s5072_s25, 512  ;;  %p4797_p4 = scmp.lt.s32.totalorder %s5072_s25, %s5072_s25 }
  0x91   :  { %p4793_p3 = scmp.ne.s32.totalorder %s5072_s25, %s4792_s29  ;;  %p4798_p5 = scmp.lt.s32.totalorder %s4792_s29, %s4792_s29 }
  0x93   :  { %p4799_p6 = por %p4798_p5, %p4797_p4 }
  0x95   :  { %p4800_p7 = pnand %p4799_p6, %p4793_p3 }
  0x97   :  { %4803 = shalt.err (!%p4800_p7)
}
  0x98   :  { %140 = dma.hbm_to_vmem [thread:$0]  %s5614_s14, 512, %s5072_s25, [#allocation16], %s4840_s0, %s4840_s0, %s4841_s21  }
  0x99   :  { %4826 = dma.done.wait [#allocation4], 256  }
  0x9a   :  { %4827 = vsyncadd [#allocation4], 4294967040 }
  0x9b   :  { %4828 = dma.done.wait [#allocation7], 768  }
  0x9c   :  { %4829 = vsyncadd [#allocation7], 4294966528 }
  0x9d   :  { %4830 = dma.done.wait [#allocation10], 1024  }
  0x9e   :  { %4831 = vsyncadd [#allocation10], 4294966272 }
  0x9f   :  { %4832 = dma.done.wait [#allocation13], 1024  }
  0xa0   :  { %4833 = vsyncadd [#allocation13], 4294966272 }
  0xa1   :  { %4834 = dma.done.wait [#allocation16], 512  }
  0xa2   :  { %4835 = vsyncadd [#allocation16], 4294966784  ;;  %vm195_vm0 = vcmask 261120   ;;  %s5635_s30 = sld [smem:[#allocation26_spill]]  ;;  %v5121_v5 = vld [vmem:[#allocation3] sm:$0xff]  ;;  %s5636_s26 = sld [smem:[#allocation27_spill]]  ;;  %v429_v27 = vlaneseq }
  0xa3   :  { %4164 = vmatprep.mubr.msk.f32.mxu1 %vm195_vm0, %v5121_v5  ;;  %4186 = vmatprep.mubr.msk.f32.mxu0 %vm195_vm0, %v5121_v5  ;;  %v5139_v12 = vld [vmem:[#allocation3 + $0x8] sm:$0xff]  ;;  %v4848_v14 = vmov 0.0   ;;  %vm4849_vm1 = vmmov 0   ;;  %vm435_vm2 = vcmask 64512   ;;  %s4850_s11 = smov 120   ;;  %s5637_s23 = sld [smem:[#allocation28_spill]] }
  0xa4   :  { %v430_v28 = vshrl.u32 %v429_v27, 7  ;;  %v432_v29 = vand.u32 127, %v429_v27  ;;  %s4851_s22 = smov 112   ;;  %s4852_s1 = smov 104   ;;  %vm1102_vm4 = vcmask 130112   ;;  %vm1445_vm5 = vcmask 195712  }
  0xa5   :  { %s4853_s2 = smov 16   ;;  %vm1788_vm6 = vcmask 261312   ;;  %vm3787_vm15 = vcmask 523264  }
  0xa6   :  { %vm433_vm3 = vcmp.gt.s32.totalorder %v432_v29, %v430_v28 }
  0xa7   :  { %v5194_v30 = vsel %vm433_vm3, 1.7677669e+09, %v4848_v14 }
  0xa8   :  { %v179_v0 = vld [vmem:[%s5635_s30] sm:$0xff]  ;;  %v180_v1 = vld [vmem:[%s5635_s30 + $0x8] sm:$0xff]  ;;  %v181_v2 = vld [vmem:[%s5635_s30 + $0x10] sm:$0xff] }
  0xa9   :  { %v4434_v3 = vpack.c.bf16 %v180_v1, %v179_v0  ;;  %v182_v4 = vld [vmem:[%s5635_s30 + $0x18] sm:$0xff]  ;;  %v183_v7 = vld [vmem:[%s5636_s26] sm:$0xff]  ;;  %v184_v8 = vld [vmem:[%s5636_s26 + $0x8] sm:$0xff] }
  0xaa   :  { %v4438_v6 = vpack.c.bf16 %v182_v4, %v181_v2  ;;  %v4442_v9 = vpack.c.bf16 %v184_v8, %v183_v7  ;;  %v185_v10 = vld [vmem:[%s5636_s26 + $0x10] sm:$0xff]  ;;  %v186_v11 = vld [vmem:[%s5636_s26 + $0x18] sm:$0xff]  ;;  %v187_v21 = vld [vmem:[%s5637_s23] sm:$0xff]  ;;  %s4854_s26 = smov 24  }
  0xab   :  { %4435 = vmatprep.subr.bf16.mxu1 %v4434_v3  ;;  %v4446_v13 = vpack.c.bf16 %v186_v11, %v185_v10  ;;  %v188_v22 = vld [vmem:[%s5637_s23 + $0x8] sm:$0xff]  ;;  %v189_v23 = vld [vmem:[%s5637_s23 + $0x10] sm:$0xff]  ;;  %v190_v25 = vld [vmem:[%s5637_s23 + $0x18] sm:$0xff] }
  0xac   :  { %4437 = vmatpush3.bf16.msra.mxu1 %v4434_v3  ;;  %v4450_v24 = vpack.c.bf16 %v188_v22, %v187_v21  ;;  %v4454_v26 = vpack.c.bf16 %v190_v25, %v189_v23 }
  0xad   :  { %4439 = vmatprep.subr.bf16.mxu1 %v4438_v6 }
  0xae   :  { %4451 = vmatprep.subr.bf16.mxu0 %v4450_v24 }
  0xaf   :  { %4453 = vmatpush3.bf16.msra.mxu0 %v4450_v24 }
  0xb0   :  { %4441 = vmatpush3.bf16.msra.mxu1 %v4438_v6  ;;  %4455 = vmatprep.subr.bf16.mxu0 %v4454_v26 }
  0xb1   :  { %4443 = vmatprep.subr.bf16.mxu1 %v4442_v9 }
  0xb3   :  { %4165 = vmatmul.mubr.msk.f32.vlgmr.msra.gmra.mrb[0].mxu1 %vm195_vm0, %v5139_v12  ;;  %4457 = vmatpush3.bf16.msra.mxu0 %v4454_v26 }
  0xb4   :  { %4445 = vmatpush3.bf16.msra.mxu1 %v4442_v9  ;;  %4175 = vmatprep.mubr.msk.f32.mxu1 %vm195_vm0, %v5121_v5 }
  0xb5   :  { %4447 = vmatprep.subr.bf16.mxu1 %v4446_v13  ;;  %4199 = vmatprep.subr.mxu0 %v4848_v14 }
  0xb6   :  { %4187 = vmatmul.mubr.msk.f32.vlgmr.msra.gmra.mrb[0].mxu0 %vm195_vm0, %v5139_v12 }
  0xb7   :  { %4201 = vmatprep.mubr.msk.f32.mxu0 %vm4849_vm1, %v4848_v14 }
  0xb8   :  { %4449 = vmatpush3.bf16.msra.mxu1 %v4446_v13 }
  0xb9   :  { %4189 = vmatprep.subr.mxu1 %v4848_v14 }
  0xbb   :  { %4176 = vmatmul.mubr.msk.f32.vlgmr.msra.gmra.mrb[2].mxu1 %vm195_vm0, %v5139_v12 }
  0xbc   :  { %4191 = vmatprep.mubr.msk.f32.mxu1 %vm4849_vm1, %v4848_v14 }
 0x186   :  { %v4166_v15 = vpop.f32.mrb[0].mxu1 }
 0x187   :  { %v268_v16 = vpop.f32.mrb[1].mxu1  ;;  %v5169_v20 = vmul.f32 0.17677669, %v4166_v15 }
 0x188   :  { %v5158_v19 = vmul.f32 0.17677669, %v268_v16 }
 0x189   :  { %v5204_v49 = vpop.f32.mrb[0].mxu0 }
 0x18a   :  { %v5206_v50 = vpop.f32.mrb[1].mxu0 }
 0x18b   :  { %4200 = vmatpush3.msra.mxu0 %v5206_v50 }
 0x18c   :  { %4209 = vmatprep.subr.mxu0 %v4848_v14 }
 0x18e   :  { %v5150_v17 = vpop.f32.mrb[2].mxu1 }
 0x18f   :  { %840 = vrot.lane.b32.xlu1 %v5150_v17, %s4850_s11  ;;  %v5154_v18 = vpop.f32.mrb[3].mxu1 }
 0x190   :  { %4190 = vmatpush3.xpose.msk.msra.mxu1 %vm435_vm2, %v5154_v18 }
 0x191   :  { %4194 = vmatprep.subr.mxu1 %v4848_v14 }
 0x193   :  { %760 = vrot.lane.b32.xlu1 %v5158_v19, %s4850_s11  ;;  %4192 = vmatmul.mubr.msk.f32.vlgmr.msra.gmra.mrb[4].mxu1 %vm435_vm2, %v5158_v19 }
 0x194   :  { %4195 = vmatpush3.xpose.msk.msra.mxu1 %vm435_vm2, %v5150_v17  ;;  %4196 = vmatprep.mubr.msk.f32.mxu1 %vm4849_vm1, %v4848_v14 }
 0x195   :  { %4204 = vmatprep.subr.mxu1 %v4848_v14 }
 0x197   :  { %4197 = vmatmul.mubr.msk.f32.vlgmr.msra.gmra.mrb[6].mxu1 %vm435_vm2, %v5169_v20 }
 0x198   :  { %4206 = vmatprep.mubr.msk.f32.mxu1 %vm4849_vm1, %v4848_v14  ;;  %4205 = vmatpush3.msra.mxu1 %v5204_v49 }
 0x199   :  { %4214 = vmatprep.subr.mxu1 %v4848_v14 }
 0x201   :  { %v841_v51 = vpop.permute.xlu1 %840 }
 0x205   :  { %v761_v52 = vpop.permute.xlu1 %760 }
 0x266   :  { %v508_v31 = vpop.f32.mrb[4].mxu1 }
 0x267   :  { %v588_v32 = vsub.f32 %v508_v31, %v5194_v30  ;;  %v4193_v33 = vpop.f32.mrb[5].mxu1 }
 0x269   :  { %v590_v34 = vsel %vm435_vm2, %v588_v32, -inf }
 0x26a   :  { %591 = vmax.xlane.f32.xlu0 %v590_v34  ;;  %v584_v35 = vpop.f32.mrb[6].mxu1 }
 0x26b   :  { %v589_v36 = vsub.f32 %v584_v35, %v5194_v30  ;;  %v4198_v37 = vpop.f32.mrb[7].mxu1 }
 0x26d   :  { %v593_v38 = vsel %vm435_vm2, %v589_v36, -inf }
 0x26e   :  { %594 = vmax.xlane.f32.xlu0 %v593_v38 }
 0x284   :  { %762 = vrot.lane.b32.xlu0 %v5154_v18, %s4850_s11 }
 0x2f7   :  { %v592_v39 = vpop.xlane.xlu0 %591 }
 0x2f8   :  { %v596_v40 = vsub.f32 %v588_v32, %v592_v39 }
 0x2fa   :  { %v598_v41 = vmul.f32 1.442695, %v596_v40 }
 0x2fb   :  { %v595_v42 = vpop.xlane.xlu0 %594 }
 0x2fc   :  { %4540 = vpow2.f32 %v598_v41  ;;  %v597_v43 = vsub.f32 %v589_v36, %v595_v42 }
 0x2fe   :  { %v600_v44 = vmul.f32 1.442695, %v597_v43 }
 0x2ff   :  { %v763_v57 = vpop.permute.xlu0 %762 }
 0x300   :  { %4542 = vpow2.f32 %v600_v44 }
 0x306   :  { %v4541_v45 = vpop.eup %4540 }
 0x307   :  { %v602_v46 = vsel %vm435_vm2, %v4541_v45, 0.0 }
 0x308   :  { %603 = vadd.xlane.f32.xlu1 %v602_v46 }
 0x30a   :  { %v4543_v47 = vpop.eup %4542 }
 0x30b   :  { %v605_v48 = vsel %vm435_vm2, %v4543_v47, 0.0 }
 0x30c   :  { %606 = vadd.xlane.f32.xlu1 %v605_v48 }
 0x31d   :  { %838 = vrot.lane.b32.xlu1 %v5169_v20, %s4850_s11 }
 0x395   :  { %v604_v53 = vpop.xlane.xlu1 %603 }
 0x396   :  { %4544 = vrcp.f32 %v604_v53 }
 0x399   :  { %v607_v54 = vpop.xlane.xlu1 %606 }
 0x39a   :  { %4546 = vrcp.f32 %v607_v54 }
 0x39d   :  { %v839_v60 = vpop.permute.xlu1 %838 }
 0x3a0   :  { %v4545_v55 = vpop.eup %4544 }
 0x3a1   :  { %v610_v56 = vmul.f32 %v4545_v55, %v4541_v45 }
 0x3a3   :  { %4202 = vmatmul.mubr.msk.f32.vlgmr.msra.gmra.mrb[2].mxu0 %vm435_vm2, %v610_v56 }
 0x3a4   :  { %v4547_v58 = vpop.eup %4546  ;;  %4210 = vmatpush3.xpose.msk.msra.mxu0 %vm435_vm2, %v763_v57  ;;  %4211 = vmatprep.mubr.msk.f32.mxu0 %vm4849_vm1, %v4848_v14 }
 0x3a5   :  { %v611_v59 = vmul.f32 %v4547_v58, %v4543_v47  ;;  %4219 = vmatprep.subr.mxu0 %v4848_v14 }
 0x3a7   :  { %4207 = vmatmul.mubr.msk.f32.vlgmr.msra.gmra.mrb[8].mxu1 %vm435_vm2, %v611_v59  ;;  %4212 = vmatmul.mubr.msk.f32.vlgmr.msra.gmra.mrb[4].mxu0 %vm435_vm2, %v761_v52 }
 0x3a8   :  { %4215 = vmatpush3.xpose.msk.msra.mxu1 %vm435_vm2, %v841_v51  ;;  %4216 = vmatprep.mubr.msk.f32.mxu1 %vm4849_vm1, %v4848_v14 }
 0x3a9   :  { %4224 = vmatprep.subr.mxu1 %v4848_v14  ;;  %4221 = vmatprep.mubr.msk.f32.mxu0 %vm4849_vm1, %v4848_v14 }
 0x3ab   :  { %4217 = vmatmul.mubr.msk.f32.vlgmr.msra.gmra.mrb[10].mxu1 %vm435_vm2, %v839_v60 }
 0x3ac   :  { %4226 = vmatprep.mubr.msk.f32.mxu1 %vm4849_vm1, %v4848_v14 }
 0x476   :  { %v681_v61 = vpop.f32.mrb[2].mxu0 }
 0x477   :  { %758 = vst.msk [vmem:[#allocation2] sm:$0xff] %vm435_vm2, %v681_v61  ;;  %v4203_v62 = vpop.f32.mrb[3].mxu0 }
 0x47a   :  { %v754_v63 = vpop.f32.mrb[8].mxu1  ;;  %v834_v0 = vpop.f32.mrb[4].mxu0 }
 0x47b   :  { %759 = vst.msk [vmem:[#allocation2 + $0x8] sm:$0xff] %vm435_vm2, %v754_v63  ;;  %v916_v1 = vsub.f32 %v834_v0, %v5194_v30  ;;  %v4208_v2 = vpop.f32.mrb[9].mxu1  ;;  %v4213_v3 = vpop.f32.mrb[5].mxu0 }
 0x47d   :  { %v918_v4 = vsel %vm435_vm2, %v916_v1, -inf }
 0x47e   :  { %919 = vmax.xlane.f32.xlu0 %v918_v4  ;;  %v912_v6 = vpop.f32.mrb[10].mxu1 }
 0x47f   :  { %v917_v7 = vsub.f32 %v912_v6, %v5194_v30  ;;  %v4218_v8 = vpop.f32.mrb[11].mxu1 }
 0x481   :  { %v921_v9 = vsel %vm435_vm2, %v917_v7, -inf }
 0x482   :  { %922 = vmax.xlane.f32.xlu1 %v921_v9 }
 0x493   :  { %1018 = vrot.lane.b32.xlu1 %v5204_v49, %s4850_s11 }
 0x494   :  { %941 = vrot.lane.b32.xlu0 %v5206_v50, %s4850_s11 }
 0x497   :  { %1107 = vrot.lane.b32.xlu1 %v5154_v18, %s4851_s22 }
 0x49b   :  { %1185 = vrot.lane.b32.xlu1 %v5150_v17, %s4851_s22 }
 0x49f   :  { %1183 = vrot.lane.b32.xlu1 %v5169_v20, %s4851_s22 }
 0x50b   :  { %v920_v10 = vpop.xlane.xlu0 %919 }
 0x50c   :  { %v924_v11 = vsub.f32 %v916_v1, %v920_v10 }
 0x50e   :  { %v926_v13 = vmul.f32 1.442695, %v924_v11 }
 0x50f   :  { %v942_v15 = vpop.permute.xlu0 %941  ;;  %v923_v16 = vpop.xlane.xlu1 %922 }
 0x510   :  { %4548 = vpow2.f32 %v926_v13  ;;  %v925_v21 = vsub.f32 %v917_v7, %v923_v16  ;;  %4220 = vmatpush3.msra.mxu0 %v942_v15 }
 0x511   :  { %4229 = vmatprep.subr.mxu0 %v4848_v14 }
 0x512   :  { %v928_v22 = vmul.f32 1.442695, %v925_v21 }
 0x513   :  { %v1019_v23 = vpop.permute.xlu1 %1018 }
 0x514   :  { %4550 = vpow2.f32 %v928_v22  ;;  %4225 = vmatpush3.msra.mxu1 %v1019_v23 }
 0x515   :  { %4234 = vmatprep.subr.mxu1 %v4848_v14 }
 0x517   :  { %v1108_v31 = vpop.permute.xlu1 %1107 }
 0x51a   :  { %v4549_v24 = vpop.eup %4548 }
 0x51b   :  { %v930_v25 = vsel %vm435_vm2, %v4549_v24, 0.0  ;;  %v1186_v35 = vpop.permute.xlu1 %1185 }
 0x51c   :  { %931 = vadd.xlane.f32.xlu0 %v930_v25 }
 0x51e   :  { %v4551_v26 = vpop.eup %4550 }
 0x51f   :  { %v933_v27 = vsel %vm435_vm2, %v4551_v26, 0.0  ;;  %v1184_v38 = vpop.permute.xlu1 %1183 }
 0x520   :  { %934 = vadd.xlane.f32.xlu0 %v933_v27 }
 0x536   :  { %1105 = vrot.lane.b32.xlu0 %v5158_v19, %s4851_s22 }
 0x5a9   :  { %v932_v28 = vpop.xlane.xlu0 %931 }
 0x5aa   :  { %4552 = vrcp.f32 %v932_v28 }
 0x5ad   :  { %v935_v29 = vpop.xlane.xlu0 %934 }
 0x5ae   :  { %4554 = vrcp.f32 %v935_v29 }
 0x5b1   :  { %v1106_v37 = vpop.permute.xlu0 %1105 }
 0x5b4   :  { %v4553_v32 = vpop.eup %4552 }
 0x5b5   :  { %v938_v33 = vmul.f32 %v4553_v32, %v4549_v24 }
 0x5b7   :  { %4222 = vmatmul.mubr.msk.f32.vlgmr.msra.gmra.mrb[6].mxu0 %vm435_vm2, %v938_v33 }
 0x5b8   :  { %v4555_v34 = vpop.eup %4554  ;;  %4230 = vmatpush3.xpose.msk.msra.mxu0 %vm435_vm2, %v1108_v31  ;;  %4231 = vmatprep.mubr.msk.f32.mxu0 %vm4849_vm1, %v4848_v14 }
 0x5b9   :  { %v939_v36 = vmul.f32 %v4555_v34, %v4551_v26  ;;  %4239 = vmatprep.subr.mxu0 %v4848_v14 }
 0x5bb   :  { %4227 = vmatmul.mubr.msk.f32.vlgmr.msra.gmra.mrb[12].mxu1 %vm435_vm2, %v939_v36  ;;  %4232 = vmatmul.mubr.msk.f32.vlgmr.msra.gmra.mrb[8].mxu0 %vm435_vm2, %v1106_v37 }
 0x5bc   :  { %4235 = vmatpush3.xpose.msk.msra.mxu1 %vm435_vm2, %v1186_v35  ;;  %4236 = vmatprep.mubr.msk.f32.mxu1 %vm4849_vm1, %v4848_v14 }
 0x5bd   :  { %4244 = vmatprep.subr.mxu1 %v4848_v14  ;;  %4241 = vmatprep.mubr.msk.f32.mxu0 %vm4849_vm1, %v4848_v14 }
 0x5bf   :  { %4237 = vmatmul.mubr.msk.f32.vlgmr.msra.gmra.mrb[14].mxu1 %vm435_vm2, %v1184_v38 }
 0x5c0   :  { %4246 = vmatprep.mubr.msk.f32.mxu1 %vm4849_vm1, %v4848_v14 }
 0x68a   :  { %v5268_v39 = vpop.f32.mrb[6].mxu0 }
 0x68b   :  { %v4223_v40 = vpop.f32.mrb[7].mxu0 }
 0x68e   :  { %v5270_v41 = vpop.f32.mrb[12].mxu1  ;;  %v1179_v42 = vpop.f32.mrb[8].mxu0 }
 0x68f   :  { %v1261_v43 = vsub.f32 %v1179_v42, %v5194_v30  ;;  %v4228_v44 = vpop.f32.mrb[13].mxu1  ;;  %v4233_v45 = vpop.f32.mrb[9].mxu0 }
 0x691   :  { %v1263_v46 = vsel %vm435_vm2, %v1261_v43, -inf }
 0x692   :  { %1264 = vmax.xlane.f32.xlu0 %v1263_v46  ;;  %v1257_v47 = vpop.f32.mrb[14].mxu1 }
 0x693   :  { %v1262_v48 = vsub.f32 %v1257_v47, %v5194_v30  ;;  %v4238_v51 = vpop.f32.mrb[15].mxu1  ;;  %v192_v47 = vld [vmem:[#allocation8 + $0x8] sm:$0xff] }
 0x694   :  { %v193_v51 = vld [vmem:[#allocation8 + $0x10] sm:$0xff] }
 0x695   :  { %v1266_v52 = vsel %vm435_vm2, %v1262_v48, -inf }
 0x696   :  { %1267 = vmax.xlane.f32.xlu1 %v1266_v52  ;;  %v194_v52 = vld [vmem:[#allocation8 + $0x18] sm:$0xff] }
 0x6a7   :  { %1361 = vrot.lane.b32.xlu1 %v5204_v49, %s4851_s22 }
 0x6a8   :  { %1285 = vrot.lane.b32.xlu0 %v5206_v50, %s4851_s22 }
 0x6ab   :  { %1450 = vrot.lane.b32.xlu1 %v5154_v18, %s4852_s1 }
 0x6af   :  { %1528 = vrot.lane.b32.xlu1 %v5150_v17, %s4852_s1 }
 0x6b3   :  { %1526 = vrot.lane.b32.xlu1 %v5169_v20, %s4852_s1 }
 0x71f   :  { %v1265_v53 = vpop.xlane.xlu0 %1264 }
 0x720   :  { %v1269_v54 = vsub.f32 %v1261_v43, %v1265_v53  ;;  %v4462_v53 = vpack.c.bf16 %v194_v52, %v193_v51  ;;  %v3985_v51 = vld [vmem:[%s5607_s7] ss:$0 sm:$0xff]  ;;  %s4855_s7 = smov [#allocation17]  }
 0x721   :  { %s3936_s20 = sshll.u32 %s4855_s7, 4  ;;  %s3937_s20 = int_to_ptr.vmem [resolvable:$true] %s3936_s20 }
 0x722   :  { %v1271_v55 = vmul.f32 1.442695, %v1269_v54  ;;  %p4809_p9 = scmp.lt.s32.totalorder %s3937_s20, %s3937_s20 }
 0x723   :  { %v1286_v56 = vpop.permute.xlu0 %1285  ;;  %v1268_v57 = vpop.xlane.xlu1 %1267 }
 0x724   :  { %4556 = vpow2.f32 %v1271_v55  ;;  %v1270_v58 = vsub.f32 %v1262_v48, %v1268_v57  ;;  %4240 = vmatpush3.msra.mxu0 %v1286_v56 }
 0x725   :  { %4249 = vmatprep.subr.mxu0 %v4848_v14 }
 0x726   :  { %v1273_v59 = vmul.f32 1.442695, %v1270_v58 }
 0x727   :  { %v1362_v60 = vpop.permute.xlu1 %1361 }
 0x728   :  { %4558 = vpow2.f32 %v1273_v59  ;;  %4245 = vmatpush3.msra.mxu1 %v1362_v60 }
 0x729   :  { %4254 = vmatprep.subr.mxu1 %v4848_v14 }
 0x72b   :  { %v1451_v0 = vpop.permute.xlu1 %1450 }
 0x72e   :  { %v4557_v17 = vpop.eup %4556 }
 0x72f   :  { %v1275_v18 = vsel %vm435_vm2, %v4557_v17, 0.0  ;;  %v1529_v4 = vpop.permute.xlu1 %1528 }
 0x730   :  { %1276 = vadd.xlane.f32.xlu0 %v1275_v18 }
 0x732   :  { %v4559_v20 = vpop.eup %4558 }
 0x733   :  { %v1278_v61 = vsel %vm435_vm2, %v4559_v20, 0.0  ;;  %v1527_v7 = vpop.permute.xlu1 %1526 }
 0x734   :  { %1279 = vadd.xlane.f32.xlu0 %v1278_v61 }
 0x74a   :  { %1448 = vrot.lane.b32.xlu0 %v5158_v19, %s4852_s1 }
 0x7bd   :  { %v1277_v62 = vpop.xlane.xlu0 %1276 }
 0x7be   :  { %4560 = vrcp.f32 %v1277_v62 }
 0x7c1   :  { %v1280_v63 = vpop.xlane.xlu0 %1279 }
 0x7c2   :  { %4562 = vrcp.f32 %v1280_v63 }
 0x7c5   :  { %v1449_v19 = vpop.permute.xlu0 %1448 }
 0x7c8   :  { %v4561_v1 = vpop.eup %4560 }
 0x7c9   :  { %v1283_v2 = vmul.f32 %v4561_v1, %v4557_v17 }
 0x7cb   :  { %4242 = vmatmul.mubr.msk.f32.vlgmr.msra.gmra.mrb[10].mxu0 %vm435_vm2, %v1283_v2 }
 0x7cc   :  { %v4563_v3 = vpop.eup %4562  ;;  %4250 = vmatpush3.xpose.msk.msra.mxu0 %vm435_vm2, %v1451_v0  ;;  %4251 = vmatprep.mubr.msk.f32.mxu0 %vm4849_vm1, %v4848_v14 }
 0x7cd   :  { %v1284_v6 = vmul.f32 %v4563_v3, %v4559_v20  ;;  %4259 = vmatprep.subr.mxu0 %v4848_v14 }
 0x7cf   :  { %4247 = vmatmul.mubr.msk.f32.vlgmr.msra.gmra.mrb[16].mxu1 %vm435_vm2, %v1284_v6  ;;  %4252 = vmatmul.mubr.msk.f32.vlgmr.msra.gmra.mrb[12].mxu0 %vm435_vm2, %v1449_v19 }
 0x7d0   :  { %4255 = vmatpush3.xpose.msk.msra.mxu1 %vm435_vm2, %v1529_v4  ;;  %4256 = vmatprep.mubr.msk.f32.mxu1 %vm4849_vm1, %v4848_v14 }
 0x7d1   :  { %4264 = vmatprep.subr.mxu1 %v4848_v14  ;;  %4261 = vmatprep.mubr.msk.f32.mxu0 %vm4849_vm1, %v4848_v14 }
 0x7d3   :  { %4257 = vmatmul.mubr.msk.f32.vlgmr.msra.gmra.mrb[18].mxu1 %vm435_vm2, %v1527_v7 }
 0x7d4   :  { %4266 = vmatprep.mubr.msk.f32.mxu1 %vm4849_vm1, %v4848_v14 }
 0x89e   :  { %v1357_v8 = vpop.f32.mrb[10].mxu0 }
 0x89f   :  { %v4243_v9 = vpop.f32.mrb[11].mxu0 }
 0x8a0   :  { %v1940_v9 = vld [vmem:[#allocation11] sm:$0xff] }
 0x8a2   :  { %v1433_v10 = vpop.f32.mrb[16].mxu1  ;;  %v1522_v11 = vpop.f32.mrb[12].mxu0 }
 0x8a3   :  { %v1604_v13 = vsub.f32 %v1522_v11, %v5194_v30  ;;  %v4248_v15 = vpop.f32.mrb[17].mxu1  ;;  %v4253_v16 = vpop.f32.mrb[13].mxu0  ;;  %v1936_v11 = vld [vmem:[#allocation9] sm:$0xff] }
 0x8a4   :  { %v1937_v15 = vld [vmem:[#allocation9 + $0x8] sm:$0xff]  ;;  %v1942_v16 = vld [vmem:[#allocation11 + $0x10] sm:$0xff] }
 0x8a5   :  { %v1606_v21 = vsel %vm435_vm2, %v1604_v13, -inf }
 0x8a6   :  { %1607 = vmax.xlane.f32.xlu0 %v1606_v21  ;;  %v1600_v22 = vpop.f32.mrb[18].mxu1  ;;  %v1943_v21 = vld [vmem:[#allocation11 + $0x18] sm:$0xff] }
 0x8a7   :  { %v1605_v23 = vsub.f32 %v1600_v22, %v5194_v30  ;;  %v4258_v24 = vpop.f32.mrb[19].mxu1  ;;  %v4466_v22 = vpack.c.bf16 %v1937_v15, %v1936_v11 }
 0x8a8   :  { %v1938_v24 = vld [vmem:[#allocation9 + $0x10] sm:$0xff] }
 0x8a9   :  { %v1609_v25 = vsel %vm435_vm2, %v1605_v23, -inf }
 0x8aa   :  { %1610 = vmax.xlane.f32.xlu1 %v1609_v25  ;;  %v1939_v25 = vld [vmem:[#allocation9 + $0x18] sm:$0xff] }
 0x8bb   :  { %1704 = vrot.lane.b32.xlu1 %v5204_v49, %s4852_s1 }
 0x8bf   :  { %1096 = vrot.lane.b32.xlu1 %v5268_v39, %s4841_s21 }
 0x8c3   :  { %1098 = vrot.lane.b32.xlu1 %v5270_v41, %s4841_s21 }
 0x8c7   :  { %1441 = vrot.lane.b32.xlu1 %v1433_v10, %s4853_s2  ;;  %v1941_v10 = vld [vmem:[#allocation11 + $0x8] sm:$0xff] }
 0x933   :  { %v1608_v26 = vpop.xlane.xlu0 %1607 }
 0x934   :  { %v1612_v27 = vsub.f32 %v1604_v13, %v1608_v26  ;;  %v4474_v13 = vpack.c.bf16 %v1941_v10, %v1940_v9  ;;  %v4470_v26 = vpack.c.bf16 %v1939_v25, %v1938_v24 }
 0x936   :  { %v1614_v28 = vmul.f32 1.442695, %v1612_v27  ;;  %v177_v27 = vld [vmem:[#allocation6] sm:$0xff] }
 0x937   :  { %v1611_v30 = vpop.xlane.xlu1 %1610 }
 0x938   :  { %4564 = vpow2.f32 %v1614_v28  ;;  %v1613_v29 = vsub.f32 %v1605_v23, %v1611_v30  ;;  %v4478_v23 = vpack.c.bf16 %v1943_v21, %v1942_v16  ;;  %v178_v28 = vld [vmem:[#allocation6 + $0x8] sm:$0xff]  ;;  %v1944_v30 = vld [vmem:[#allocation12] sm:$0xff] }
 0x93a   :  { %v1616_v31 = vmul.f32 1.442695, %v1613_v29  ;;  %v1945_v29 = vld [vmem:[#allocation12 + $0x8] sm:$0xff] }
 0x93b   :  { %v1705_v32 = vpop.permute.xlu1 %1704 }
 0x93c   :  { %4566 = vpow2.f32 %v1616_v31  ;;  %4265 = vmatpush3.msra.mxu1 %v1705_v32  ;;  %v4482_v31 = vpack.c.bf16 %v1945_v29, %v1944_v30 }
 0x93d   :  { %4467 = vmatprep.subr.bf16.mxu1 %v4466_v22 }
 0x93f   :  { %v1097_v49 = vpop.permute.xlu1 %1096 }
 0x940   :  { %1103 = vst.msk [vmem:[#allocation2] sm:$0xff] %vm1102_vm4, %v1097_v49 }
 0x942   :  { %v4565_v33 = vpop.eup %4564 }
 0x943   :  { %v1099_v34 = vpop.permute.xlu1 %1098  ;;  %v1618_v35 = vsel %vm435_vm2, %v4565_v33, 0.0 }
 0x944   :  { %1104 = vst.msk [vmem:[#allocation2 + $0x8] sm:$0xff] %vm1102_vm4, %v1099_v34  ;;  %1619 = vadd.xlane.f32.xlu0 %v1618_v35 }
 0x946   :  { %v4567_v36 = vpop.eup %4566 }
 0x947   :  { %v1442_v37 = vpop.permute.xlu1 %1441  ;;  %v1621_v38 = vsel %vm435_vm2, %v4567_v36, 0.0 }
 0x948   :  { %1447 = vst.msk [vmem:[#allocation2 + $0x8] sm:$0xff] %vm1445_vm5, %v1442_v37  ;;  %1622 = vadd.xlane.f32.xlu0 %v1621_v38 }
 0x95e   :  { %1628 = vrot.lane.b32.xlu0 %v5206_v50, %s4852_s1  ;;  %v191_v50 = vld [vmem:[#allocation8] sm:$0xff] }
 0x95f   :  { %v4458_v48 = vpack.c.bf16 %v192_v47, %v191_v50  ;;  %v3984_v50 = vld [vmem:[%s5606_s6] ss:$0 sm:$0xff] }
 0x962   :  { %1439 = vrot.lane.b32.xlu0 %v1357_v8, %s4853_s2 }
 0x9d1   :  { %v1620_v39 = vpop.xlane.xlu0 %1619 }
 0x9d2   :  { %4568 = vrcp.f32 %v1620_v39 }
 0x9d5   :  { %v1623_v40 = vpop.xlane.xlu0 %1622 }
 0x9d6   :  { %4570 = vrcp.f32 %v1623_v40 }
 0x9d9   :  { %v1629_v41 = vpop.permute.xlu0 %1628 }
 0x9da   :  { %4260 = vmatpush3.msra.mxu0 %v1629_v41 }
 0x9db   :  { %4459 = vmatprep.subr.bf16.mxu0 %v4458_v48 }
 0x9dc   :  { %v4569_v42 = vpop.eup %4568 }
 0x9dd   :  { %v1626_v43 = vmul.f32 %v4569_v42, %v4565_v33  ;;  %v1440_v44 = vpop.permute.xlu0 %1439 }
 0x9de   :  { %1446 = vst.msk [vmem:[#allocation2] sm:$0xff] %vm1445_vm5, %v1440_v44 }
 0x9df   :  { %4262 = vmatmul.mubr.msk.f32.vlgmr.msra.gmra.mrb[14].mxu0 %vm435_vm2, %v1626_v43 }
 0x9e0   :  { %v4571_v45 = vpop.eup %4570  ;;  %4461 = vmatpush3.bf16.msra.mxu0 %v4458_v48 }
 0x9e1   :  { %v1627_v46 = vmul.f32 %v4571_v45, %v4567_v36  ;;  %4463 = vmatprep.subr.bf16.mxu0 %v4462_v53 }
 0x9e3   :  { %4267 = vmatmul.mubr.msk.f32.vlgmr.msra.gmra.mrb[20].mxu1 %vm435_vm2, %v1627_v46 }
 0x9e4   :  { %4465 = vmatpush3.bf16.msra.mxu0 %v4462_v53  ;;  %4469 = vmatpush3.bf16.msra.mxu1 %v4466_v22 }
 0x9e5   :  { %4475 = vmatprep.subr.bf16.mxu0 %v4474_v13  ;;  %4471 = vmatprep.subr.bf16.mxu1 %v4470_v26 }
 0x9e8   :  { %4473 = vmatpush3.bf16.msra.mxu1 %v4470_v26 }
 0x9e9   :  { %4483 = vmatprep.subr.bf16.mxu1 %v4482_v31 }
 0xab2   :  { %v1700_v54 = vpop.f32.mrb[14].mxu0 }
 0xab3   :  { %1782 = vrot.lane.b32.xlu0 %v1700_v54, %s4854_s26  ;;  %v4263_v55 = vpop.f32.mrb[15].mxu0 }
 0xab6   :  { %v1776_v56 = vpop.f32.mrb[20].mxu1 }
 0xab7   :  { %1784 = vrot.lane.b32.xlu1 %v1776_v56, %s4854_s26  ;;  %v4268_v57 = vpop.f32.mrb[21].mxu1  ;;  %v1946_v56 = vld [vmem:[#allocation12 + $0x10] sm:$0xff] }
 0xab8   :  { %v1947_v57 = vld [vmem:[#allocation12 + $0x18] sm:$0xff] }
 0xb25   :  { %v1783_v58 = vpop.permute.xlu0 %1782 }
 0xb26   :  { %1789 = vst.msk [vmem:[#allocation2] sm:$0xff] %vm1788_vm6, %v1783_v58 }
 0xb29   :  { %v1785_v59 = vpop.permute.xlu1 %1784 }
 0xb2a   :  { %1790 = vst.msk [vmem:[#allocation2 + $0x8] sm:$0xff] %vm1788_vm6, %v1785_v59 }
 0xb2d   :  { %v1791_v60 = vld [vmem:[#allocation2] sm:$0xff] }
 0xb2e   :  { %4277 = vmatprep.mubr.msk.f32.mxu0 %vm195_vm0, %v1791_v60  ;;  %v4486_v60 = vpack.c.bf16 %v1947_v57, %v1946_v56 }
 0xb31   :  { %v1792_v17 = vld [vmem:[#allocation2 + $0x8] sm:$0xff] }
 0xb32   :  { %4278 = vmatmul.mubr.msk.f32.vlgmr.msra.gmra.mrb[16].mxu0 %vm195_vm0, %v1792_v17 }
 0xb33   :  { %4477 = vmatpush3.bf16.msra.mxu0 %v4474_v13  ;;  %4299 = vmatprep.mubr.msk.f32.mxu0 %vm195_vm0, %v177_v27 }
 0xb34   :  { %4479 = vmatprep.subr.bf16.mxu0 %v4478_v23 }
 0xb37   :  { %4481 = vmatpush3.bf16.msra.mxu0 %v4478_v23 }
 0xb38   :  { %4313 = vmatprep.subr.mxu0 %v4848_v14 }
 0xb3a   :  { %4300 = vmatmul.mubr.msk.f32.vlgmr.msra.gmra.mrb[18].mxu0 %vm195_vm0, %v178_v28 }
 0xb3b   :  { %4315 = vmatprep.mubr.msk.f32.mxu0 %vm4849_vm1, %v4848_v14 }
 0xc05   :  { %v4279_v18 = vpop.f32.mrb[16].mxu0 }
 0xc06   :  { %v1875_v20 = vadd.f32 %v4279_v18, %v5139_v12  ;;  %v1865_v61 = vpop.f32.mrb[17].mxu0 }
 0xc07   :  { %v1874_v62 = vadd.f32 %v1865_v61, %v5121_v5 }
 0xc08   :  { %v1881_v63 = vsel %vm195_vm0, %v1875_v20, 0.0 }
 0xc09   :  { %1882 = vadd.xlane.f32.xlu1 %v1881_v63  ;;  %v1878_v0 = vsel %vm195_vm0, %v1874_v62, 0.0 }
 0xc0a   :  { %1879 = vadd.xlane.f32.xlu0 %v1878_v0 }
 0xc0d   :  { %v5371_v17 = vpop.f32.mrb[18].mxu0 }
 0xc0e   :  { %v5373_v18 = vpop.f32.mrb[19].mxu0 }
 0xc0f   :  { %4314 = vmatpush3.xpose.msk.msra.mxu0 %vm435_vm2, %v5373_v18 }
 0xc10   :  { %4323 = vmatprep.subr.mxu0 %v4848_v14 }
 0xc96   :  { %v1883_v1 = vpop.xlane.xlu1 %1882 }
 0xc97   :  { %v1886_v2 = vmul.f32 0.03125, %v1883_v1  ;;  %v1880_v3 = vpop.xlane.xlu0 %1879 }
 0xc98   :  { %v1885_v4 = vmul.f32 0.03125, %v1880_v3 }
 0xc99   :  { %v5340_v6 = vsub.f32 %v1875_v20, %v1886_v2 }
 0xc9a   :  { %v1887_v19 = vsub.f32 %v1874_v62, %v1885_v4 }
 0xc9b   :  { %v1890_v12 = vmul.f32 %v5340_v6, %v5340_v6  ;;  %v1925_v53 = vmul.f32 %v3984_v50, %v5340_v6 }
 0xc9c   :  { %v1889_v7 = vmul.f32 %v1887_v19, %v1887_v19  ;;  %v1924_v47 = vmul.f32 %v3984_v50, %v1887_v19 }
 0xc9d   :  { %v1894_v5 = vsel %vm195_vm0, %v1890_v12, 0.0 }
 0xc9e   :  { %v1891_v8 = vsel %vm195_vm0, %v1889_v7, 0.0 }
 0xc9f   :  { %1892 = vadd.xlane.f32.xlu0 %v1891_v8 }
 0xca3   :  { %1895 = vadd.xlane.f32.xlu0 %v1894_v5 }
 0xd2c   :  { %v1893_v32 = vpop.xlane.xlu0 %1892 }
 0xd2d   :  { %v1898_v49 = vmul.f32 0.032258064, %v1893_v32 }
 0xd2f   :  { %4572 = vrsqrt.f32 %v1898_v49  ;;  %vm1902_vm7 = vcmp.eq.f32.partialorder %v1898_v49, inf  ;;  %v1905_v37 = vand.u32 2147483648, %v1898_v49  ;;  %vm1904_vm8 = vcmp.eq.f32.partialorder %v1898_v49, 0.0 }
 0xd30   :  { %v1896_v33 = vpop.xlane.xlu0 %1895 }
 0xd31   :  { %v1899_v34 = vmul.f32 0.032258064, %v1896_v33 }
 0xd33   :  { %4574 = vrsqrt.f32 %v1899_v34  ;;  %vm1909_vm9 = vcmp.eq.f32.partialorder %v1899_v34, inf  ;;  %v1912_v43 = vand.u32 2147483648, %v1899_v34  ;;  %vm1911_vm10 = vcmp.eq.f32.partialorder %v1899_v34, 0.0 }
 0xd39   :  { %v4573_v35 = vpop.eup %4572 }
 0xd3a   :  { %v1901_v36 = vmul.f32 %v4573_v35, %v1898_v49 }
 0xd3c   :  { %v1903_v38 = vsel %vm1902_vm7, %v1898_v49, %v1901_v36 }
 0xd3d   :  { %v4575_v39 = vpop.eup %4574  ;;  %v1906_v40 = vsel %vm1904_vm8, %v1905_v37, %v1903_v38 }
 0xd3e   :  { %v1908_v41 = vmul.f32 %v4575_v39, %v1899_v34  ;;  %v1914_v42 = vadd.f32 1e-06, %v1906_v40 }
 0xd40   :  { %v1910_v44 = vsel %vm1909_vm9, %v1899_v34, %v1908_v41  ;;  %4576 = vrcp.f32 %v1914_v42 }
 0xd41   :  { %v1913_v45 = vsel %vm1911_vm10, %v1912_v43, %v1910_v44 }
 0xd42   :  { %v1915_v46 = vadd.f32 1e-06, %v1913_v45 }
 0xd44   :  { %4578 = vrcp.f32 %v1915_v46 }
 0xd4a   :  { %v4577_v48 = vpop.eup %4576 }
 0xd4b   :  { %v1926_v52 = vmul.f32 %v4577_v48, %v1924_v47 }
 0xd4d   :  { %v5358_v54 = vadd.f32 %v3985_v51, %v1926_v52 }
 0xd4e   :  { %v4579_v55 = vpop.eup %4578 }
 0xd4f   :  { %v1927_v58 = vmul.f32 %v4579_v55, %v1925_v53  ;;  %4288 = vmatprep.mubr.msk.f32.mxu1 %vm195_vm0, %v5358_v54 }
 0xd51   :  { %v5362_v59 = vadd.f32 %v3985_v51, %v1927_v58 }
 0xd53   :  { %4289 = vmatmul.mubr.msk.f32.vlgmr.msra.gmra.mrb[22].mxu1 %vm195_vm0, %v5362_v59 }
 0xd54   :  { %4485 = vmatpush3.bf16.msra.mxu1 %v4482_v31  ;;  %4310 = vmatprep.mubr.msk.f32.mxu1 %vm195_vm0, %v177_v27 }
 0xd55   :  { %4487 = vmatprep.subr.bf16.mxu1 %v4486_v60 }
 0xd58   :  { %4489 = vmatpush3.bf16.msra.mxu1 %v4486_v60 }
 0xd59   :  { %4318 = vmatprep.subr.mxu1 %v4848_v14 }
 0xd5b   :  { %4311 = vmatmul.mubr.msk.f32.vlgmr.msra.gmra.mrb[24].mxu1 %vm195_vm0, %v178_v28 }
 0xd5c   :  { %4320 = vmatprep.mubr.msk.f32.mxu1 %vm4849_vm1, %v4848_v14 }
 0xd61   :  { %4319 = vmatpush3.xpose.msk.msra.mxu1 %vm435_vm2, %v5371_v17 }
 0xd62   :  { %4328 = vmatprep.subr.mxu1 %v4848_v14 }
 0xe26   :  { %v4290_v20 = vpop.f32.mrb[22].mxu1 }
 0xe27   :  { %v5381_v61 = vmul.f32 0.17677669, %v4290_v20  ;;  %v2024_v62 = vpop.f32.mrb[23].mxu1 }
 0xe28   :  { %v5383_v63 = vmul.f32 0.17677669, %v2024_v62 }
 0xe29   :  { %4321 = vmatmul.mubr.msk.f32.vlgmr.msra.gmra.mrb[26].mxu1 %vm435_vm2, %v5381_v61 }
 0xe2a   :  { %4316 = vmatmul.mubr.msk.f32.vlgmr.msra.gmra.mrb[20].mxu0 %vm435_vm2, %v5383_v63  ;;  %4330 = vmatprep.mubr.msk.f32.mxu1 %vm4849_vm1, %v4848_v14 }
 0xe2b   :  { %4325 = vmatprep.mubr.msk.f32.mxu0 %vm4849_vm1, %v4848_v14 }
 0xe2e   :  { %v5393_v0 = vpop.f32.mrb[24].mxu1 }
 0xe2f   :  { %v5395_v1 = vpop.f32.mrb[25].mxu1  ;;  %4329 = vmatpush3.msra.mxu1 %v5393_v0 }
 0xe30   :  { %4324 = vmatpush3.msra.mxu0 %v5395_v1  ;;  %4338 = vmatprep.subr.mxu1 %v4848_v14 }
 0xe31   :  { %4333 = vmatprep.subr.mxu0 %v4848_v14 }
 0xefc   :  { %v2339_v2 = vpop.f32.mrb[26].mxu1 }
 0xefd   :  { %v2263_v3 = vpop.f32.mrb[20].mxu0  ;;  %v4322_v4 = vpop.f32.mrb[27].mxu1  ;;  %v2346_v6 = vsel %vm435_vm2, %v2339_v2, -inf }
 0xefe   :  { %2347 = vmax.xlane.f32.xlu1 %v2346_v6  ;;  %v4317_v19 = vpop.f32.mrb[21].mxu0  ;;  %v2343_v7 = vsel %vm435_vm2, %v2263_v3, -inf }
 0xeff   :  { %2344 = vmax.xlane.f32.xlu0 %v2343_v7 }
 0xf8b   :  { %v2348_v8 = vpop.xlane.xlu1 %2347 }
 0xf8c   :  { %v2350_v12 = vsub.f32 %v2339_v2, %v2348_v8  ;;  %v2345_v5 = vpop.xlane.xlu0 %2344 }
 0xf8d   :  { %v2349_v9 = vsub.f32 %v2263_v3, %v2345_v5 }
 0xf8e   :  { %v2353_v10 = vmul.f32 1.442695, %v2350_v12 }
 0xf8f   :  { %v2351_v11 = vmul.f32 1.442695, %v2349_v9 }
 0xf90   :  { %4580 = vpow2.f32 %v2353_v10 }
 0xf91   :  { %4582 = vpow2.f32 %v2351_v11 }
 0xf9a   :  { %v4581_v13 = vpop.eup %4580 }
 0xf9b   :  { %v4583_v15 = vpop.eup %4582  ;;  %v2358_v16 = vsel %vm435_vm2, %v4581_v13, 0.0 }
 0xf9c   :  { %2359 = vadd.xlane.f32.xlu1 %v2358_v16  ;;  %v2355_v21 = vsel %vm435_vm2, %v4583_v15, 0.0 }
 0xf9d   :  { %2356 = vadd.xlane.f32.xlu0 %v2355_v21 }
 0xfad   :  { %2593 = vrot.lane.b32.xlu1 %v5371_v17, %s4850_s11 }
 0xfb1   :  { %2513 = vrot.lane.b32.xlu1 %v5383_v63, %s4850_s11 }
 0xfb3   :  { %2515 = vrot.lane.b32.xlu0 %v5373_v18, %s4850_s11 }
 0xfb5   :  { %2591 = vrot.lane.b32.xlu1 %v5381_v61, %s4850_s11 }
0x1029   :  { %v2360_v22 = vpop.xlane.xlu1 %2359 }
0x102a   :  { %4584 = vrcp.f32 %v2360_v22  ;;  %v2357_v23 = vpop.xlane.xlu0 %2356 }
0x102b   :  { %4586 = vrcp.f32 %v2357_v23 }
0x102d   :  { %v2594_v24 = vpop.permute.xlu1 %2593 }
0x102e   :  { %v2516_v29 = vpop.permute.xlu0 %2515 }
0x1031   :  { %v2514_v26 = vpop.permute.xlu1 %2513 }
0x1034   :  { %v4585_v25 = vpop.eup %4584 }
0x1035   :  { %v4587_v27 = vpop.eup %4586  ;;  %v2364_v28 = vmul.f32 %v4585_v25, %v4581_v13  ;;  %v2592_v31 = vpop.permute.xlu1 %2591 }
0x1036   :  { %v2363_v30 = vmul.f32 %v4587_v27, %v4583_v15 }
0x1037   :  { %4331 = vmatmul.mubr.msk.f32.vlgmr.msra.gmra.mrb[28].mxu1 %vm435_vm2, %v2364_v28 }
0x1038   :  { %4339 = vmatpush3.xpose.msk.msra.mxu1 %vm435_vm2, %v2594_v24  ;;  %4326 = vmatmul.mubr.msk.f32.vlgmr.msra.gmra.mrb[22].mxu0 %vm435_vm2, %v2363_v30 }
0x1039   :  { %4334 = vmatpush3.xpose.msk.msra.mxu0 %vm435_vm2, %v2516_v29  ;;  %4340 = vmatprep.mubr.msk.f32.mxu1 %vm4849_vm1, %v4848_v14 }
0x103a   :  { %4335 = vmatprep.mubr.msk.f32.mxu0 %vm4849_vm1, %v4848_v14  ;;  %4348 = vmatprep.subr.mxu1 %v4848_v14 }
0x103b   :  { %4341 = vmatmul.mubr.msk.f32.vlgmr.msra.gmra.mrb[30].mxu1 %vm435_vm2, %v2592_v31  ;;  %4343 = vmatprep.subr.mxu0 %v4848_v14 }
0x103c   :  { %4336 = vmatmul.mubr.msk.f32.vlgmr.msra.gmra.mrb[24].mxu0 %vm435_vm2, %v2514_v26  ;;  %4350 = vmatprep.mubr.msk.f32.mxu1 %vm4849_vm1, %v4848_v14 }
0x103d   :  { %4345 = vmatprep.mubr.msk.f32.mxu0 %vm4849_vm1, %v4848_v14 }
0x110a   :  { %v2507_v32 = vpop.f32.mrb[28].mxu1 }
0x110b   :  { %2512 = vst.msk [vmem:[#allocation2 + $0x8] sm:$0xff] %vm435_vm2, %v2507_v32  ;;  %v2434_v49 = vpop.f32.mrb[22].mxu0  ;;  %v4332_v33 = vpop.f32.mrb[29].mxu1 }
0x110c   :  { %2511 = vst.msk [vmem:[#allocation2] sm:$0xff] %vm435_vm2, %v2434_v49  ;;  %v4327_v34 = vpop.f32.mrb[23].mxu0 }
0x110e   :  { %v2665_v35 = vpop.f32.mrb[30].mxu1 }
0x110f   :  { %v2587_v36 = vpop.f32.mrb[24].mxu0  ;;  %v4342_v37 = vpop.f32.mrb[31].mxu1  ;;  %v2672_v38 = vsel %vm435_vm2, %v2665_v35, -inf }
0x1110   :  { %2673 = vmax.xlane.f32.xlu1 %v2672_v38  ;;  %v4337_v39 = vpop.f32.mrb[25].mxu0  ;;  %v2669_v40 = vsel %vm435_vm2, %v2587_v36, -inf }
0x1111   :  { %2670 = vmax.xlane.f32.xlu0 %v2669_v40 }
0x1121   :  { %2769 = vrot.lane.b32.xlu1 %v5393_v0, %s4850_s11 }
0x1125   :  { %2857 = vrot.lane.b32.xlu1 %v5373_v18, %s4851_s22 }
0x1127   :  { %2692 = vrot.lane.b32.xlu0 %v5395_v1, %s4850_s11 }
0x1129   :  { %2935 = vrot.lane.b32.xlu1 %v5371_v17, %s4851_s22 }
0x112d   :  { %2933 = vrot.lane.b32.xlu1 %v5381_v61, %s4851_s22 }
0x119d   :  { %v2674_v41 = vpop.xlane.xlu1 %2673 }
0x119e   :  { %v2676_v42 = vsub.f32 %v2665_v35, %v2674_v41  ;;  %v2671_v43 = vpop.xlane.xlu0 %2670 }
0x119f   :  { %v2675_v44 = vsub.f32 %v2587_v36, %v2671_v43 }
0x11a0   :  { %v2679_v45 = vmul.f32 1.442695, %v2676_v42 }
0x11a1   :  { %v2677_v46 = vmul.f32 1.442695, %v2675_v44  ;;  %v2770_v50 = vpop.permute.xlu1 %2769 }
0x11a2   :  { %4588 = vpow2.f32 %v2679_v45  ;;  %4349 = vmatpush3.msra.mxu1 %v2770_v50  ;;  %v2693_v47 = vpop.permute.xlu0 %2692 }
0x11a3   :  { %4344 = vmatpush3.msra.mxu0 %v2693_v47  ;;  %4358 = vmatprep.subr.mxu1 %v4848_v14  ;;  %4590 = vpow2.f32 %v2677_v46 }
0x11a4   :  { %4353 = vmatprep.subr.mxu0 %v4848_v14 }
0x11a5   :  { %v2858_v57 = vpop.permute.xlu1 %2857 }
0x11a9   :  { %v2936_v60 = vpop.permute.xlu1 %2935 }
0x11ac   :  { %v4589_v48 = vpop.eup %4588 }
0x11ad   :  { %v2684_v51 = vsel %vm435_vm2, %v4589_v48, 0.0  ;;  %v4591_v52 = vpop.eup %4590  ;;  %v2934_v3 = vpop.permute.xlu1 %2933 }
0x11ae   :  { %2685 = vadd.xlane.f32.xlu0 %v2684_v51  ;;  %v2681_v53 = vsel %vm435_vm2, %v4591_v52, 0.0 }
0x11b2   :  { %2682 = vadd.xlane.f32.xlu0 %v2681_v53 }
0x11c8   :  { %2855 = vrot.lane.b32.xlu0 %v5383_v63, %s4851_s22 }
0x123b   :  { %v2686_v55 = vpop.xlane.xlu0 %2685 }
0x123c   :  { %4592 = vrcp.f32 %v2686_v55 }
0x123f   :  { %v2683_v56 = vpop.xlane.xlu0 %2682 }
0x1240   :  { %4594 = vrcp.f32 %v2683_v56 }
0x1243   :  { %v2856_v4 = vpop.permute.xlu0 %2855 }
0x1246   :  { %v4593_v58 = vpop.eup %4592 }
0x1247   :  { %v2690_v20 = vmul.f32 %v4593_v58, %v4589_v48 }
0x1249   :  { %4351 = vmatmul.mubr.msk.f32.vlgmr.msra.gmra.mrb[32].mxu1 %vm435_vm2, %v2690_v20 }
0x124a   :  { %v4595_v62 = vpop.eup %4594  ;;  %4359 = vmatpush3.xpose.msk.msra.mxu1 %vm435_vm2, %v2936_v60  ;;  %4360 = vmatprep.mubr.msk.f32.mxu1 %vm4849_vm1, %v4848_v14 }
0x124b   :  { %v2689_v2 = vmul.f32 %v4595_v62, %v4591_v52  ;;  %4368 = vmatprep.subr.mxu1 %v4848_v14 }
0x124d   :  { %4346 = vmatmul.mubr.msk.f32.vlgmr.msra.gmra.mrb[26].mxu0 %vm435_vm2, %v2689_v2  ;;  %4361 = vmatmul.mubr.msk.f32.vlgmr.msra.gmra.mrb[34].mxu1 %vm435_vm2, %v2934_v3 }
0x124e   :  { %4354 = vmatpush3.xpose.msk.msra.mxu0 %vm435_vm2, %v2858_v57  ;;  %4355 = vmatprep.mubr.msk.f32.mxu0 %vm4849_vm1, %v4848_v14 }
0x124f   :  { %4363 = vmatprep.subr.mxu0 %v4848_v14  ;;  %4370 = vmatprep.mubr.msk.f32.mxu1 %vm4849_vm1, %v4848_v14 }
0x1251   :  { %4356 = vmatmul.mubr.msk.f32.vlgmr.msra.gmra.mrb[28].mxu0 %vm435_vm2, %v2856_v4 }
0x1252   :  { %4365 = vmatprep.mubr.msk.f32.mxu0 %vm4849_vm1, %v4848_v14 }
0x131c   :  { %v5465_v6 = vpop.f32.mrb[32].mxu1 }
0x131d   :  { %v4352_v19 = vpop.f32.mrb[33].mxu1 }
0x1320   :  { %v5467_v7 = vpop.f32.mrb[26].mxu0  ;;  %v3007_v8 = vpop.f32.mrb[34].mxu1 }
0x1321   :  { %v4347_v12 = vpop.f32.mrb[27].mxu0  ;;  %v4362_v5 = vpop.f32.mrb[35].mxu1  ;;  %v3014_v9 = vsel %vm435_vm2, %v3007_v8, -inf }
0x1322   :  { %3015 = vmax.xlane.f32.xlu1 %v3014_v9  ;;  %v1950_v5 = vld [vmem:[#allocation14 + $0x10] sm:$0xff]  ;;  %v1951_v9 = vld [vmem:[#allocation14 + $0x18] sm:$0xff] }
0x1324   :  { %v2929_v10 = vpop.f32.mrb[28].mxu0 }
0x1325   :  { %v4357_v11 = vpop.f32.mrb[29].mxu0  ;;  %v3011_v13 = vsel %vm435_vm2, %v2929_v10, -inf }
0x1326   :  { %3012 = vmax.xlane.f32.xlu0 %v3011_v13 }
0x1333   :  { %3109 = vrot.lane.b32.xlu1 %v5393_v0, %s4851_s22 }
0x1337   :  { %3197 = vrot.lane.b32.xlu1 %v5373_v18, %s4852_s1 }
0x133b   :  { %3275 = vrot.lane.b32.xlu1 %v5371_v17, %s4852_s1 }
0x133c   :  { %3033 = vrot.lane.b32.xlu0 %v5395_v1, %s4851_s22 }
0x133f   :  { %3273 = vrot.lane.b32.xlu1 %v5381_v61, %s4852_s1 }
0x13af   :  { %v3016_v15 = vpop.xlane.xlu1 %3015 }
0x13b0   :  { %v3018_v16 = vsub.f32 %v3007_v8, %v3016_v15  ;;  %v1949_v8 = vld [vmem:[#allocation14 + $0x8] sm:$0xff] }
0x13b2   :  { %v3021_v21 = vmul.f32 1.442695, %v3018_v16 }
0x13b3   :  { %v3110_v22 = vpop.permute.xlu1 %3109  ;;  %v3013_v23 = vpop.xlane.xlu0 %3012 }
0x13b4   :  { %4596 = vpow2.f32 %v3021_v21  ;;  %v3017_v24 = vsub.f32 %v2929_v10, %v3013_v23  ;;  %4369 = vmatpush3.msra.mxu1 %v3110_v22  ;;  %v4494_v10 = vpack.c.bf16 %v1951_v9, %v1950_v5 }
0x13b5   :  { %4378 = vmatprep.subr.mxu1 %v4848_v14 }
0x13b6   :  { %v3019_v18 = vmul.f32 1.442695, %v3017_v24 }
0x13b7   :  { %v3034_v25 = vpop.permute.xlu0 %3033  ;;  %v3198_v29 = vpop.permute.xlu1 %3197 }
0x13b8   :  { %4598 = vpow2.f32 %v3019_v18  ;;  %4364 = vmatpush3.msra.mxu0 %v3034_v25 }
0x13b9   :  { %4373 = vmatprep.subr.mxu0 %v4848_v14 }
0x13bb   :  { %v3276_v32 = vpop.permute.xlu1 %3275 }
0x13be   :  { %v4597_v17 = vpop.eup %4596 }
0x13bf   :  { %v3026_v26 = vsel %vm435_vm2, %v4597_v17, 0.0 }
0x13c0   :  { %3027 = vadd.xlane.f32.xlu0 %v3026_v26 }
0x13c2   :  { %v4599_v61 = vpop.eup %4598 }
0x13c3   :  { %v3023_v27 = vsel %vm435_vm2, %v4599_v61, 0.0 }
0x13c4   :  { %3024 = vadd.xlane.f32.xlu0 %v3023_v27 }
0x13da   :  { %3195 = vrot.lane.b32.xlu0 %v5383_v63, %s4852_s1  ;;  %v3274_v63 = vpop.permute.xlu1 %3273 }
0x144d   :  { %v3028_v28 = vpop.xlane.xlu0 %3027 }
0x144e   :  { %4600 = vrcp.f32 %v3028_v28 }
0x1451   :  { %v3025_v30 = vpop.xlane.xlu0 %3024 }
0x1452   :  { %4602 = vrcp.f32 %v3025_v30 }
0x1455   :  { %v3196_v35 = vpop.permute.xlu0 %3195 }
0x1458   :  { %v4601_v31 = vpop.eup %4600 }
0x1459   :  { %v3032_v49 = vmul.f32 %v4601_v31, %v4597_v17 }
0x145b   :  { %4371 = vmatmul.mubr.msk.f32.vlgmr.msra.gmra.mrb[36].mxu1 %vm435_vm2, %v3032_v49 }
0x145c   :  { %v4603_v33 = vpop.eup %4602  ;;  %4379 = vmatpush3.xpose.msk.msra.mxu1 %vm435_vm2, %v3276_v32  ;;  %4380 = vmatprep.mubr.msk.f32.mxu1 %vm4849_vm1, %v4848_v14 }
0x145d   :  { %v3031_v34 = vmul.f32 %v4603_v33, %v4599_v61  ;;  %4388 = vmatprep.subr.mxu1 %v4848_v14 }
0x145f   :  { %4366 = vmatmul.mubr.msk.f32.vlgmr.msra.gmra.mrb[30].mxu0 %vm435_vm2, %v3031_v34  ;;  %4381 = vmatmul.mubr.msk.f32.vlgmr.msra.gmra.mrb[38].mxu1 %vm435_vm2, %v3274_v63 }
0x1460   :  { %4374 = vmatpush3.xpose.msk.msra.mxu0 %vm435_vm2, %v3198_v29  ;;  %4375 = vmatprep.mubr.msk.f32.mxu0 %vm4849_vm1, %v4848_v14 }
0x1461   :  { %4383 = vmatprep.subr.mxu0 %v4848_v14  ;;  %4390 = vmatprep.mubr.msk.f32.mxu1 %vm4849_vm1, %v4848_v14 }
0x1463   :  { %4376 = vmatmul.mubr.msk.f32.vlgmr.msra.gmra.mrb[32].mxu0 %vm435_vm2, %v3196_v35  ;;  %v3679_v35 = vld [vmem:[#allocation15 + $0x8] sm:$0xff] }
0x1464   :  { %4385 = vmatprep.mubr.msk.f32.mxu0 %vm4849_vm1, %v4848_v14 }
0x152e   :  { %v3181_v36 = vpop.f32.mrb[36].mxu1 }
0x152f   :  { %v4372_v37 = vpop.f32.mrb[37].mxu1 }
0x1532   :  { %v3105_v38 = vpop.f32.mrb[30].mxu0  ;;  %v3347_v39 = vpop.f32.mrb[38].mxu1 }
0x1533   :  { %v4367_v40 = vpop.f32.mrb[31].mxu0  ;;  %v4382_v41 = vpop.f32.mrb[39].mxu1  ;;  %v3354_v42 = vsel %vm435_vm2, %v3347_v39, -inf }
0x1534   :  { %3355 = vmax.xlane.f32.xlu1 %v3354_v42  ;;  %v3772_v40 = vld [vmem:[%s5616_s16] sm:$0xff]  ;;  %v3773_v41 = vld [vmem:[%s5616_s16 + $0x8] sm:$0xff]  ;;  %v3774_v42 = vld [vmem:[%s5616_s16 + $0x10] sm:$0xff] }
0x1536   :  { %v3269_v43 = vpop.f32.mrb[32].mxu0 }
0x1537   :  { %v4377_v44 = vpop.f32.mrb[33].mxu0  ;;  %v3351_v45 = vsel %vm435_vm2, %v3269_v43, -inf }
0x1538   :  { %3352 = vmax.xlane.f32.xlu0 %v3351_v45  ;;  %v3775_v44 = vld [vmem:[%s5616_s16 + $0x18] sm:$0xff] }
0x1539   :  { %v4510_v45 = vpack.c.bf16 %v3775_v44, %v3774_v42 }
0x1545   :  { %3449 = vrot.lane.b32.xlu1 %v5393_v0, %s4852_s1 }
0x1549   :  { %2847 = vrot.lane.b32.xlu1 %v5467_v7, %s4841_s21 }
0x154d   :  { %2849 = vrot.lane.b32.xlu1 %v5465_v6, %s4841_s21 }
0x1551   :  { %3189 = vrot.lane.b32.xlu1 %v3181_v36, %s4853_s2  ;;  %v3680_v36 = vld [vmem:[#allocation15 + $0x10] sm:$0xff] }
0x15c1   :  { %v3356_v14 = vpop.xlane.xlu1 %3355 }
0x15c2   :  { %v3358_v46 = vsub.f32 %v3347_v39, %v3356_v14  ;;  %v3776_v14 = vld [vmem:[%s5616_s16 + $0x20] sm:$0xff] }
0x15c4   :  { %v3361_v50 = vmul.f32 1.442695, %v3358_v46  ;;  %v3777_v46 = vld [vmem:[%s5616_s16 + $0x28] sm:$0xff] }
0x15c5   :  { %v3450_v47 = vpop.permute.xlu1 %3449  ;;  %v3353_v48 = vpop.xlane.xlu0 %3352 }
0x15c6   :  { %4604 = vpow2.f32 %v3361_v50  ;;  %v3357_v51 = vsub.f32 %v3269_v43, %v3353_v48  ;;  %4389 = vmatpush3.msra.mxu1 %v3450_v47  ;;  %v4506_v43 = vpack.c.bf16 %v3773_v41, %v3772_v40  ;;  %v4514_v50 = vpack.c.bf16 %v3777_v46, %v3776_v14 }
0x15c8   :  { %v3359_v52 = vmul.f32 1.442695, %v3357_v51 }
0x15c9   :  { %v2848_v53 = vpop.permute.xlu1 %2847 }
0x15ca   :  { %4606 = vpow2.f32 %v3359_v52  ;;  %2853 = vst.msk [vmem:[#allocation2] sm:$0xff] %vm1102_vm4, %v2848_v53 }
0x15cd   :  { %v2850_v0 = vpop.permute.xlu1 %2849 }
0x15ce   :  { %2854 = vst.msk [vmem:[#allocation2 + $0x8] sm:$0xff] %vm1102_vm4, %v2850_v0 }
0x15d0   :  { %v4605_v55 = vpop.eup %4604 }
0x15d1   :  { %v3190_v56 = vpop.permute.xlu1 %3189  ;;  %v3366_v57 = vsel %vm435_vm2, %v4605_v55, 0.0 }
0x15d2   :  { %3194 = vst.msk [vmem:[#allocation2 + $0x8] sm:$0xff] %vm1445_vm5, %v3190_v56  ;;  %3367 = vadd.xlane.f32.xlu0 %v3366_v57 }
0x15d4   :  { %v4607_v58 = vpop.eup %4606 }
0x15d5   :  { %v3363_v60 = vsel %vm435_vm2, %v4607_v58, 0.0 }
0x15d6   :  { %3364 = vadd.xlane.f32.xlu0 %v3363_v60 }
0x15ec   :  { %3373 = vrot.lane.b32.xlu0 %v5395_v1, %s4852_s1  ;;  %v1948_v1 = vld [vmem:[#allocation14] sm:$0xff] }
0x15ed   :  { %v4490_v12 = vpack.c.bf16 %v1949_v8, %v1948_v1  ;;  %v4019_v1 = vld [vmem:[%s5613_s13] ss:$0 sm:$0xff] }
0x15f0   :  { %3187 = vrot.lane.b32.xlu0 %v3105_v38, %s4853_s2  ;;  %v3681_v38 = vld [vmem:[#allocation15 + $0x18] sm:$0xff] }
0x15f1   :  { %v4502_v39 = vpack.c.bf16 %v3681_v38, %v3680_v36 }
0x165f   :  { %v3368_v20 = vpop.xlane.xlu0 %3367 }
0x1660   :  { %4608 = vrcp.f32 %v3368_v20 }
0x1663   :  { %v3365_v62 = vpop.xlane.xlu0 %3364 }
0x1664   :  { %4610 = vrcp.f32 %v3365_v62 }
0x1667   :  { %v3374_v2 = vpop.permute.xlu0 %3373 }
0x1668   :  { %4384 = vmatpush3.msra.mxu0 %v3374_v2 }
0x1669   :  { %4491 = vmatprep.subr.bf16.mxu0 %v4490_v12 }
0x166a   :  { %v4609_v3 = vpop.eup %4608 }
0x166b   :  { %v3372_v4 = vmul.f32 %v4609_v3, %v4605_v55  ;;  %v3188_v6 = vpop.permute.xlu0 %3187 }
0x166c   :  { %3193 = vst.msk [vmem:[#allocation2] sm:$0xff] %vm1445_vm5, %v3188_v6  ;;  %v4018_v6 = vld [vmem:[%s5612_s12] ss:$0 sm:$0xff] }
0x166d   :  { %4391 = vmatmul.mubr.msk.f32.vlgmr.msra.gmra.mrb[40].mxu1 %vm435_vm2, %v3372_v4 }
0x166e   :  { %v4611_v19 = vpop.eup %4610 }
0x166f   :  { %v3371_v7 = vmul.f32 %v4611_v19, %v4607_v58 }
0x1671   :  { %4386 = vmatmul.mubr.msk.f32.vlgmr.msra.gmra.mrb[34].mxu0 %vm435_vm2, %v3371_v7 }
0x1672   :  { %4493 = vmatpush3.bf16.msra.mxu0 %v4490_v12 }
0x1673   :  { %4495 = vmatprep.subr.bf16.mxu0 %v4494_v10 }
0x1676   :  { %4497 = vmatpush3.bf16.msra.mxu0 %v4494_v10 }
0x1677   :  { %4507 = vmatprep.subr.bf16.mxu0 %v4506_v43 }
0x1740   :  { %v3521_v11 = vpop.f32.mrb[40].mxu1 }
0x1741   :  { %3529 = vrot.lane.b32.xlu1 %v3521_v11, %s4854_s26  ;;  %v4392_v13 = vpop.f32.mrb[41].mxu1 }
0x1742   :  { %v3778_v13 = vld [vmem:[%s5616_s16 + $0x30] sm:$0xff] }
0x1744   :  { %v3445_v15 = vpop.f32.mrb[34].mxu0 }
0x1745   :  { %3527 = vrot.lane.b32.xlu0 %v3445_v15, %s4854_s26  ;;  %v4387_v16 = vpop.f32.mrb[35].mxu0  ;;  %v3779_v15 = vld [vmem:[%s5616_s16 + $0x38] sm:$0xff] }
0x1746   :  { %v4518_v16 = vpack.c.bf16 %v3779_v15, %v3778_v13 }
0x17b3   :  { %v3530_v21 = vpop.permute.xlu1 %3529 }
0x17b4   :  { %3534 = vst.msk [vmem:[#allocation2 + $0x8] sm:$0xff] %vm1788_vm6, %v3530_v21  ;;  %v4020_v21 = vld [vmem:[%s5615_s15] ss:$0 sm:$0xff] }
0x17b7   :  { %v3528_v22 = vpop.permute.xlu0 %3527 }
0x17b8   :  { %3533 = vst.msk [vmem:[#allocation2] sm:$0xff] %vm1788_vm6, %v3528_v22 }
0x17bb   :  { %v3536_v24 = vld [vmem:[#allocation2 + $0x8] sm:$0xff] }
0x17bf   :  { %v3535_v23 = vld [vmem:[#allocation2] sm:$0xff] }
0x17c0   :  { %4401 = vmatprep.mubr.msk.f32.mxu0 %vm195_vm0, %v3535_v23 }
0x17c1   :  { %4402 = vmatmul.mubr.msk.f32.vlgmr.msra.gmra.mrb[36].mxu0 %vm195_vm0, %v3536_v24 }
0x17c2   :  { %4509 = vmatpush3.bf16.msra.mxu0 %v4506_v43 }
0x17c3   :  { %4511 = vmatprep.subr.bf16.mxu0 %v4510_v45 }
0x17c6   :  { %4513 = vmatpush3.bf16.msra.mxu0 %v4510_v45 }
0x17c7   :  { %4515 = vmatprep.subr.bf16.mxu0 %v4514_v50 }
0x17ca   :  { %4517 = vmatpush3.bf16.msra.mxu0 %v4514_v50 }
0x17cb   :  { %4519 = vmatprep.subr.bf16.mxu0 %v4518_v16 }
0x17ce   :  { %4521 = vmatpush3.bf16.msra.mxu0 %v4518_v16 }
0x1894   :  { %v4403_v18 = vpop.f32.mrb[36].mxu0 }
0x1895   :  { %v3619_v25 = vadd.f32 %v4403_v18, %v5362_v59  ;;  %v3609_v17 = vpop.f32.mrb[37].mxu0 }
0x1896   :  { %v3618_v26 = vadd.f32 %v3609_v17, %v5358_v54  ;;  %v3678_v54 = vld [vmem:[#allocation15] sm:$0xff] }
0x1897   :  { %v3625_v61 = vsel %vm195_vm0, %v3619_v25, 0.0  ;;  %v4498_v37 = vpack.c.bf16 %v3679_v35, %v3678_v54 }
0x1898   :  { %3626 = vadd.xlane.f32.xlu1 %v3625_v61  ;;  %v3622_v27 = vsel %vm195_vm0, %v3618_v26, 0.0 }
0x1899   :  { %3623 = vadd.xlane.f32.xlu0 %v3622_v27  ;;  %4499 = vmatprep.subr.bf16.mxu1 %v4498_v37 }
0x189a   :  { %4501 = vmatpush3.bf16.msra.mxu1 %v4498_v37 }
0x189b   :  { %4503 = vmatprep.subr.bf16.mxu1 %v4502_v39 }
0x189e   :  { %4505 = vmatpush3.bf16.msra.mxu1 %v4502_v39 }
0x1925   :  { %v3627_v28 = vpop.xlane.xlu1 %3626 }
0x1926   :  { %v3629_v30 = vmul.f32 0.03125, %v3627_v28  ;;  %v3624_v29 = vpop.xlane.xlu0 %3623 }
0x1927   :  { %v3628_v31 = vmul.f32 0.03125, %v3624_v29 }
0x1928   :  { %v3631_v32 = vsub.f32 %v3619_v25, %v3629_v30 }
0x1929   :  { %v3630_v49 = vsub.f32 %v3618_v26, %v3628_v31  ;;  %v4023_v26 = vld [vmem:[%s5617_s17] ss:$0 sm:$0xff] }
0x192a   :  { %v3633_v63 = vmul.f32 %v3631_v32, %v3631_v32  ;;  %v3667_v12 = vmul.f32 %v4018_v6, %v3631_v32 }
0x192b   :  { %v3632_v33 = vmul.f32 %v3630_v49, %v3630_v49  ;;  %v3666_v19 = vmul.f32 %v4018_v6, %v3630_v49 }
0x192c   :  { %v3637_v59 = vsel %vm195_vm0, %v3633_v63, 0.0 }
0x192d   :  { %v3634_v34 = vsel %vm195_vm0, %v3632_v33, 0.0 }
0x192e   :  { %3635 = vadd.xlane.f32.xlu0 %v3634_v34 }
0x1932   :  { %3638 = vadd.xlane.f32.xlu0 %v3637_v59 }
0x19bb   :  { %v3636_v47 = vpop.xlane.xlu0 %3635 }
0x19bc   :  { %v3640_v48 = vmul.f32 0.032258064, %v3636_v47 }
0x19be   :  { %4612 = vrsqrt.f32 %v3640_v48  ;;  %vm3644_vm11 = vcmp.eq.f32.partialorder %v3640_v48, inf  ;;  %v3647_v55 = vand.u32 2147483648, %v3640_v48  ;;  %vm3646_vm12 = vcmp.eq.f32.partialorder %v3640_v48, 0.0 }
0x19bf   :  { %v3639_v51 = vpop.xlane.xlu0 %3638 }
0x19c0   :  { %v3641_v52 = vmul.f32 0.032258064, %v3639_v51 }
0x19c2   :  { %4614 = vrsqrt.f32 %v3641_v52  ;;  %vm3651_vm13 = vcmp.eq.f32.partialorder %v3641_v52, inf  ;;  %v3654_v62 = vand.u32 2147483648, %v3641_v52  ;;  %vm3653_vm14 = vcmp.eq.f32.partialorder %v3641_v52, 0.0 }
0x19c8   :  { %v4613_v53 = vpop.eup %4612 }
0x19c9   :  { %v3643_v0 = vmul.f32 %v4613_v53, %v3640_v48 }
0x19cb   :  { %v3645_v56 = vsel %vm3644_vm11, %v3640_v48, %v3643_v0 }
0x19cc   :  { %v4615_v57 = vpop.eup %4614  ;;  %v3648_v58 = vsel %vm3646_vm12, %v3647_v55, %v3645_v56  ;;  %v4026_v56 = vld [vmem:[%s5618_s18] ss:$0 sm:$0xff]  ;;  %s4804_s18 = scalar_lea.vmem %s3937_s20, 256 }
0x19cd   :  { %v3650_v60 = vmul.f32 %v4615_v57, %v3641_v52  ;;  %v3656_v20 = vadd.f32 1e-06, %v3648_v58  ;;  %p4805_p8 = scmp.ne.s32.totalorder %s3937_s20, %s4804_s18  ;;  %p4810_p10 = scmp.lt.s32.totalorder %s4804_s18, %s4804_s18 }
0x19cf   :  { %v3652_v2 = vsel %vm3651_vm13, %v3641_v52, %v3650_v60  ;;  %4616 = vrcp.f32 %v3656_v20  ;;  %v4027_v20 = vld [vmem:[%s5619_s19] ss:$0 sm:$0xff]  ;;  %p4811_p11 = por %p4810_p10, %p4809_p9 }
0x19d0   :  { %v3655_v3 = vsel %vm3653_vm14, %v3654_v62, %v3652_v2 }
0x19d1   :  { %v3657_v4 = vadd.f32 1e-06, %v3655_v3  ;;  %p4812_p12 = pnand %p4811_p11, %p4805_p8 }
0x19d3   :  { %4618 = vrcp.f32 %v3657_v4 }
0x19d9   :  { %v4617_v7 = vpop.eup %4616 }
0x19da   :  { %v3668_v8 = vmul.f32 %v4617_v7, %v3666_v19 }
0x19dc   :  { %v3676_v5 = vadd.f32 %v4019_v1, %v3668_v8 }
0x19dd   :  { %v4619_v9 = vpop.eup %4618 }
0x19de   :  { %v3669_v10 = vmul.f32 %v4619_v9, %v3667_v12  ;;  %4412 = vmatprep.mubr.msk.f32.mxu1 %vm195_vm0, %v3676_v5 }
0x19e0   :  { %v3677_v11 = vadd.f32 %v4019_v1, %v3669_v10 }
0x19e2   :  { %4413 = vmatmul.mubr.msk.f32.vlgmr.msra.gmra.mrb[42].mxu1 %vm195_vm0, %v3677_v11 }
0x1ab5   :  { %v4414_v22 = vpop.f32.mrb[42].mxu1 }
0x1ab6   :  { %v3767_v23 = vadd.f32 %v4414_v22, %v4020_v21  ;;  %v3761_v24 = vpop.f32.mrb[43].mxu1 }
0x1ab7   :  { %v3762_v18 = vadd.f32 %v4020_v21, %v3761_v24 }
0x1ab8   :  { %v3771_v17 = vmax.f32 %v3767_v23, 0.0 }
0x1ab9   :  { %v3770_v25 = vmax.f32 %v3762_v18, 0.0 }
0x1abb   :  { %4431 = vmatprep.mubr.msk.f32.mxu0 %vm3787_vm15, %v3770_v25 }
0x1abc   :  { %4432 = vmatmul.mubr.msk.f32.vlgmr.msra.gmra.mrb[38].mxu0 %vm3787_vm15, %v3771_v17 }
0x1b8f   :  { %v4433_v61 = vpop.f32.mrb[38].mxu0 }
0x1b90   :  { %v3866_v27 = vadd.f32 %v4433_v61, %v4023_v26  ;;  %v3860_v28 = vpop.f32.mrb[39].mxu0 }
0x1b91   :  { %v3861_v30 = vadd.f32 %v4023_v26, %v3860_v28 }
0x1b92   :  { %v3870_v29 = vadd.f32 %v3866_v27, %v3677_v11 }
0x1b93   :  { %v3869_v31 = vadd.f32 %v3861_v30, %v3676_v5 }
0x1b94   :  { %v3876_v32 = vsel %vm195_vm0, %v3870_v29, 0.0 }
0x1b95   :  { %3877 = vadd.xlane.f32.xlu1 %v3876_v32  ;;  %v3873_v49 = vsel %vm195_vm0, %v3869_v31, 0.0 }
0x1b96   :  { %3874 = vadd.xlane.f32.xlu0 %v3873_v49 }
0x1c22   :  { %v3878_v33 = vpop.xlane.xlu1 %3877 }
0x1c23   :  { %v3880_v34 = vmul.f32 0.03125, %v3878_v33  ;;  %v3875_v63 = vpop.xlane.xlu0 %3874 }
0x1c24   :  { %v3879_v59 = vmul.f32 0.03125, %v3875_v63 }
0x1c25   :  { %v3882_v54 = vsub.f32 %v3870_v29, %v3880_v34 }
0x1c26   :  { %v3881_v35 = vsub.f32 %v3869_v31, %v3879_v59 }
0x1c27   :  { %v3884_v36 = vmul.f32 %v3882_v54, %v3882_v54  ;;  %v3918_v57 = vmul.f32 %v4026_v56, %v3882_v54 }
0x1c28   :  { %v3883_v37 = vmul.f32 %v3881_v35, %v3881_v35  ;;  %v3917_v60 = vmul.f32 %v4026_v56, %v3881_v35 }
0x1c29   :  { %v3888_v38 = vsel %vm195_vm0, %v3884_v36, 0.0 }
0x1c2a   :  { %3889 = vadd.xlane.f32.xlu1 %v3888_v38  ;;  %v3885_v39 = vsel %vm195_vm0, %v3883_v37, 0.0 }
0x1c2b   :  { %3886 = vadd.xlane.f32.xlu0 %v3885_v39 }
0x1cb7   :  { %v3890_v40 = vpop.xlane.xlu1 %3889 }
0x1cb8   :  { %v3892_v41 = vmul.f32 0.032258064, %v3890_v40  ;;  %v3887_v42 = vpop.xlane.xlu0 %3886 }
0x1cb9   :  { %v3891_v43 = vmul.f32 0.032258064, %v3887_v42 }
0x1cba   :  { %4620 = vrsqrt.f32 %v3892_v41  ;;  %vm3902_vm1 = vcmp.eq.f32.partialorder %v3892_v41, inf  ;;  %v3905_v46 = vand.u32 2147483648, %v3892_v41  ;;  %vm3904_vm2 = vcmp.eq.f32.partialorder %v3892_v41, 0.0 }
0x1cbb   :  { %4622 = vrsqrt.f32 %v3891_v43  ;;  %vm3895_vm3 = vcmp.eq.f32.partialorder %v3891_v43, inf  ;;  %v3898_v48 = vand.u32 2147483648, %v3891_v43  ;;  %vm3897_vm4 = vcmp.eq.f32.partialorder %v3891_v43, 0.0 }
0x1cc4   :  { %v4621_v44 = vpop.eup %4620 }
0x1cc5   :  { %v4623_v45 = vpop.eup %4622  ;;  %v3901_v14 = vmul.f32 %v4621_v44, %v3892_v41 }
0x1cc6   :  { %v3894_v50 = vmul.f32 %v4623_v45, %v3891_v43 }
0x1cc7   :  { %v3903_v47 = vsel %vm3902_vm1, %v3892_v41, %v3901_v14 }
0x1cc8   :  { %v3906_v51 = vsel %vm3904_vm2, %v3905_v46, %v3903_v47  ;;  %v3896_v52 = vsel %vm3895_vm3, %v3891_v43, %v3894_v50 }
0x1cc9   :  { %v3908_v53 = vadd.f32 1e-06, %v3906_v51  ;;  %v3899_v0 = vsel %vm3897_vm4, %v3898_v48, %v3896_v52 }
0x1cca   :  { %v3907_v55 = vadd.f32 1e-06, %v3899_v0 }
0x1ccb   :  { %4624 = vrcp.f32 %v3908_v53 }
0x1ccc   :  { %4626 = vrcp.f32 %v3907_v55 }
0x1cd5   :  { %v4625_v58 = vpop.eup %4624 }
0x1cd6   :  { %v4627_v62 = vpop.eup %4626  ;;  %v3920_v2 = vmul.f32 %v4625_v58, %v3918_v57 }
0x1cd7   :  { %v3919_v3 = vmul.f32 %v4627_v62, %v3917_v60 }
0x1cd8   :  { %v3928_v4 = vadd.f32 %v4027_v20, %v3920_v2 }
0x1cd9   :  { %v3927_v6 = vadd.f32 %v4027_v20, %v3919_v3 }
0x1cda   :  { %3930 = vst.msk [vmem:[#allocation17 + $0x8] sm:$0xff] %vm195_vm0, %v3928_v4 }
0x1cdb   :  { %3929 = vst.msk [vmem:[#allocation17] sm:$0xff] %vm195_vm0, %v3927_v6 }
0x1cdc   :  { %4815 = shalt.err (!%p4812_p12)
}
0x1cdd   :  { %s5638_s11 = sld [smem:[#allocation29_spill]] }
0x1ce3   :  { %s4816_s28 = scalar_lea.hbm %s5638_s11, 256 }
0x1ce4   :  { %p4817_p13 = scmp.ne.s32.totalorder %s5638_s11, %s4816_s28  ;;  %p4820_p0 = scmp.lt.u32.totalorder %s4816_s28, %s5638_s11 }
0x1ce6   :  { %p4822_p1 = pnand %p4820_p0, %p4817_p13 }
0x1ce8   :  { %4825 = shalt.err (!%p4822_p1)
}
0x1ce9   :  { %3942 = dma.vmem_to_hbm [thread:$0]  %s3937_s20, 256, %s5638_s11, [#allocation5], %s4840_s0, %s4840_s0, %s4841_s21  }
0x1cea   :  { %4836 = dma.done.wait [#allocation5], 256  }
0x1ceb   :  { %4837 = vsyncadd [#allocation5], 4294967040 }
0x1cec   :  { %3946 = vsyncpa [#allocation4], 1 }
0x1ced   :  { %3947 = vsyncpa [#allocation7], 1 }
0x1cee   :  { %3948 = vsyncpa [#allocation10], 1 }
0x1cef   :  { %3949 = vsyncpa [#allocation13], 1 }
0x1cf0   :  { %3950 = vsyncpa [#allocation16], 1 }
0x1cf1   :  { %3951 = vsyncpa [#allocation5], 1 }

</bundles_post_ra>
